<compile_context>
chip_gen: v6e
topology: v6e:2x2x1
jax: 0.10.0
libtpu: 0.0.40
codegen_flags: <defaults>
</compile_context>

<pallas_src>
from typing import Dict, Tuple

import jax
import jax.numpy as jnp
import numpy as np
from jax.experimental import pallas as pl
from jax.experimental.pallas import tpu as pltpu


# -----------------------------------------------------------------------------
# Helpers / global tiling knobs
# -----------------------------------------------------------------------------
def _cdiv(a: int, b: int) -> int:
    return -(-a // b)


def _round_up(x: int, m: int) -> int:
    return ((x + m - 1) // m) * m


_TM_CAP = 512     # M tile cap (sublane dim of A / out blocks)
_TN_CAP = 512     # N tile cap (lane dim of B / out blocks, multiple of 128 when tiled)
_TK_CAP = 1024    # K tile cap (single full-K block whenever K <= 1024)


def _vmem_limit_bytes() -> int:
    # v5e / v6e have 128 MiB physical VMEM -> use ~96 MiB; v7x has 64 MiB -> ~48 MiB.
    try:
        cap = int(pltpu.get_tpu_info().vmem_capacity_bytes)
        return max(32 << 20, min(96 << 20, (cap * 3) // 4))
    except Exception:
        return 48 << 20   # safe on every generation


_VMEM_LIMIT = _vmem_limit_bytes()


# -----------------------------------------------------------------------------
# Tiled matmul + bias + ReLU kernel (shared by conv-as-im2col and fc layers)
# -----------------------------------------------------------------------------
def _matmul_bias_relu_kernel(a_ref, b_ref, bias_ref, o_ref, acc_ref):
    @pl.when(pl.program_id(2) == 0)
    def _init():
        acc_ref[...] = jnp.zeros_like(acc_ref)

    acc_ref[...] += jnp.dot(a_ref[...], b_ref[...],
                            preferred_element_type=jnp.float32)

    @pl.when(pl.program_id(2) == pl.num_programs(2) - 1)
    def _finalize():
        # f32 epilogue on the f32 accumulator, then a single narrow cast on store.
        o_ref[...] = jnp.maximum(acc_ref[...] + bias_ref[...], 0.0).astype(o_ref.dtype)


def matmul_bias_relu(a: jax.Array, w: jax.Array, bias: jax.Array,
                     out_dtype=jnp.bfloat16) -> jax.Array:
    """relu(a @ w + bias).

    a    : (M, K) activations (cast to bf16 for the MXU, f32 accumulate)
    w    : (Kp, N) bf16 weights, Kp >= K (K zero-padded once in prepare_params)
    bias : (N,) or (1, N) f32
    Output (M, N) in `out_dtype` (bf16 between layers).  Ragged M / N edges are
    handled by Pallas block masking -> no per-call pad / slice HBM copies.
    """
    M, K = a.shape
    Kp, N = w.shape
    assert Kp >= K, (Kp, K)

    a = a.astype(jnp.bfloat16)
    if Kp > K:                                    # K padding (reduction correctness)
        a = jnp.pad(a, ((0, 0), (0, Kp - K)))
        K = Kp
    bias = bias.reshape(1, N).astype(jnp.float32)

    # K tiling: one full-K block when it fits, else 1024-wide blocks.
    if K <= _TK_CAP:
        tk = K
    else:
        tk = _TK_CAP
        if K % tk:
            pad = _round_up(K, tk) - K
            a = jnp.pad(a, ((0, 0), (0, pad)))
            w = jnp.pad(w, ((0, pad), (0, 0)))
            K += pad

    tm = M if M <= _TM_CAP else _TM_CAP
    tn = N if N <= _TN_CAP else _TN_CAP
    # Megacore (v7x has 2 TensorCores): ensure >=2 blocks on a "parallel" axis if possible.
    if _cdiv(M, tm) == 1 and _cdiv(N, tn) == 1:
        if N >= 256 and N % 256 == 0:
            tn = N // 2
        elif M >= 16:
            tm = _round_up(_cdiv(M, 2), 8)

    grid = (_cdiv(M, tm), _cdiv(N, tn), K // tk)

    # TODO(synk): if weight DMA is still exposed at large K, sweep
    # pipeline_mode=pl.Buffered(3) on the weight BlockSpec.
    return pl.pallas_call(
        _matmul_bias_relu_kernel,
        out_shape=jax.ShapeDtypeStruct((M, N), out_dtype),
        grid_spec=pltpu.PrefetchScalarGridSpec(
            num_scalar_prefetch=0,
            grid=grid,
            in_specs=[
                pl.BlockSpec((tm, tk), lambda i, j, k: (i, k)),
                pl.BlockSpec((tk, tn), lambda i, j, k: (k, j)),
                pl.BlockSpec((1, tn), lambda i, j, k: (0, j)),
            ],
            out_specs=pl.BlockSpec((tm, tn), lambda i, j, k: (i, j)),
            scratch_shapes=[pltpu.VMEM((tm, tn), jnp.float32)],
        ),
        compiler_params=pltpu.CompilerParams(
            dimension_semantics=("parallel", "parallel", "arbitrary"),
            vmem_limit_bytes=_VMEM_LIMIT,
        ),
        cost_estimate=pl.CostEstimate(
            flops=2 * M * N * K,
            transcendentals=0,
            bytes_accessed=(M * K * 2 + K * N * 2 + N * 4
                            + M * N * jnp.dtype(out_dtype).itemsize),
        ),
    )(a, w, bias)


# -----------------------------------------------------------------------------
# Gridded 2x2 max-pool kernel (NHWC, bf16, single HBM pass, bounded VMEM blocks)
# -----------------------------------------------------------------------------
def _maxpool2x2_kernel(x_ref, o_ref):
    x = x_ref[...]                                      # (tr, 2, PW, 2, C)
    m = jnp.maximum(x[:, 0], x[:, 1])                   # H-pair max -> (tr, PW, 2, C)
    o_ref[...] = jnp.maximum(m[:, :, 0, :], m[:, :, 1, :])   # W-pair max -> (tr, PW, C)


def maxpool2x2_nhwc(x: jax.Array) -> jax.Array:
    # x: (B, H, W, C) -> (B, H//2, W//2, C); floor semantics of nn.MaxPool2d(2).
    B, H, W, C = x.shape
    PH, PW = H // 2, W // 2
    if H != 2 * PH or W != 2 * PW:
        x = x[:, :2 * PH, :2 * PW, :]                   # copy only for odd H/W
    R = B * PH
    x5 = x.reshape(R, 2, PW, 2, C)                      # metadata-only view of NHWC

    # Row tile: multiple of 8 (or the full R), bounded so the padded VMEM block stays
    # small on every generation (v7x has only 64 MiB VMEM).
    row_bytes = 2 * PW * 2 * C * x.dtype.itemsize
    tr = max(8, min(512, (1 << 19) // max(row_bytes, 1)))
    tr -= tr % 8
    if tr >= R:
        tr = R

    # TODO(synk): fuse the pool into the conv matmul epilogue (or the next conv's im2col)
    # so the pre-pool activation never round-trips HBM; also emit a lane-dense
    # (tr, PW*C) 2-D output slab instead of the (PW, C) trailing dims.
    out = pl.pallas_call(
        _maxpool2x2_kernel,
        out_shape=jax.ShapeDtypeStruct((R, PW, C), x.dtype),
        grid_spec=pltpu.PrefetchScalarGridSpec(
            num_scalar_prefetch=0,
            grid=(_cdiv(R, tr),),
            in_specs=[pl.BlockSpec((tr, 2, PW, 2, C), lambda r: (r, 0, 0, 0, 0))],
            out_specs=pl.BlockSpec((tr, PW, C), lambda r: (r, 0, 0)),
        ),
        compiler_params=pltpu.CompilerParams(
            dimension_semantics=("parallel",),
            vmem_limit_bytes=_VMEM_LIMIT,
        ),
    )(x5)
    return out.reshape(B, PH, PW, C)


# -----------------------------------------------------------------------------
# Conv2d (valid, stride 1) + ReLU = bf16 im2col (NHWC glue) + tiled Pallas matmul
# -----------------------------------------------------------------------------
def conv2d_relu_nhwc(x: jax.Array, w_mat: jax.Array, bias: jax.Array,
                     KH: int, KW: int) -> jax.Array:
    # x: (B, H, W, Cin), w_mat: (Kp, Cout) bf16, bias: (1, Cout) f32
    B, H, W, Cin = x.shape
    OH, OW = H - KH + 1, W - KW + 1
    x = x.astype(jnp.bfloat16)
    if KH == 1 and KW == 1:
        patches = x.reshape(B * OH * OW, Cin)
    else:
        # bf16 im2col glue (channel-last slices stay lane-dense).
        # TODO(synk): fuse im2col into the matmul grid (arbitrary (kh,kw) axes with
        # element-offset index maps) so the patch matrix never round-trips HBM.
        cols = [x[:, kh:kh + OH, kw:kw + OW, :] for kh in range(KH) for kw in range(KW)]
        patches = jnp.concatenate(cols, axis=-1).reshape(B * OH * OW, KH * KW * Cin)
    Cout = w_mat.shape[1]
    out = matmul_bias_relu(patches, w_mat, bias)        # (B*OH*OW, Cout) bf16
    return out.reshape(B, OH, OW, Cout)


# -----------------------------------------------------------------------------
# ModelAlexnet parameters (PyTorch layout), one-time kernel-layout prep, forward
# -----------------------------------------------------------------------------
def compute_conv_output_size(Lin, kernel_size, stride=1, padding=0, dilation=1) -> int:
    return int(np.floor((Lin + 2 * padding - dilation * (kernel_size - 1) - 1)
                        / float(stride) + 1))


def init_params(key, inputsize: Tuple[int, int], nhid: int) -> Dict[str, jax.Array]:
    nch, size = inputsize[0], inputsize[1]
    k1, k2 = size // 8, size // 10
    s = compute_conv_output_size(size, k1) // 2
    s = compute_conv_output_size(s, k2) // 2
    s = compute_conv_output_size(s, 2) // 2
    smid = s

    keys = jax.random.split(key, 10)

    def winit(k, shape, fan_in):
        bound = 1.0 / np.sqrt(fan_in)
        return jax.random.uniform(k, shape, jnp.float32, -bound, bound)

    return {
        "c1_w": winit(keys[0], (64, nch, k1, k1), nch * k1 * k1),
        "c1_b": winit(keys[1], (64,), nch * k1 * k1),
        "c2_w": winit(keys[2], (128, 64, k2, k2), 64 * k2 * k2),
        "c2_b": winit(keys[3], (128,), 64 * k2 * k2),
        "c3_w": winit(keys[4], (256, 128, 2, 2), 128 * 2 * 2),
        "c3_b": winit(keys[5], (256,), 128 * 2 * 2),
        "fc1_w": winit(keys[6], (nhid, 256 * smid * smid), 256 * smid * smid),
        "fc1_b": winit(keys[7], (nhid,), 256 * smid * smid),
        "fc2_w": winit(keys[8], (nhid, nhid), nhid),
        "fc2_b": winit(keys[9], (nhid,), nhid),
    }


def _pad_k_rows(w: jax.Array) -> jax.Array:
    """Zero-pad the K (reduction) axis of a (K, N) weight to the kernel's K tiling."""
    K = w.shape[0]
    if K > _TK_CAP and K % _TK_CAP:
        w = jnp.pad(w, ((0, _round_up(K, _TK_CAP) - K), (0, 0)))
    return w


def prepare_params(params: Dict[str, jax.Array], size: int, nhid: int) -> Dict[str, jax.Array]:
    """One-time conversion of PyTorch-layout params into kernel-ready layout:
    weights as (K, N) bf16 (K pre-padded for the matmul tiling), biases as (1, N) f32.
    No per-forward transposes / pads / casts of parameters."""
    k1, k2 = size // 8, size // 10
    s = compute_conv_output_size(size, k1) // 2
    s = compute_conv_output_size(s, k2) // 2
    s = compute_conv_output_size(s, 2) // 2
    smid = s

    def conv_w(wt):  # (Cout, Cin, KH, KW) -> (KH*KW*Cin, Cout), matching im2col column order
        Cout, Cin, KH, KW = wt.shape
        m = jnp.transpose(wt, (2, 3, 1, 0)).reshape(KH * KW * Cin, Cout)
        return _pad_k_rows(m.astype(jnp.bfloat16))

    def bias2d(b):
        return b.reshape(1, -1).astype(jnp.float32)

    # Permute fc1 input features from PyTorch's NCHW flatten to our NHWC flatten.
    fc1_w = params["fc1_w"].reshape(nhid, 256, smid, smid)
    fc1_w = jnp.transpose(fc1_w, (0, 2, 3, 1)).reshape(nhid, smid * smid * 256)
    fc1_w = _pad_k_rows(jnp.transpose(fc1_w, (1, 0)).astype(jnp.bfloat16))   # (In, nhid)

    fc2_w = _pad_k_rows(jnp.transpose(params["fc2_w"], (1, 0)).astype(jnp.bfloat16))

    return {
        "c1_w": conv_w(params["c1_w"]), "c1_b": bias2d(params["c1_b"]),
        "c2_w": conv_w(params["c2_w"]), "c2_b": bias2d(params["c2_b"]),
        "c3_w": conv_w(params["c3_w"]), "c3_b": bias2d(params["c3_b"]),
        "fc1_w": fc1_w, "fc1_b": bias2d(params["fc1_b"]),
        "fc2_w": fc2_w, "fc2_b": bias2d(params["fc2_b"]),
    }


def make_forward(size: int):
    k1, k2 = size // 8, size // 10

    @jax.jit
    def forward(wp: Dict[str, jax.Array], x_nchw: jax.Array):
        x = jnp.transpose(x_nchw, (0, 2, 3, 1)).astype(jnp.bfloat16)   # NCHW -> NHWC once
        h = conv2d_relu_nhwc(x, wp["c1_w"], wp["c1_b"], k1, k1)
        h = maxpool2x2_nhwc(h)                          # drop1 = identity (inference)
        h = conv2d_relu_nhwc(h, wp["c2_w"], wp["c2_b"], k2, k2)
        h = maxpool2x2_nhwc(h)                          # drop1 = identity
        h = conv2d_relu_nhwc(h, wp["c3_w"], wp["c3_b"], 2, 2)
        h = maxpool2x2_nhwc(h)                          # drop2 = identity
        h = h.reshape(h.shape[0], -1)                   # NHWC flatten (fc1_w pre-permuted)
        h = matmul_bias_relu(h, wp["fc1_w"], wp["fc1_b"])                         # bf16 out
        h = matmul_bias_relu(h, wp["fc2_w"], wp["fc2_b"], out_dtype=jnp.float32)  # final f32
        # TODO(synk): training-mode stochastic dropout (pltpu.prng_*) not implemented.
        misc = {"reg": jnp.asarray(0.0, jnp.float32)}   # no param has .grad -> norm is 0
        return h, misc

    return forward


# -----------------------------------------------------------------------------
# Pure-JAX (XLA, f32) reference of the PyTorch module, for a numerical sanity check
# -----------------------------------------------------------------------------
def reference_forward(params: Dict[str, jax.Array], x: jax.Array) -> jax.Array:
    def conv_relu(x, w, b):
        y = jax.lax.conv_general_dilated(
            x, w, window_strides=(1, 1), padding="VALID",
            dimension_numbers=("NCHW", "OIHW", "NCHW"))
        return jax.nn.relu(y + b[None, :, None, None])

    def pool(x):
        B, C, H, W = x.shape
        PH, PW = H // 2, W // 2
        x = x[:, :, : 2 * PH, : 2 * PW].reshape(B, C, PH, 2, PW, 2)
        return jnp.max(x, axis=(3, 5))

    h = pool(conv_relu(x, params["c1_w"], params["c1_b"]))
    h = pool(conv_relu(h, params["c2_w"], params["c2_b"]))
    h = pool(conv_relu(h, params["c3_w"], params["c3_b"]))
    h = h.reshape(h.shape[0], -1)
    h = jax.nn.relu(h @ params["fc1_w"].T + params["fc1_b"])
    h = jax.nn.relu(h @ params["fc2_w"].T + params["fc2_b"])
    return h


if __name__ == "__main__":
    # inputsize = (nch=4, size=16): conv1 k=2 -> 15 -> pool 7; conv2 k=1 -> 7 -> pool 3;
    # conv3 k=2 -> 2 -> pool 1; smid=1, flatten=256, nhid=32.
    B, NCH, SIZE, NHID = 2, 4, 16, 32
    key = jax.random.PRNGKey(0)
    kx, kp = jax.random.split(key)
    x = jax.random.normal(kx, (B, NCH, SIZE, SIZE), jnp.float32)

    params = init_params(kp, (NCH, SIZE), NHID)       # PyTorch-layout params
    wp = prepare_params(params, SIZE, NHID)           # one-time kernel-layout conversion
    forward = make_forward(SIZE)

    h, misc = forward(wp, x)
    h = jax.block_until_ready(h)
    _ = jax.block_until_ready(misc["reg"])

    assert h.shape == (B, NHID), h.shape
    assert bool(jnp.all(jnp.isfinite(h)))

    # Sanity-check against the pure-JAX f32 reference (bf16 MXU inputs + bf16
    # inter-layer activations -> loose tolerance).
    h_ref = reference_forward(params, x)
    np.testing.assert_allclose(np.asarray(h), np.asarray(h_ref), rtol=1.5e-1, atol=1e-1)

    print("KERNEL_OK")
</pallas_src>

<mosaic_0001>
module attributes {stable_mosaic.version = 11 : i64} {
  func.func @_matmul_bias_relu_kernel(%arg0: i32, %arg1: i32, %arg2: i32, %arg3: memref<232x16xbf16, #tpu.memory_space<vmem>>, %arg4: memref<16x64xbf16, #tpu.memory_space<vmem>>, %arg5: memref<1x64xf32, #tpu.memory_space<vmem>>, %arg6: memref<232x64xbf16, #tpu.memory_space<vmem>>, %arg7: memref<232x64xf32, #tpu.memory_space<vmem>>) attributes {dimension_semantics = [#tpu.dimension_semantics<parallel>, #tpu.dimension_semantics<parallel>, #tpu.dimension_semantics<arbitrary>], iteration_bounds = array<i64: 2, 1, 1>, scalar_prefetch = 0 : i64, scratch_operands = 1 : i64, tpu.core_type = #tpu.core_type<tc>, window_params = [{transform_indices = @transform_0, window_bounds = array<i64: 232, 16>}, {transform_indices = @transform_1, window_bounds = array<i64: 16, 64>}, {transform_indices = @transform_2, window_bounds = array<i64: 1, 64>}, {transform_indices = @transform_3, window_bounds = array<i64: 232, 64>}]} {
    %c0_i32 = arith.constant 0 : i32
    %0 = arith.cmpi eq, %arg2, %c0_i32 : i32
    %1 = arith.extui %0 : i1 to i32
    %c0_i32_0 = arith.constant 0 : i32
    %2 = arith.cmpi ne, %1, %c0_i32_0 : i32
    scf.if %2 {
      %cst_10 = arith.constant 0.000000e+00 : f32
      %12 = vector.broadcast %cst_10 : f32 to vector<232x64xf32>
      %c0_11 = arith.constant 0 : index
      %c0_12 = arith.constant 0 : index
      %13 = vector.load %arg7[%c0_11, %c0_12] : memref<232x64xf32, #tpu.memory_space<vmem>>, vector<232x64xf32>
      tpu.vector_store %arg7[%c0_11, %c0_12], %12 {strides = array<i32>} : memref<232x64xf32, #tpu.memory_space<vmem>>, vector<232x64xf32>,
    } else {
    }
    %c0 = arith.constant 0 : index
    %c0_1 = arith.constant 0 : index
    %3 = vector.load %arg7[%c0, %c0_1] : memref<232x64xf32, #tpu.memory_space<vmem>>, vector<232x64xf32>
    %c0_2 = arith.constant 0 : index
    %c0_3 = arith.constant 0 : index
    %4 = vector.load %arg3[%c0_2, %c0_3] : memref<232x16xbf16, #tpu.memory_space<vmem>>, vector<232x16xbf16>
    %c0_4 = arith.constant 0 : index
    %c0_5 = arith.constant 0 : index
    %5 = vector.load %arg4[%c0_4, %c0_5] : memref<16x64xbf16, #tpu.memory_space<vmem>>, vector<16x64xbf16>
    %cst = arith.constant dense<0.000000e+00> : vector<232x64xf32>
    %6 = tpu.matmul %4, %5, %cst {dimension_numbers = #tpu.dot_dimension_numbers<[1], [0], [0], [1], [0, 0, 1, 1], [], []>} : vector<232x16xbf16>, vector<16x64xbf16>, vector<232x64xf32> -> vector<232x64xf32>
    %7 = arith.addf %3, %6 : vector<232x64xf32>
    %c0_6 = arith.constant 0 : index
    %c0_7 = arith.constant 0 : index
    %8 = vector.load %arg7[%c0_6, %c0_7] : memref<232x64xf32, #tpu.memory_space<vmem>>, vector<232x64xf32>
    tpu.vector_store %arg7[%c0_6, %c0_7], %7 {strides = array<i32>} : memref<232x64xf32, #tpu.memory_space<vmem>>, vector<232x64xf32>,
    %c0_i32_8 = arith.constant 0 : i32
    %9 = arith.cmpi eq, %arg2, %c0_i32_8 : i32
    %10 = arith.extui %9 : i1 to i32
    %c0_i32_9 = arith.constant 0 : i32
    %11 = arith.cmpi ne, %10, %c0_i32_9 : i32
    scf.if %11 {
      %c0_10 = arith.constant 0 : index
      %c0_11 = arith.constant 0 : index
      %12 = vector.load %arg7[%c0_10, %c0_11] : memref<232x64xf32, #tpu.memory_space<vmem>>, vector<232x64xf32>
      %c0_12 = arith.constant 0 : index
      %c0_13 = arith.constant 0 : index
      %13 = vector.load %arg5[%c0_12, %c0_13] : memref<1x64xf32, #tpu.memory_space<vmem>>, vector<1x64xf32>
      %14 = vector.broadcast %13 : vector<1x64xf32> to vector<232x64xf32>
      %15 = arith.addf %12, %14 : vector<232x64xf32>
      %cst_14 = arith.constant 0.000000e+00 : f32
      %16 = vector.broadcast %cst_14 : f32 to vector<232x64xf32>
      %17 = arith.maximumf %15, %16 : vector<232x64xf32>
      %18 = arith.truncf %17 : vector<232x64xf32> to vector<232x64xbf16>
      %c0_15 = arith.constant 0 : index
      %c0_16 = arith.constant 0 : index
      %19 = vector.load %arg6[%c0_15, %c0_16] : memref<232x64xbf16, #tpu.memory_space<vmem>>, vector<232x64xbf16>
      tpu.vector_store %arg6[%c0_15, %c0_16], %18 {strides = array<i32>} : memref<232x64xbf16, #tpu.memory_space<vmem>>, vector<232x64xbf16>,
    } else {
    }
    return
  }
  func.func @transform_0(%arg0: i32, %arg1: i32, %arg2: i32) -> (i32, i32) {
    %c0_i32 = arith.constant 0 : i32
    return %arg0, %arg2 : i32, i32
  }
  func.func @transform_1(%arg0: i32, %arg1: i32, %arg2: i32) -> (i32, i32) {
    %c0_i32 = arith.constant 0 : i32
    return %arg2, %arg1 : i32, i32
  }
  func.func @transform_2(%arg0: i32, %arg1: i32, %arg2: i32) -> (i32, i32) {
    %c0_i32 = arith.constant 0 : i32
    %c0_i32_0 = arith.constant 0 : i32
    return %c0_i32, %arg1 : i32, i32
  }
  func.func @transform_3(%arg0: i32, %arg1: i32, %arg2: i32) -> (i32, i32) {
    %c0_i32 = arith.constant 0 : i32
    return %arg0, %arg1 : i32, i32
  }
}

module attributes {stable_mosaic.version = 11 : i64} {
  func.func @_maxpool2x2_kernel(%arg0: i32, %arg1: memref<14x2x7x2x64xbf16, #tpu.memory_space<vmem>>, %arg2: memref<14x7x64xbf16, #tpu.memory_space<vmem>>) attributes {dimension_semantics = [#tpu.dimension_semantics<parallel>], iteration_bounds = array<i64: 1>, scalar_prefetch = 0 : i64, scratch_operands = 0 : i64, tpu.core_type = #tpu.core_type<tc>, window_params = [{transform_indices = @transform_0, window_bounds = array<i64: 14, 2, 7, 2, 64>}, {transform_indices = @transform_1, window_bounds = array<i64: 14, 7, 64>}]} {
    %c0 = arith.constant 0 : index
    %c0_0 = arith.constant 0 : index
    %c0_1 = arith.constant 0 : index
    %c0_2 = arith.constant 0 : index
    %c0_3 = arith.constant 0 : index
    %0 = vector.load %arg1[%c0, %c0_0, %c0_1, %c0_2, %c0_3] : memref<14x2x7x2x64xbf16, #tpu.memory_space<vmem>>, vector<14x2x7x2x64xbf16>
    %1 = vector.extract_strided_slice %0 {offsets = [0, 0, 0, 0, 0], sizes = [14, 1, 7, 2, 64], strides = [1, 1, 1, 1, 1]} : vector<14x2x7x2x64xbf16> to vector<14x1x7x2x64xbf16>
    %2 = vector.shape_cast %1 : vector<14x1x7x2x64xbf16> to vector<14x7x2x64xbf16>
    %3 = vector.extract_strided_slice %0 {offsets = [0, 1, 0, 0, 0], sizes = [14, 1, 7, 2, 64], strides = [1, 1, 1, 1, 1]} : vector<14x2x7x2x64xbf16> to vector<14x1x7x2x64xbf16>
    %4 = vector.shape_cast %3 : vector<14x1x7x2x64xbf16> to vector<14x7x2x64xbf16>
    %5 = arith.maximumf %2, %4 : vector<14x7x2x64xbf16>
    %6 = vector.extract_strided_slice %5 {offsets = [0, 0, 0, 0], sizes = [14, 7, 1, 64], strides = [1, 1, 1, 1]} : vector<14x7x2x64xbf16> to vector<14x7x1x64xbf16>
    %7 = vector.shape_cast %6 : vector<14x7x1x64xbf16> to vector<14x7x64xbf16>
    %8 = vector.extract_strided_slice %5 {offsets = [0, 0, 1, 0], sizes = [14, 7, 1, 64], strides = [1, 1, 1, 1]} : vector<14x7x2x64xbf16> to vector<14x7x1x64xbf16>
    %9 = vector.shape_cast %8 : vector<14x7x1x64xbf16> to vector<14x7x64xbf16>
    %10 = arith.maximumf %7, %9 : vector<14x7x64xbf16>
    %c0_4 = arith.constant 0 : index
    %c0_5 = arith.constant 0 : index
    %c0_6 = arith.constant 0 : index
    %11 = vector.load %arg2[%c0_4, %c0_5, %c0_6] : memref<14x7x64xbf16, #tpu.memory_space<vmem>>, vector<14x7x64xbf16>
    tpu.vector_store %arg2[%c0_4, %c0_5, %c0_6], %10 {strides = array<i32>} : memref<14x7x64xbf16, #tpu.memory_space<vmem>>, vector<14x7x64xbf16>,
    return
  }
  func.func @transform_0(%arg0: i32) -> (i32, i32, i32, i32, i32) {
    %c0_i32 = arith.constant 0 : i32
    %c0_i32_0 = arith.constant 0 : i32
    %c0_i32_1 = arith.constant 0 : i32
    %c0_i32_2 = arith.constant 0 : i32
    %c0_i32_3 = arith.constant 0 : i32
    return %arg0, %c0_i32, %c0_i32_0, %c0_i32_1, %c0_i32_2 : i32, i32, i32, i32, i32
  }
  func.func @transform_1(%arg0: i32) -> (i32, i32, i32) {
    %c0_i32 = arith.constant 0 : i32
    %c0_i32_0 = arith.constant 0 : i32
    %c0_i32_1 = arith.constant 0 : i32
    return %arg0, %c0_i32, %c0_i32_0 : i32, i32, i32
  }
}

module attributes {stable_mosaic.version = 11 : i64} {
  func.func @_matmul_bias_relu_kernel(%arg0: i32, %arg1: i32, %arg2: i32, %arg3: memref<56x64xbf16, #tpu.memory_space<vmem>>, %arg4: memref<64x128xbf16, #tpu.memory_space<vmem>>, %arg5: memref<1x128xf32, #tpu.memory_space<vmem>>, %arg6: memref<56x128xbf16, #tpu.memory_space<vmem>>, %arg7: memref<56x128xf32, #tpu.memory_space<vmem>>) attributes {dimension_semantics = [#tpu.dimension_semantics<parallel>, #tpu.dimension_semantics<parallel>, #tpu.dimension_semantics<arbitrary>], iteration_bounds = array<i64: 2, 1, 1>, scalar_prefetch = 0 : i64, scratch_operands = 1 : i64, tpu.core_type = #tpu.core_type<tc>, window_params = [{transform_indices = @transform_0, window_bounds = array<i64: 56, 64>}, {transform_indices = @transform_1, window_bounds = array<i64: 64, 128>}, {transform_indices = @transform_2, window_bounds = array<i64: 1, 128>}, {transform_indices = @transform_3, window_bounds = array<i64: 56, 128>}]} {
    %c0_i32 = arith.constant 0 : i32
    %0 = arith.cmpi eq, %arg2, %c0_i32 : i32
    %1 = arith.extui %0 : i1 to i32
    %c0_i32_0 = arith.constant 0 : i32
    %2 = arith.cmpi ne, %1, %c0_i32_0 : i32
    scf.if %2 {
      %cst_10 = arith.constant 0.000000e+00 : f32
      %12 = vector.broadcast %cst_10 : f32 to vector<56x128xf32>
      %c0_11 = arith.constant 0 : index
      %c0_12 = arith.constant 0 : index
      %13 = vector.load %arg7[%c0_11, %c0_12] : memref<56x128xf32, #tpu.memory_space<vmem>>, vector<56x128xf32>
      tpu.vector_store %arg7[%c0_11, %c0_12], %12 {strides = array<i32>} : memref<56x128xf32, #tpu.memory_space<vmem>>, vector<56x128xf32>,
    } else {
    }
    %c0 = arith.constant 0 : index
    %c0_1 = arith.constant 0 : index
    %3 = vector.load %arg7[%c0, %c0_1] : memref<56x128xf32, #tpu.memory_space<vmem>>, vector<56x128xf32>
    %c0_2 = arith.constant 0 : index
    %c0_3 = arith.constant 0 : index
    %4 = vector.load %arg3[%c0_2, %c0_3] : memref<56x64xbf16, #tpu.memory_space<vmem>>, vector<56x64xbf16>
    %c0_4 = arith.constant 0 : index
    %c0_5 = arith.constant 0 : index
    %5 = vector.load %arg4[%c0_4, %c0_5] : memref<64x128xbf16, #tpu.memory_space<vmem>>, vector<64x128xbf16>
    %cst = arith.constant dense<0.000000e+00> : vector<56x128xf32>
    %6 = tpu.matmul %4, %5, %cst {dimension_numbers = #tpu.dot_dimension_numbers<[1], [0], [0], [1], [0, 0, 1, 1], [], []>} : vector<56x64xbf16>, vector<64x128xbf16>, vector<56x128xf32> -> vector<56x128xf32>
    %7 = arith.addf %3, %6 : vector<56x128xf32>
    %c0_6 = arith.constant 0 : index
    %c0_7 = arith.constant 0 : index
    %8 = vector.load %arg7[%c0_6, %c0_7] : memref<56x128xf32, #tpu.memory_space<vmem>>, vector<56x128xf32>
    tpu.vector_store %arg7[%c0_6, %c0_7], %7 {strides = array<i32>} : memref<56x128xf32, #tpu.memory_space<vmem>>, vector<56x128xf32>,
    %c0_i32_8 = arith.constant 0 : i32
    %9 = arith.cmpi eq, %arg2, %c0_i32_8 : i32
    %10 = arith.extui %9 : i1 to i32
    %c0_i32_9 = arith.constant 0 : i32
    %11 = arith.cmpi ne, %10, %c0_i32_9 : i32
    scf.if %11 {
      %c0_10 = arith.constant 0 : index
      %c0_11 = arith.constant 0 : index
      %12 = vector.load %arg7[%c0_10, %c0_11] : memref<56x128xf32, #tpu.memory_space<vmem>>, vector<56x128xf32>
      %c0_12 = arith.constant 0 : index
      %c0_13 = arith.constant 0 : index
      %13 = vector.load %arg5[%c0_12, %c0_13] : memref<1x128xf32, #tpu.memory_space<vmem>>, vector<1x128xf32>
      %14 = vector.broadcast %13 : vector<1x128xf32> to vector<56x128xf32>
      %15 = arith.addf %12, %14 : vector<56x128xf32>
      %cst_14 = arith.constant 0.000000e+00 : f32
      %16 = vector.broadcast %cst_14 : f32 to vector<56x128xf32>
      %17 = arith.maximumf %15, %16 : vector<56x128xf32>
      %18 = arith.truncf %17 : vector<56x128xf32> to vector<56x128xbf16>
      %c0_15 = arith.constant 0 : index
      %c0_16 = arith.constant 0 : index
      %19 = vector.load %arg6[%c0_15, %c0_16] : memref<56x128xbf16, #tpu.memory_space<vmem>>, vector<56x128xbf16>
      tpu.vector_store %arg6[%c0_15, %c0_16], %18 {strides = array<i32>} : memref<56x128xbf16, #tpu.memory_space<vmem>>, vector<56x128xbf16>,
    } else {
    }
    return
  }
  func.func @transform_0(%arg0: i32, %arg1: i32, %arg2: i32) -> (i32, i32) {
    %c0_i32 = arith.constant 0 : i32
    return %arg0, %arg2 : i32, i32
  }
  func.func @transform_1(%arg0: i32, %arg1: i32, %arg2: i32) -> (i32, i32) {
    %c0_i32 = arith.constant 0 : i32
    return %arg2, %arg1 : i32, i32
  }
  func.func @transform_2(%arg0: i32, %arg1: i32, %arg2: i32) -> (i32, i32) {
    %c0_i32 = arith.constant 0 : i32
    %c0_i32_0 = arith.constant 0 : i32
    return %c0_i32, %arg1 : i32, i32
  }
  func.func @transform_3(%arg0: i32, %arg1: i32, %arg2: i32) -> (i32, i32) {
    %c0_i32 = arith.constant 0 : i32
    return %arg0, %arg1 : i32, i32
  }
}

module attributes {stable_mosaic.version = 11 : i64} {
  func.func @_maxpool2x2_kernel(%arg0: i32, %arg1: memref<6x2x3x2x128xbf16, #tpu.memory_space<vmem>>, %arg2: memref<6x3x128xbf16, #tpu.memory_space<vmem>>) attributes {dimension_semantics = [#tpu.dimension_semantics<parallel>], iteration_bounds = array<i64: 1>, scalar_prefetch = 0 : i64, scratch_operands = 0 : i64, tpu.core_type = #tpu.core_type<tc>, window_params = [{transform_indices = @transform_0, window_bounds = array<i64: 6, 2, 3, 2, 128>}, {transform_indices = @transform_1, window_bounds = array<i64: 6, 3, 128>}]} {
    %c0 = arith.constant 0 : index
    %c0_0 = arith.constant 0 : index
    %c0_1 = arith.constant 0 : index
    %c0_2 = arith.constant 0 : index
    %c0_3 = arith.constant 0 : index
    %0 = vector.load %arg1[%c0, %c0_0, %c0_1, %c0_2, %c0_3] : memref<6x2x3x2x128xbf16, #tpu.memory_space<vmem>>, vector<6x2x3x2x128xbf16>
    %1 = vector.extract_strided_slice %0 {offsets = [0, 0, 0, 0, 0], sizes = [6, 1, 3, 2, 128], strides = [1, 1, 1, 1, 1]} : vector<6x2x3x2x128xbf16> to vector<6x1x3x2x128xbf16>
    %2 = vector.shape_cast %1 : vector<6x1x3x2x128xbf16> to vector<6x3x2x128xbf16>
    %3 = vector.extract_strided_slice %0 {offsets = [0, 1, 0, 0, 0], sizes = [6, 1, 3, 2, 128], strides = [1, 1, 1, 1, 1]} : vector<6x2x3x2x128xbf16> to vector<6x1x3x2x128xbf16>
    %4 = vector.shape_cast %3 : vector<6x1x3x2x128xbf16> to vector<6x3x2x128xbf16>
    %5 = arith.maximumf %2, %4 : vector<6x3x2x128xbf16>
    %6 = vector.extract_strided_slice %5 {offsets = [0, 0, 0, 0], sizes = [6, 3, 1, 128], strides = [1, 1, 1, 1]} : vector<6x3x2x128xbf16> to vector<6x3x1x128xbf16>
    %7 = vector.shape_cast %6 : vector<6x3x1x128xbf16> to vector<6x3x128xbf16>
    %8 = vector.extract_strided_slice %5 {offsets = [0, 0, 1, 0], sizes = [6, 3, 1, 128], strides = [1, 1, 1, 1]} : vector<6x3x2x128xbf16> to vector<6x3x1x128xbf16>
    %9 = vector.shape_cast %8 : vector<6x3x1x128xbf16> to vector<6x3x128xbf16>
    %10 = arith.maximumf %7, %9 : vector<6x3x128xbf16>
    %c0_4 = arith.constant 0 : index
    %c0_5 = arith.constant 0 : index
    %c0_6 = arith.constant 0 : index
    %11 = vector.load %arg2[%c0_4, %c0_5, %c0_6] : memref<6x3x128xbf16, #tpu.memory_space<vmem>>, vector<6x3x128xbf16>
    tpu.vector_store %arg2[%c0_4, %c0_5, %c0_6], %10 {strides = array<i32>} : memref<6x3x128xbf16, #tpu.memory_space<vmem>>, vector<6x3x128xbf16>,
    return
  }
  func.func @transform_0(%arg0: i32) -> (i32, i32, i32, i32, i32) {
    %c0_i32 = arith.constant 0 : i32
    %c0_i32_0 = arith.constant 0 : i32
    %c0_i32_1 = arith.constant 0 : i32
    %c0_i32_2 = arith.constant 0 : i32
    %c0_i32_3 = arith.constant 0 : i32
    return %arg0, %c0_i32, %c0_i32_0, %c0_i32_1, %c0_i32_2 : i32, i32, i32, i32, i32
  }
  func.func @transform_1(%arg0: i32) -> (i32, i32, i32) {
    %c0_i32 = arith.constant 0 : i32
    %c0_i32_0 = arith.constant 0 : i32
    %c0_i32_1 = arith.constant 0 : i32
    return %arg0, %c0_i32, %c0_i32_0 : i32, i32, i32
  }
}

module attributes {stable_mosaic.version = 11 : i64} {
  func.func @_matmul_bias_relu_kernel(%arg0: i32, %arg1: i32, %arg2: i32, %arg3: memref<8x512xbf16, #tpu.memory_space<vmem>>, %arg4: memref<512x128xbf16, #tpu.memory_space<vmem>>, %arg5: memref<1x128xf32, #tpu.memory_space<vmem>>, %arg6: memref<8x128xbf16, #tpu.memory_space<vmem>>, %arg7: memref<8x128xf32, #tpu.memory_space<vmem>>) attributes {dimension_semantics = [#tpu.dimension_semantics<parallel>, #tpu.dimension_semantics<parallel>, #tpu.dimension_semantics<arbitrary>], iteration_bounds = array<i64: 1, 2, 1>, scalar_prefetch = 0 : i64, scratch_operands = 1 : i64, tpu.core_type = #tpu.core_type<tc>, window_params = [{transform_indices = @transform_0, window_bounds = array<i64: 8, 512>}, {transform_indices = @transform_1, window_bounds = array<i64: 512, 128>}, {transform_indices = @transform_2, window_bounds = array<i64: 1, 128>}, {transform_indices = @transform_3, window_bounds = array<i64: 8, 128>}]} {
    %c0_i32 = arith.constant 0 : i32
    %0 = arith.cmpi eq, %arg2, %c0_i32 : i32
    %1 = arith.extui %0 : i1 to i32
    %c0_i32_0 = arith.constant 0 : i32
    %2 = arith.cmpi ne, %1, %c0_i32_0 : i32
    scf.if %2 {
      %cst_10 = arith.constant 0.000000e+00 : f32
      %12 = vector.broadcast %cst_10 : f32 to vector<8x128xf32>
      %c0_11 = arith.constant 0 : index
      %c0_12 = arith.constant 0 : index
      %13 = vector.load %arg7[%c0_11, %c0_12] : memref<8x128xf32, #tpu.memory_space<vmem>>, vector<8x128xf32>
      tpu.vector_store %arg7[%c0_11, %c0_12], %12 {strides = array<i32>} : memref<8x128xf32, #tpu.memory_space<vmem>>, vector<8x128xf32>,
    } else {
    }
    %c0 = arith.constant 0 : index
    %c0_1 = arith.constant 0 : index
    %3 = vector.load %arg7[%c0, %c0_1] : memref<8x128xf32, #tpu.memory_space<vmem>>, vector<8x128xf32>
    %c0_2 = arith.constant 0 : index
    %c0_3 = arith.constant 0 : index
    %4 = vector.load %arg3[%c0_2, %c0_3] : memref<8x512xbf16, #tpu.memory_space<vmem>>, vector<8x512xbf16>
    %c0_4 = arith.constant 0 : index
    %c0_5 = arith.constant 0 : index
    %5 = vector.load %arg4[%c0_4, %c0_5] : memref<512x128xbf16, #tpu.memory_space<vmem>>, vector<512x128xbf16>
    %cst = arith.constant dense<0.000000e+00> : vector<8x128xf32>
    %6 = tpu.matmul %4, %5, %cst {dimension_numbers = #tpu.dot_dimension_numbers<[1], [0], [0], [1], [0, 0, 1, 1], [], []>} : vector<8x512xbf16>, vector<512x128xbf16>, vector<8x128xf32> -> vector<8x128xf32>
    %7 = arith.addf %3, %6 : vector<8x128xf32>
    %c0_6 = arith.constant 0 : index
    %c0_7 = arith.constant 0 : index
    %8 = vector.load %arg7[%c0_6, %c0_7] : memref<8x128xf32, #tpu.memory_space<vmem>>, vector<8x128xf32>
    tpu.vector_store %arg7[%c0_6, %c0_7], %7 {strides = array<i32>} : memref<8x128xf32, #tpu.memory_space<vmem>>, vector<8x128xf32>,
    %c0_i32_8 = arith.constant 0 : i32
    %9 = arith.cmpi eq, %arg2, %c0_i32_8 : i32
    %10 = arith.extui %9 : i1 to i32
    %c0_i32_9 = arith.constant 0 : i32
    %11 = arith.cmpi ne, %10, %c0_i32_9 : i32
    scf.if %11 {
      %c0_10 = arith.constant 0 : index
      %c0_11 = arith.constant 0 : index
      %12 = vector.load %arg7[%c0_10, %c0_11] : memref<8x128xf32, #tpu.memory_space<vmem>>, vector<8x128xf32>
      %c0_12 = arith.constant 0 : index
      %c0_13 = arith.constant 0 : index
      %13 = vector.load %arg5[%c0_12, %c0_13] : memref<1x128xf32, #tpu.memory_space<vmem>>, vector<1x128xf32>
      %14 = vector.broadcast %13 : vector<1x128xf32> to vector<8x128xf32>
      %15 = arith.addf %12, %14 : vector<8x128xf32>
      %cst_14 = arith.constant 0.000000e+00 : f32
      %16 = vector.broadcast %cst_14 : f32 to vector<8x128xf32>
      %17 = arith.maximumf %15, %16 : vector<8x128xf32>
      %18 = arith.truncf %17 : vector<8x128xf32> to vector<8x128xbf16>
      %c0_15 = arith.constant 0 : index
      %c0_16 = arith.constant 0 : index
      %19 = vector.load %arg6[%c0_15, %c0_16] : memref<8x128xbf16, #tpu.memory_space<vmem>>, vector<8x128xbf16>
      tpu.vector_store %arg6[%c0_15, %c0_16], %18 {strides = array<i32>} : memref<8x128xbf16, #tpu.memory_space<vmem>>, vector<8x128xbf16>,
    } else {
    }
    return
  }
  func.func @transform_0(%arg0: i32, %arg1: i32, %arg2: i32) -> (i32, i32) {
    %c0_i32 = arith.constant 0 : i32
    return %arg0, %arg2 : i32, i32
  }
  func.func @transform_1(%arg0: i32, %arg1: i32, %arg2: i32) -> (i32, i32) {
    %c0_i32 = arith.constant 0 : i32
    return %arg2, %arg1 : i32, i32
  }
  func.func @transform_2(%arg0: i32, %arg1: i32, %arg2: i32) -> (i32, i32) {
    %c0_i32 = arith.constant 0 : i32
    %c0_i32_0 = arith.constant 0 : i32
    return %c0_i32, %arg1 : i32, i32
  }
  func.func @transform_3(%arg0: i32, %arg1: i32, %arg2: i32) -> (i32, i32) {
    %c0_i32 = arith.constant 0 : i32
    return %arg0, %arg1 : i32, i32
  }
}

module attributes {stable_mosaic.version = 11 : i64} {
  func.func @_maxpool2x2_kernel(%arg0: i32, %arg1: memref<2x2x1x2x256xbf16, #tpu.memory_space<vmem>>, %arg2: memref<2x1x256xbf16, #tpu.memory_space<vmem>>) attributes {dimension_semantics = [#tpu.dimension_semantics<parallel>], iteration_bounds = array<i64: 1>, scalar_prefetch = 0 : i64, scratch_operands = 0 : i64, tpu.core_type = #tpu.core_type<tc>, window_params = [{transform_indices = @transform_0, window_bounds = array<i64: 2, 2, 1, 2, 256>}, {transform_indices = @transform_1, window_bounds = array<i64: 2, 1, 256>}]} {
    %c0 = arith.constant 0 : index
    %c0_0 = arith.constant 0 : index
    %c0_1 = arith.constant 0 : index
    %c0_2 = arith.constant 0 : index
    %c0_3 = arith.constant 0 : index
    %0 = vector.load %arg1[%c0, %c0_0, %c0_1, %c0_2, %c0_3] : memref<2x2x1x2x256xbf16, #tpu.memory_space<vmem>>, vector<2x2x1x2x256xbf16>
    %1 = vector.extract_strided_slice %0 {offsets = [0, 0, 0, 0, 0], sizes = [2, 1, 1, 2, 256], strides = [1, 1, 1, 1, 1]} : vector<2x2x1x2x256xbf16> to vector<2x1x1x2x256xbf16>
    %2 = vector.shape_cast %1 : vector<2x1x1x2x256xbf16> to vector<2x1x2x256xbf16>
    %3 = vector.extract_strided_slice %0 {offsets = [0, 1, 0, 0, 0], sizes = [2, 1, 1, 2, 256], strides = [1, 1, 1, 1, 1]} : vector<2x2x1x2x256xbf16> to vector<2x1x1x2x256xbf16>
    %4 = vector.shape_cast %3 : vector<2x1x1x2x256xbf16> to vector<2x1x2x256xbf16>
    %5 = arith.maximumf %2, %4 : vector<2x1x2x256xbf16>
    %6 = vector.extract_strided_slice %5 {offsets = [0, 0, 0, 0], sizes = [2, 1, 1, 256], strides = [1, 1, 1, 1]} : vector<2x1x2x256xbf16> to vector<2x1x1x256xbf16>
    %7 = vector.shape_cast %6 : vector<2x1x1x256xbf16> to vector<2x1x256xbf16>
    %8 = vector.extract_strided_slice %5 {offsets = [0, 0, 1, 0], sizes = [2, 1, 1, 256], strides = [1, 1, 1, 1]} : vector<2x1x2x256xbf16> to vector<2x1x1x256xbf16>
    %9 = vector.shape_cast %8 : vector<2x1x1x256xbf16> to vector<2x1x256xbf16>
    %10 = arith.maximumf %7, %9 : vector<2x1x256xbf16>
    %c0_4 = arith.constant 0 : index
    %c0_5 = arith.constant 0 : index
    %c0_6 = arith.constant 0 : index
    %11 = vector.load %arg2[%c0_4, %c0_5, %c0_6] : memref<2x1x256xbf16, #tpu.memory_space<vmem>>, vector<2x1x256xbf16>
    tpu.vector_store %arg2[%c0_4, %c0_5, %c0_6], %10 {strides = array<i32>} : memref<2x1x256xbf16, #tpu.memory_space<vmem>>, vector<2x1x256xbf16>,
    return
  }
  func.func @transform_0(%arg0: i32) -> (i32, i32, i32, i32, i32) {
    %c0_i32 = arith.constant 0 : i32
    %c0_i32_0 = arith.constant 0 : i32
    %c0_i32_1 = arith.constant 0 : i32
    %c0_i32_2 = arith.constant 0 : i32
    %c0_i32_3 = arith.constant 0 : i32
    return %arg0, %c0_i32, %c0_i32_0, %c0_i32_1, %c0_i32_2 : i32, i32, i32, i32, i32
  }
  func.func @transform_1(%arg0: i32) -> (i32, i32, i32) {
    %c0_i32 = arith.constant 0 : i32
    %c0_i32_0 = arith.constant 0 : i32
    %c0_i32_1 = arith.constant 0 : i32
    return %arg0, %c0_i32, %c0_i32_0 : i32, i32, i32
  }
}

module attributes {stable_mosaic.version = 11 : i64} {
  func.func @_matmul_bias_relu_kernel(%arg0: i32, %arg1: i32, %arg2: i32, %arg3: memref<2x256xbf16, #tpu.memory_space<vmem>>, %arg4: memref<256x32xbf16, #tpu.memory_space<vmem>>, %arg5: memref<1x32xf32, #tpu.memory_space<vmem>>, %arg6: memref<2x32xbf16, #tpu.memory_space<vmem>>, %arg7: memref<2x32xf32, #tpu.memory_space<vmem>>) attributes {dimension_semantics = [#tpu.dimension_semantics<parallel>, #tpu.dimension_semantics<parallel>, #tpu.dimension_semantics<arbitrary>], iteration_bounds = array<i64: 1, 1, 1>, scalar_prefetch = 0 : i64, scratch_operands = 1 : i64, tpu.core_type = #tpu.core_type<tc>, window_params = [{transform_indices = @transform_0, window_bounds = array<i64: 2, 256>}, {transform_indices = @transform_1, window_bounds = array<i64: 256, 32>}, {transform_indices = @transform_2, window_bounds = array<i64: 1, 32>}, {transform_indices = @transform_3, window_bounds = array<i64: 2, 32>}]} {
    %c0_i32 = arith.constant 0 : i32
    %0 = arith.cmpi eq, %arg2, %c0_i32 : i32
    %1 = arith.extui %0 : i1 to i32
    %c0_i32_0 = arith.constant 0 : i32
    %2 = arith.cmpi ne, %1, %c0_i32_0 : i32
    scf.if %2 {
      %cst_10 = arith.constant 0.000000e+00 : f32
      %12 = vector.broadcast %cst_10 : f32 to vector<2x32xf32>
      %c0_11 = arith.constant 0 : index
      %c0_12 = arith.constant 0 : index
      %13 = vector.load %arg7[%c0_11, %c0_12] : memref<2x32xf32, #tpu.memory_space<vmem>>, vector<2x32xf32>
      tpu.vector_store %arg7[%c0_11, %c0_12], %12 {strides = array<i32>} : memref<2x32xf32, #tpu.memory_space<vmem>>, vector<2x32xf32>,
    } else {
    }
    %c0 = arith.constant 0 : index
    %c0_1 = arith.constant 0 : index
    %3 = vector.load %arg7[%c0, %c0_1] : memref<2x32xf32, #tpu.memory_space<vmem>>, vector<2x32xf32>
    %c0_2 = arith.constant 0 : index
    %c0_3 = arith.constant 0 : index
    %4 = vector.load %arg3[%c0_2, %c0_3] : memref<2x256xbf16, #tpu.memory_space<vmem>>, vector<2x256xbf16>
    %c0_4 = arith.constant 0 : index
    %c0_5 = arith.constant 0 : index
    %5 = vector.load %arg4[%c0_4, %c0_5] : memref<256x32xbf16, #tpu.memory_space<vmem>>, vector<256x32xbf16>
    %cst = arith.constant dense<0.000000e+00> : vector<2x32xf32>
    %6 = tpu.matmul %4, %5, %cst {dimension_numbers = #tpu.dot_dimension_numbers<[1], [0], [0], [1], [0, 0, 1, 1], [], []>} : vector<2x256xbf16>, vector<256x32xbf16>, vector<2x32xf32> -> vector<2x32xf32>
    %7 = arith.addf %3, %6 : vector<2x32xf32>
    %c0_6 = arith.constant 0 : index
    %c0_7 = arith.constant 0 : index
    %8 = vector.load %arg7[%c0_6, %c0_7] : memref<2x32xf32, #tpu.memory_space<vmem>>, vector<2x32xf32>
    tpu.vector_store %arg7[%c0_6, %c0_7], %7 {strides = array<i32>} : memref<2x32xf32, #tpu.memory_space<vmem>>, vector<2x32xf32>,
    %c0_i32_8 = arith.constant 0 : i32
    %9 = arith.cmpi eq, %arg2, %c0_i32_8 : i32
    %10 = arith.extui %9 : i1 to i32
    %c0_i32_9 = arith.constant 0 : i32
    %11 = arith.cmpi ne, %10, %c0_i32_9 : i32
    scf.if %11 {
      %c0_10 = arith.constant 0 : index
      %c0_11 = arith.constant 0 : index
      %12 = vector.load %arg7[%c0_10, %c0_11] : memref<2x32xf32, #tpu.memory_space<vmem>>, vector<2x32xf32>
      %c0_12 = arith.constant 0 : index
      %c0_13 = arith.constant 0 : index
      %13 = vector.load %arg5[%c0_12, %c0_13] : memref<1x32xf32, #tpu.memory_space<vmem>>, vector<1x32xf32>
      %14 = vector.broadcast %13 : vector<1x32xf32> to vector<2x32xf32>
      %15 = arith.addf %12, %14 : vector<2x32xf32>
      %cst_14 = arith.constant 0.000000e+00 : f32
      %16 = vector.broadcast %cst_14 : f32 to vector<2x32xf32>
      %17 = arith.maximumf %15, %16 : vector<2x32xf32>
      %18 = arith.truncf %17 : vector<2x32xf32> to vector<2x32xbf16>
      %c0_15 = arith.constant 0 : index
      %c0_16 = arith.constant 0 : index
      %19 = vector.load %arg6[%c0_15, %c0_16] : memref<2x32xbf16, #tpu.memory_space<vmem>>, vector<2x32xbf16>
      tpu.vector_store %arg6[%c0_15, %c0_16], %18 {strides = array<i32>} : memref<2x32xbf16, #tpu.memory_space<vmem>>, vector<2x32xbf16>,
    } else {
    }
    return
  }
  func.func @transform_0(%arg0: i32, %arg1: i32, %arg2: i32) -> (i32, i32) {
    %c0_i32 = arith.constant 0 : i32
    return %arg0, %arg2 : i32, i32
  }
  func.func @transform_1(%arg0: i32, %arg1: i32, %arg2: i32) -> (i32, i32) {
    %c0_i32 = arith.constant 0 : i32
    return %arg2, %arg1 : i32, i32
  }
  func.func @transform_2(%arg0: i32, %arg1: i32, %arg2: i32) -> (i32, i32) {
    %c0_i32 = arith.constant 0 : i32
    %c0_i32_0 = arith.constant 0 : i32
    return %c0_i32, %arg1 : i32, i32
  }
  func.func @transform_3(%arg0: i32, %arg1: i32, %arg2: i32) -> (i32, i32) {
    %c0_i32 = arith.constant 0 : i32
    return %arg0, %arg1 : i32, i32
  }
}

module attributes {stable_mosaic.version = 11 : i64} {
  func.func @_matmul_bias_relu_kernel(%arg0: i32, %arg1: i32, %arg2: i32, %arg3: memref<2x32xbf16, #tpu.memory_space<vmem>>, %arg4: memref<32x32xbf16, #tpu.memory_space<vmem>>, %arg5: memref<1x32xf32, #tpu.memory_space<vmem>>, %arg6: memref<2x32xf32, #tpu.memory_space<vmem>>, %arg7: memref<2x32xf32, #tpu.memory_space<vmem>>) attributes {dimension_semantics = [#tpu.dimension_semantics<parallel>, #tpu.dimension_semantics<parallel>, #tpu.dimension_semantics<arbitrary>], iteration_bounds = array<i64: 1, 1, 1>, scalar_prefetch = 0 : i64, scratch_operands = 1 : i64, tpu.core_type = #tpu.core_type<tc>, window_params = [{transform_indices = @transform_0, window_bounds = array<i64: 2, 32>}, {transform_indices = @transform_1, window_bounds = array<i64: 32, 32>}, {transform_indices = @transform_2, window_bounds = array<i64: 1, 32>}, {transform_indices = @transform_3, window_bounds = array<i64: 2, 32>}]} {
    %c0_i32 = arith.constant 0 : i32
    %0 = arith.cmpi eq, %arg2, %c0_i32 : i32
    %1 = arith.extui %0 : i1 to i32
    %c0_i32_0 = arith.constant 0 : i32
    %2 = arith.cmpi ne, %1, %c0_i32_0 : i32
    scf.if %2 {
      %cst_10 = arith.constant 0.000000e+00 : f32
      %12 = vector.broadcast %cst_10 : f32 to vector<2x32xf32>
      %c0_11 = arith.constant 0 : index
      %c0_12 = arith.constant 0 : index
      %13 = vector.load %arg7[%c0_11, %c0_12] : memref<2x32xf32, #tpu.memory_space<vmem>>, vector<2x32xf32>
      tpu.vector_store %arg7[%c0_11, %c0_12], %12 {strides = array<i32>} : memref<2x32xf32, #tpu.memory_space<vmem>>, vector<2x32xf32>,
    } else {
    }
    %c0 = arith.constant 0 : index
    %c0_1 = arith.constant 0 : index
    %3 = vector.load %arg7[%c0, %c0_1] : memref<2x32xf32, #tpu.memory_space<vmem>>, vector<2x32xf32>
    %c0_2 = arith.constant 0 : index
    %c0_3 = arith.constant 0 : index
    %4 = vector.load %arg3[%c0_2, %c0_3] : memref<2x32xbf16, #tpu.memory_space<vmem>>, vector<2x32xbf16>
    %c0_4 = arith.constant 0 : index
    %c0_5 = arith.constant 0 : index
    %5 = vector.load %arg4[%c0_4, %c0_5] : memref<32x32xbf16, #tpu.memory_space<vmem>>, vector<32x32xbf16>
    %cst = arith.constant dense<0.000000e+00> : vector<2x32xf32>
    %6 = tpu.matmul %4, %5, %cst {dimension_numbers = #tpu.dot_dimension_numbers<[1], [0], [0], [1], [0, 0, 1, 1], [], []>} : vector<2x32xbf16>, vector<32x32xbf16>, vector<2x32xf32> -> vector<2x32xf32>
    %7 = arith.addf %3, %6 : vector<2x32xf32>
    %c0_6 = arith.constant 0 : index
    %c0_7 = arith.constant 0 : index
    %8 = vector.load %arg7[%c0_6, %c0_7] : memref<2x32xf32, #tpu.memory_space<vmem>>, vector<2x32xf32>
    tpu.vector_store %arg7[%c0_6, %c0_7], %7 {strides = array<i32>} : memref<2x32xf32, #tpu.memory_space<vmem>>, vector<2x32xf32>,
    %c0_i32_8 = arith.constant 0 : i32
    %9 = arith.cmpi eq, %arg2, %c0_i32_8 : i32
    %10 = arith.extui %9 : i1 to i32
    %c0_i32_9 = arith.constant 0 : i32
    %11 = arith.cmpi ne, %10, %c0_i32_9 : i32
    scf.if %11 {
      %c0_10 = arith.constant 0 : index
      %c0_11 = arith.constant 0 : index
      %12 = vector.load %arg7[%c0_10, %c0_11] : memref<2x32xf32, #tpu.memory_space<vmem>>, vector<2x32xf32>
      %c0_12 = arith.constant 0 : index
      %c0_13 = arith.constant 0 : index
      %13 = vector.load %arg5[%c0_12, %c0_13] : memref<1x32xf32, #tpu.memory_space<vmem>>, vector<1x32xf32>
      %14 = vector.broadcast %13 : vector<1x32xf32> to vector<2x32xf32>
      %15 = arith.addf %12, %14 : vector<2x32xf32>
      %cst_14 = arith.constant 0.000000e+00 : f32
      %16 = vector.broadcast %cst_14 : f32 to vector<2x32xf32>
      %17 = arith.maximumf %15, %16 : vector<2x32xf32>
      %c0_15 = arith.constant 0 : index
      %c0_16 = arith.constant 0 : index
      %18 = vector.load %arg6[%c0_15, %c0_16] : memref<2x32xf32, #tpu.memory_space<vmem>>, vector<2x32xf32>
      tpu.vector_store %arg6[%c0_15, %c0_16], %17 {strides = array<i32>} : memref<2x32xf32, #tpu.memory_space<vmem>>, vector<2x32xf32>,
    } else {
    }
    return
  }
  func.func @transform_0(%arg0: i32, %arg1: i32, %arg2: i32) -> (i32, i32) {
    %c0_i32 = arith.constant 0 : i32
    return %arg0, %arg2 : i32, i32
  }
  func.func @transform_1(%arg0: i32, %arg1: i32, %arg2: i32) -> (i32, i32) {
    %c0_i32 = arith.constant 0 : i32
    return %arg2, %arg1 : i32, i32
  }
  func.func @transform_2(%arg0: i32, %arg1: i32, %arg2: i32) -> (i32, i32) {
    %c0_i32 = arith.constant 0 : i32
    %c0_i32_0 = arith.constant 0 : i32
    return %c0_i32, %arg1 : i32, i32
  }
  func.func @transform_3(%arg0: i32, %arg1: i32, %arg2: i32) -> (i32, i32) {
    %c0_i32 = arith.constant 0 : i32
    return %arg0, %arg1 : i32, i32
  }
}

</mosaic_0001>

<bundles_post_ra>
// kernel: forward.10
= control target key start
LH: loop header
LB: loop body
LE: loop exit
PB: predicated region body
PF: predicated region fallthrough
CT: control target
= control target key end

     0   :  { %s1133_s12 = smov 0   ;;  %s1135_s13 = smov 0   ;;  %s1271_s0 = inlined_call_operand.vmem [shape: bf16[98,64], index: 0, kind: input, shape index: {}]   ;;  %s1272_s1 = inlined_call_operand.vmem [shape: bf16[64,128], index: 1, kind: input, shape index: {}]   ;;  %s1273_s2 = inlined_call_operand.vmem [shape: f32[1,128], index: 2, kind: input, shape index: {}]   ;;  %s1274_s3 = inlined_call_operand.vmem [shape: bf16[98,128], index: 3, kind: output, shape index: {}]  }
   0x1   :  { %s1137_s14 = smov 0   ;;  %s1139_s15 = smov 0  }
   0x2   :  { %s1141_s16 = smov 0  }
   0x3 LB: > { %s794_s17 = sadd.s32 4294967295, %s1079_s16   ;;  %s32_s18 = sadd.s32 1, %s1075_s15  ;;  %s1079_s16 = sphi %s1141_s16, %s13_s16   ;;  %s1075_s15 = sphi %s1139_s15, %s1282_s15   ;;  %s1071_s14 = sphi %s1137_s14, %s1281_s14   ;;  %s1067_s13 = sphi %s1135_s13, %s1280_s13   ;;  %s1063_s12 = sphi %s1133_s12, %s1279_s12  }
   0x4   : > { %p34_p0 = scmp.ge.s32.totalorder %s32_s18, 2  ;;  %s123_s19 = sadd.s32 1, %s1067_s13 }
   0x5   : > { %p133_p1 = scmp.ne.s32.totalorder %s1067_s13, %s1063_s12  ;;  %p134_p2 = scmp.eq.s32.totalorder %s794_s17, 1 }
   0x6   : > { %s1284_s18 = smov (%p34_p0, %s32_s18), 0  ;;  %p800_p4 = scmp.ge.s32.totalorder %s1079_s16, 1 }
   0x7   : > { %p1165_p3 = por %p134_p2, %p133_p1  ;;  %s118_s21 = ssub.s32 %s1075_s15, %s1284_s18 }
   0x8   : > { %p196_p5 = scmp.lt.s32.totalorder %s1079_s16, 3  ;;  %p121_p6 = scmp.eq.s32.totalorder %s118_s21, 0 }
   0xa   : > { %p197_p7 = pnand %p800_p4, %p196_p5 }
   0xb   : > { %s1174_s22 = scalar_select %p121_p6, %s1067_s13, %s123_s19  }
   0xc   : > { %200 = sbr.rel (%p197_p7) target bundleno = 298 (0x12a), region = 32  ;;  %s234_s10 = sand.u32 (!%p197_p7), 1, %s1063_s12  }
   0xd   : > { %s1180_s25 = smul.u32 (!%p197_p7), 7, %s1071_s14 }
   0xe   : > { %s891_s19 = smul.u32 (!%p197_p7), 28, %s234_s10 }
   0xf   : > { %p242_p8 = scmp.lt.s32.totalorder (!%p197_p7), %s1180_s25, 12 }
  0x10   : > { %s1204_s12 = scalar_lea.vmem (!%p197_p7), [#allocation3], %s891_s19  }
  0x11   : > { %v997_v0 = vld [vmem:[%s1272_s1 + $0x18] sm:$0xff]   ;;  %v998_v1 = vld [vmem:[%s1272_s1 + $0x10] sm:$0xff]   ;;  %v999_v2 = vld [vmem:[%s1272_s1 + $0x8] sm:$0xff]   ;;  %s243_s30 = scalar_select %p242_p8, %s1180_s25, 12  ;;  %vm347_vm0 = vcmask 523264  }
  0x12   : > { %867 = vmatprep.subr.bf16.mxu0 %v997_v0  ;;  %883 = vmatprep.subr.bf16.mxu1 %v997_v0  ;;  %v1000_v3 = vld [vmem:[%s1272_s1] sm:$0xff]   ;;  %s513_s21 = ssub.s32 (%p1165_p3), 13, %s1180_s25  ;;  %s841_s23 = smul.u32 (%p1165_p3), 28, %s1071_s14 }
  0x13   : > { %868 = vmatpush3.bf16.msra.mxu0 %v997_v0  ;;  %887 = vmatpush3.bf16.msra.mxu1 %v997_v0  ;;  %s801_s4 = sshll.u32 %s243_s30, 2  ;;  %v814_v8 = vld [vmem:[%s1273_s2] ss:$0 sm:$0xff]  ;;  %p514_p9 = scmp.lt.s32.totalorder (%p1165_p3), %s513_s21, 7 }
  0x14   : > { %869 = vmatprep.subr.bf16.mxu0 %v998_v1  ;;  %884 = vmatprep.subr.bf16.mxu1 %v998_v1  ;;  %s248_s9 = scalar_lea.vmem %s1271_s0, %s801_s4  ;;  %s1217_s27 = scalar_lea.vmem (%p1165_p3), %s1274_s3, %s841_s23  }
  0x15   : > { %v1001_v4 = vld [vmem:[%s248_s9] sm:$0xff]   ;;  %v1002_v5 = vld [vmem:[%s248_s9 + $0x10] sm:$0xff]   ;;  %v1003_v6 = vld [vmem:[%s248_s9 + $0x8] sm:$0xff]  }
  0x16   : > { %875 = vmatprep.mubr.msk.bf16.mxu0 %vm347_vm0, %v1001_v4  ;;  %879 = vmatprep.mubr.msk.bf16.mxu1 %vm347_vm0, %v1002_v5  ;;  %v1004_v7 = vld [vmem:[%s248_s9 + $0x18] ss:$0 sps:$4 sm:$0xff]  }
  0x17   : > { %870 = vmatpush3.bf16.msra.mxu0 %v998_v1  ;;  %888 = vmatpush3.bf16.msra.mxu1 %v998_v1 }
  0x18   : > { %871 = vmatprep.subr.bf16.mxu0 %v999_v2  ;;  %885 = vmatprep.subr.bf16.mxu1 %v999_v2 }
  0x1b   : > { %872 = vmatpush3.bf16.msra.mxu0 %v999_v2  ;;  %889 = vmatpush3.bf16.msra.mxu1 %v999_v2 }
  0x1c   : > { %873 = vmatprep.subr.bf16.mxu0 %v1000_v3  ;;  %886 = vmatprep.subr.bf16.mxu1 %v1000_v3 }
  0x1f   : > { %874 = vmatpush3.bf16.msra.mxu0 %v1000_v3  ;;  %890 = vmatpush3.bf16.msra.mxu1 %v1000_v3 }
  0x22   : > { %876 = vmatmul.mubr.msk.bf16.vlgmr.msra.gmra.mxu0 %vm347_vm0, %v1003_v6  ;;  %880 = vmatmul.mubr.msk.bf16.vlgmr.msra.gmra.mxu1 %vm347_vm0, %v1004_v7 }
  0xe2   : > { %v877_v9 = vpop.f32.mrf.mxu0  ;;  %v881_v10 = vpop.f32.mrf.mxu1 }
  0xe3   : > { %v461_v11 = vadd.f32 %v881_v10, %v814_v8  ;;  %v457_v14 = vadd.f32 %v877_v9, %v814_v8 }
  0xe4   : > { %v394_v12 = vpop.f32.mrf.mxu0  ;;  %v410_v13 = vpop.f32.mrf.mxu1 }
  0xe5   : > { %v468_v15 = vmax.f32 %v461_v11, 0.0  ;;  %v455_v16 = vadd.f32 %v814_v8, %v394_v12  ;;  %v459_v20 = vadd.f32 %v814_v8, %v410_v13  ;;  %v464_v24 = vmax.f32 %v457_v14, 0.0 }
  0xe6   : > { %v878_v17 = vpop.f32.mrf.mxu0  ;;  %v882_v18 = vpop.f32.mrf.mxu1 }
  0xe7   : > { %v840_v19 = vpack.c.bf16 %v468_v15, %v468_v15  ;;  %v458_v21 = vadd.f32 %v878_v17, %v814_v8  ;;  %v462_v28 = vmax.f32 %v455_v16, 0.0  ;;  %v466_v29 = vmax.f32 %v459_v20, 0.0 }
  0xe8   : > { %v397_v22 = vpop.f32.mrf.mxu0  ;;  %v413_v23 = vpop.f32.mrf.mxu1 }
  0xe9   : > { %504 = vst [vmem:[%s1204_s12 + $0x18] sm:$0xf] %v840_v19  ;;  %v465_v25 = vmax.f32 %v458_v21, 0.0  ;;  %v456_v26 = vadd.f32 %v814_v8, %v397_v22  ;;  %v460_v27 = vadd.f32 %v814_v8, %v413_v23 }
  0xeb   : > { %v850_v30 = vpack.c.bf16 %v465_v25, %v464_v24  ;;  %v463_v31 = vmax.f32 %v456_v26, 0.0  ;;  %v467_v32 = vmax.f32 %v460_v27, 0.0  ;;  %511 = sbr.rel (!%p1165_p3) target bundleno = 298 (0x12a), region = 44 }
  0xed   : > { %857 = vst [vmem:[%s1204_s12 + $0x8] sm:$0xff] %v850_v30   ;;  %v845_v33 = vpack.c.bf16 %v463_v31, %v462_v28  ;;  %v855_v34 = vpack.c.bf16 %v467_v32, %v466_v29 }
  0xef   : > { %846 = vst [vmem:[%s1204_s12] sm:$0xff] %v845_v33   ;;  %858 = vst [vmem:[%s1204_s12 + $0x10] sm:$0xff] %v855_v34  }
  0xf0   : > { %s1286_s21 = smov (!%p514_p9, %s513_s21), 7 }
  0xf1   : > { %s822_s28 = sshll.u32 %s1286_s21, 6 }
  0xf2   : > { %p825_p10 = scmp.eq.s32.totalorder %s822_s28, 0 }
  0xf3   : > { %1005 = sdivrem.u32 (!%p825_p10), %s1286_s21, 7 }
  0xf4   : > { %523 = sbr.rel (%p825_p10) target bundleno = 298 (0x12a), region = 48 }
  0xfc   : > { %s1223_s20 = spop.drf %1005 }
  0xfd   : > { %p826_p11 = scmp.le.s32.totalorder %s1223_s20, 0 }
  0xfe   : > { %s1276_s14 = smov (!%p826_p11), %s1217_s27  ;;  %s1277_s25 = smov (!%p826_p11), %s1204_s12 }
  0xff   : > { %721 = sbr.rel (%p826_p11) target bundleno = 273 (0x111), region = 126  ;;  %s1232_s29 = smov (!%p826_p11), 0  }
 0x100   : > { %s1234_s30 = smov (!%p826_p11), 0  }
 0x104 LB: >> { %v541_v35 = vld [vmem:[%s1087_s25] sm:$0xf]  ;;  %v543_v36 = vld [vmem:[%s1087_s25 + $0x4] sm:$0xf]  ;;  %v545_v37 = vld [vmem:[%s1087_s25 + $0x8] sm:$0xf]  ;;  %s1095_s30 = sphi %s1234_s30, %s535_s30   ;;  %s1091_s29 = sphi %s1232_s29, %s1278_s29   ;;  %s1087_s25 = sphi %s1277_s25, %s560_s25   ;;  %s1083_s14 = sphi %s1276_s14, %s561_s14  }
 0x105   : >> { %542 = vst [vmem:[%s1083_s14] sm:$0xf] %v541_v35  ;;  %544 = vst [vmem:[%s1083_s14 + $0x4] sm:$0xf] %v543_v36  ;;  %v547_v38 = vld [vmem:[%s1087_s25 + $0xc] sm:$0xf]  ;;  %s555_s4 = sadd.s32 1, %s1091_s29 }
 0x106   : >> { %546 = vst [vmem:[%s1083_s14 + $0x8] sm:$0xf] %v545_v37  ;;  %v549_v39 = vld [vmem:[%s1087_s25 + $0x10] sm:$0xf]  ;;  %v551_v40 = vld [vmem:[%s1087_s25 + $0x14] sm:$0xf]  ;;  %p556_p12 = scmp.ge.s32.totalorder %s555_s4, %s1223_s20 }
 0x107   : >> { %548 = vst [vmem:[%s1083_s14 + $0xc] sm:$0xf] %v547_v38  ;;  %550 = vst [vmem:[%s1083_s14 + $0x10] sm:$0xf] %v549_v39  ;;  %v553_v41 = vld [vmem:[%s1087_s25 + $0x18] sm:$0xf] }
 0x108   : >> { %552 = vst [vmem:[%s1083_s14 + $0x14] sm:$0xf] %v551_v40  ;;  %554 = vst [vmem:[%s1083_s14 + $0x18] sm:$0xf] %v553_v41  ;;  %s1288_s4 = smov (%p556_p12, %s555_s4), 0  ;;  %s535_s30 = sadd.s32 1, %s1095_s30  }
 0x109   : >> { %s558_s5 = smul.u32 28, %s1288_s4  ;;  %p534_p13 = scmp.ge.s32.totalorder %s535_s30, %s1223_s20 }
 0x10a   : >> { %s1278_s29 = smov %s1288_s4 }
 0x10b   : >> { %s560_s25 = scalar_lea.vmem %s1204_s12, %s558_s5 [#allocation3]   ;;  %s561_s14 = scalar_lea.vmem %s1217_s27, %s558_s5  }
 0x10c   : > { %537 = sbr.rel (!%p534_p13) target bundleno = 260 (0x104), region = 132 }
 0x111 PF: > { %1007 = sdivrem.u32 %s1286_s21, 7 }
 0x112   : > { %s827_s6 = smul.u32 28, %s1223_s20 }
 0x114   : > { %s566_s7 = scalar_lea.vmem %s1204_s12, %s827_s6 [#allocation3]   ;;  %s568_s8 = scalar_lea.vmem %s1217_s27, %s827_s6  }
 0x11a   : > { %s1008_s9 = spop.drf %1007 }
 0x11b   : > { %p829_p0 = scmp.le.s32.totalorder %s1008_s9, 0 }
 0x11c   : > { %s1097_s10 = smov (!%p829_p0), %s568_s8   ;;  %s1101_s11 = smov (!%p829_p0), %s566_s7  }
 0x11d   : > { %735 = sbr.rel (%p829_p0) target bundleno = 298 (0x12a), region = 137  ;;  %s1105_s17 = smov (!%p829_p0), 0  }
 0x11e   : > { %s1109_s19 = smov (!%p829_p0), 0  }
 0x122 LB: >> { %v578_v42 = vld [vmem:[%s1103_s11] sm:$0xf]  ;;  %s580_s23 = sadd.s32 1, %s1107_s17  ;;  %s572_s19 = sadd.s32 1, %s1111_s19   ;;  %s1111_s19 = sphi %s1109_s19, %s572_s19   ;;  %s1107_s17 = sphi %s1105_s17, %s1106_s17   ;;  %s1103_s11 = sphi %s1101_s11, %s585_s11   ;;  %s1099_s10 = sphi %s1097_s10, %s586_s10  }
 0x123   : >> { %579 = vst [vmem:[%s1099_s10] sm:$0xf] %v578_v42  ;;  %p581_p1 = scmp.ge.s32.totalorder %s580_s23, %s1008_s9  ;;  %p571_p2 = scmp.ge.s32.totalorder %s572_s19, %s1008_s9 }
 0x125   : >> { %s1290_s23 = smov (%p581_p1, %s580_s23), 0  ;;  %574 = sbr.rel (!%p571_p2) target bundleno = 290 (0x122), region = 143 }
 0x126   : >> { %s830_s12 = sshll.u32 %s1290_s23, 2  ;;  %s1106_s17 = smov %s1290_s23  }
 0x127   : >> { %s585_s11 = scalar_lea.vmem %s566_s7, %s830_s12 [#allocation3]   ;;  %s586_s10 = scalar_lea.vmem %s568_s8, %s830_s12  }
 0x12a PF: > { %s13_s16 = sadd.s32 1, %s1079_s16   ;;  %s1279_s12 = smov %s1067_s13 }
 0x12b   : > { %p10_p3 = scmp.ge.s32.totalorder %s13_s16, 4   ;;  %s1280_s13 = smov %s1174_s22 }
 0x12c   : > { %s1281_s14 = smov %s1075_s15  ;;  %s1282_s15 = smov %s1284_s18 }
 0x12d   :  { %12 = sbr.rel (!%p10_p3) target bundleno = 3 (0x3), region = 154 }

// kernel: forward.8
= control target key start
LH: loop header
LB: loop body
LE: loop exit
PB: predicated region body
PF: predicated region fallthrough
CT: control target
= control target key end

     0   :  { %s1768_s12 = smov 0   ;;  %s1770_s13 = smov 0   ;;  %s2200_s0 = inlined_call_operand.vmem [shape: bf16[450,16], index: 0, kind: input, shape index: {}]   ;;  %s2201_s1 = inlined_call_operand.vmem [shape: bf16[16,64], index: 1, kind: input, shape index: {}]   ;;  %s2202_s2 = inlined_call_operand.vmem [shape: f32[1,64], index: 2, kind: input, shape index: {}]   ;;  %s2203_s3 = inlined_call_operand.vmem [shape: bf16[450,64], index: 3, kind: output, shape index: {}]  }
   0x1   :  { %s1772_s14 = smov 0   ;;  %s1774_s15 = smov 0  }
   0x2   :  { %s1776_s16 = smov 0  }
   0x3 LB: > { %s1323_s17 = sadd.s32 4294967295, %s1712_s16   ;;  %s32_s18 = sadd.s32 1, %s1708_s15  ;;  %s1712_s16 = sphi %s1776_s16, %s13_s16   ;;  %s1708_s15 = sphi %s1774_s15, %s2211_s15   ;;  %s1704_s14 = sphi %s1772_s14, %s2210_s14   ;;  %s1700_s13 = sphi %s1770_s13, %s2209_s13   ;;  %s1696_s12 = sphi %s1768_s12, %s2208_s12  }
   0x4   : > { %p34_p0 = scmp.ge.s32.totalorder %s32_s18, 2  ;;  %s123_s19 = sadd.s32 1, %s1700_s13 }
   0x5   : > { %p133_p1 = scmp.ne.s32.totalorder %s1700_s13, %s1696_s12  ;;  %p134_p2 = scmp.eq.s32.totalorder %s1323_s17, 1 }
   0x6   : > { %s2213_s18 = smov (%p34_p0, %s32_s18), 0  ;;  %p1329_p4 = scmp.ge.s32.totalorder %s1712_s16, 1 }
   0x7   : > { %p1800_p3 = por %p134_p2, %p133_p1  ;;  %s118_s21 = ssub.s32 %s1708_s15, %s2213_s18 }
   0x8   : > { %p196_p5 = scmp.lt.s32.totalorder %s1712_s16, 3  ;;  %p121_p6 = scmp.eq.s32.totalorder %s118_s21, 0 }
   0xa   : > { %p197_p7 = pnand %p1329_p4, %p196_p5 }
   0xb   : > { %s1809_s22 = scalar_select %p121_p6, %s1700_s13, %s123_s19  }
   0xc   : > { %200 = sbr.rel (%p197_p7) target bundleno = 365 (0x16d), region = 32  ;;  %s234_s4 = sand.u32 (!%p197_p7), 1, %s1696_s12  }
   0xd   : > { %s1816_s25 = smul.u32 (!%p197_p7), 29, %s1704_s14 }
   0xe   : > { %s1954_s7 = smul.u32 (!%p197_p7), 116, %s234_s4 }
   0xf   : > { %p242_p8 = scmp.lt.s32.totalorder (!%p197_p7), %s1816_s25, 56 }
  0x10   : > { %s1965_s8 = scalar_lea.vmem (!%p197_p7), [#allocation3], %s1954_s7  }
  0x11   : > { %v1622_v0 = vld [vmem:[%s2201_s1] sm:$0xff]   ;;  %v1746_v1 = vmov 0.0   ;;  %vm276_vm0 = vcmask 523264   ;;  %vm1747_vm1 = vmmov 0   ;;  %s243_s26 = scalar_select %p242_p8, %s1816_s25, 56  ;;  %vm445_vm2 = vcmask 130048  }
  0x12   : > { %1450 = vmatprep.subr.bf16.mxu0 %v1746_v1  ;;  %1512 = vmatprep.subr.bf16.mxu1 %v1746_v1  ;;  %277 = vst.msk [vmem:[#allocation2] sm:$0xff] %vm276_vm0, %v1746_v1  ;;  %278 = vst.msk [vmem:[#allocation2 + $0x8] sm:$0xff] %vm276_vm0, %v1746_v1  ;;  %v1951_v35 = vld [vmem:[%s2202_s2] ss:$0 sm:$0xff]  ;;  %vm916_vm3 = vcmask 519168   ;;  %s954_s9 = ssub.s32 (%p1800_p3), 57, %s1816_s25 }
  0x13   : > { %1451 = vmatpush3.bf16.msra.mxu0 %v1622_v0  ;;  %1452 = vmatprep.mubr.msk.bf16.mxu0 %vm1747_vm1, %v1746_v1  ;;  %279 = vst.msk [vmem:[#allocation2 + $0x10] sm:$0xff] %vm276_vm0, %v1746_v1  ;;  %280 = vst.msk [vmem:[#allocation2 + $0x18] sm:$0xff] %vm276_vm0, %v1746_v1  ;;  %s1330_s27 = sshll.u32 %s243_s26, 2  ;;  %s1433_s10 = smul.u32 (%p1800_p3), 116, %s1704_s14 }
  0x14   : > { %281 = vst.msk [vmem:[#allocation2 + $0x20] sm:$0xff] %vm276_vm0, %v1746_v1  ;;  %282 = vst.msk [vmem:[#allocation2 + $0x28] sm:$0xff] %vm276_vm0, %v1746_v1  ;;  %1513 = vmatpush3.bf16.msra.mxu1 %v1622_v0  ;;  %1484 = vmatprep.mubr.msk.bf16.mxu1 %vm1747_vm1, %v1746_v1  ;;  %s1886_s30 = scalar_lea.vmem %s2200_s0, %s1330_s27  ;;  %p955_p9 = scmp.lt.s32.totalorder (%p1800_p3), %s954_s9, 29 }
  0x15   : > { %283 = vst.msk [vmem:[#allocation2 + $0x30] sm:$0xff] %vm276_vm0, %v1746_v1  ;;  %284 = vst.msk [vmem:[#allocation2 + $0x38] sm:$0xff] %vm276_vm0, %v1746_v1  ;;  %v1623_v2 = vld [vmem:[%s1886_s30] sm:$0xff]   ;;  %v1625_v4 = vld [vmem:[%s1886_s30 + $0x8] sm:$0xff]   ;;  %s2078_s17 = scalar_lea.vmem (%p1800_p3), %s2203_s3, %s1433_s10  }
  0x16   : > { %285 = vst.msk [vmem:[#allocation2 + $0x40] sm:$0xff] %vm276_vm0, %v1746_v1  ;;  %286 = vst.msk [vmem:[#allocation2 + $0x48] sm:$0xff] %vm276_vm0, %v1746_v1  ;;  %v1624_v3 = vld [vmem:[%s1886_s30 + $0x40] sm:$0xff]   ;;  %1453 = vmatmul.mubr.msk.bf16.vlgmr.msra.gmra.mxu0 %vm445_vm2, %v1623_v2  ;;  %v1626_v5 = vld [vmem:[%s1886_s30 + $0x48] sm:$0xff]  }
  0x17   : > { %287 = vst.msk [vmem:[#allocation2 + $0x50] sm:$0xff] %vm276_vm0, %v1746_v1  ;;  %288 = vst.msk [vmem:[#allocation2 + $0x58] sm:$0xff] %vm276_vm0, %v1746_v1  ;;  %1485 = vmatmul.mubr.msk.bf16.vlgmr.msra.gmra.mxu1 %vm445_vm2, %v1624_v3  ;;  %1456 = vmatprep.mubr.msk.bf16.mxu0 %vm1747_vm1, %v1746_v1  ;;  %v1627_v6 = vld [vmem:[%s1886_s30 + $0x10] sm:$0xff]   ;;  %v1629_v8 = vld [vmem:[%s1886_s30 + $0x18] sm:$0xff]  }
  0x18   : > { %289 = vst.msk [vmem:[#allocation2 + $0x60] sm:$0xff] %vm276_vm0, %v1746_v1  ;;  %290 = vst.msk [vmem:[#allocation2 + $0x68] sm:$0xff] %vm276_vm0, %v1746_v1  ;;  %1488 = vmatprep.mubr.msk.bf16.mxu1 %vm1747_vm1, %v1746_v1  ;;  %v1628_v7 = vld [vmem:[%s1886_s30 + $0x50] sm:$0xff]   ;;  %v1630_v9 = vld [vmem:[%s1886_s30 + $0x58] sm:$0xff]  }
  0x19   : > { %291 = vst.msk [vmem:[#allocation2 + $0x70] sm:$0xff] %vm276_vm0, %v1746_v1  ;;  %292 = vst.msk [vmem:[#allocation2 + $0x78] sm:$0xff] %vm276_vm0, %v1746_v1  ;;  %v1631_v10 = vld [vmem:[%s1886_s30 + $0x20] sm:$0xff]   ;;  %v1633_v12 = vld [vmem:[%s1886_s30 + $0x28] sm:$0xff]  }
  0x1a   : > { %293 = vst.msk [vmem:[#allocation2 + $0x80] sm:$0xff] %vm276_vm0, %v1746_v1  ;;  %294 = vst.msk [vmem:[#allocation2 + $0x88] sm:$0xff] %vm276_vm0, %v1746_v1  ;;  %v1632_v11 = vld [vmem:[%s1886_s30 + $0x60] sm:$0xff]   ;;  %v1634_v13 = vld [vmem:[%s1886_s30 + $0x68] sm:$0xff]  }
  0x1b   : > { %295 = vst.msk [vmem:[#allocation2 + $0x90] sm:$0xff] %vm276_vm0, %v1746_v1  ;;  %296 = vst.msk [vmem:[#allocation2 + $0x98] sm:$0xff] %vm276_vm0, %v1746_v1  ;;  %v1635_v14 = vld [vmem:[%s1886_s30 + $0x30] sm:$0xff]   ;;  %v1637_v16 = vld [vmem:[%s1886_s30 + $0x38] sm:$0xff]  }
  0x1c   : > { %297 = vst.msk [vmem:[#allocation2 + $0xa0] sm:$0xff] %vm276_vm0, %v1746_v1  ;;  %298 = vst.msk [vmem:[#allocation2 + $0xa8] sm:$0xff] %vm276_vm0, %v1746_v1  ;;  %v1636_v15 = vld [vmem:[%s1886_s30 + $0x70] ss:$0 sps:$4 sm:$0xff]   ;;  %v306_v17 = vld [vmem:[#allocation2] sm:$0xff] }
  0x1d   : > { %299 = vst.msk [vmem:[#allocation2 + $0xb0] sm:$0xff] %vm276_vm0, %v1746_v1  ;;  %300 = vst.msk [vmem:[#allocation2 + $0xb8] sm:$0xff] %vm276_vm0, %v1746_v1  ;;  %v307_v23 = vld [vmem:[#allocation2 + $0x8] sm:$0xff]  ;;  %v308_v31 = vld [vmem:[#allocation2 + $0x10] sm:$0xff] }
  0x1e   : > { %301 = vst.msk [vmem:[#allocation2 + $0xc0] sm:$0xff] %vm276_vm0, %v1746_v1  ;;  %302 = vst.msk [vmem:[#allocation2 + $0xc8] sm:$0xff] %vm276_vm0, %v1746_v1  ;;  %1457 = vmatmul.mubr.msk.bf16.gmra.mxu0 %vm445_vm2, %v1625_v4  ;;  %v309_v41 = vld [vmem:[#allocation2 + $0x18] sm:$0xff]  ;;  %v310_v55 = vld [vmem:[#allocation2 + $0x20] sm:$0xff] }
  0x1f   : > { %303 = vst.msk [vmem:[#allocation2 + $0xd0] sm:$0xff] %vm276_vm0, %v1746_v1  ;;  %304 = vst.msk [vmem:[#allocation2 + $0xd8] sm:$0xff] %vm276_vm0, %v1746_v1  ;;  %1489 = vmatmul.mubr.msk.bf16.gmra.mxu1 %vm445_vm2, %v1626_v5  ;;  %1460 = vmatprep.mubr.msk.bf16.mxu0 %vm1747_vm1, %v1746_v1 }
  0x20   : > { %305 = vst.msk [vmem:[#allocation2 + $0xe0] sm:$0xff] %vm276_vm0, %v1746_v1  ;;  %1492 = vmatprep.mubr.msk.bf16.mxu1 %vm1747_vm1, %v1746_v1 }
  0x21   : > { %v322_v18 = vld [vmem:[#allocation2 + $0x80] sm:$0xff]  ;;  %v323_v26 = vld [vmem:[#allocation2 + $0x88] sm:$0xff] }
  0x22   : > { %v324_v34 = vld [vmem:[#allocation2 + $0x90] sm:$0xff]  ;;  %v325_v46 = vld [vmem:[#allocation2 + $0x98] sm:$0xff] }
  0x23   : > { %v326_v61 = vld [vmem:[#allocation2 + $0xa0] sm:$0xff] }
  0x26   : > { %1461 = vmatmul.mubr.msk.bf16.gmra.mxu0 %vm445_vm2, %v1627_v6 }
  0x27   : > { %1493 = vmatmul.mubr.msk.bf16.gmra.mxu1 %vm445_vm2, %v1628_v7  ;;  %1464 = vmatprep.mubr.msk.bf16.mxu0 %vm1747_vm1, %v1746_v1  ;;  %v311_v7 = vld [vmem:[#allocation2 + $0x28] sm:$0xff] }
  0x28   : > { %1496 = vmatprep.mubr.msk.bf16.mxu1 %vm1747_vm1, %v1746_v1 }
  0x2e   : > { %1465 = vmatmul.mubr.msk.bf16.gmra.mxu0 %vm445_vm2, %v1629_v8 }
  0x2f   : > { %1497 = vmatmul.mubr.msk.bf16.gmra.mxu1 %vm445_vm2, %v1630_v9  ;;  %1468 = vmatprep.mubr.msk.bf16.mxu0 %vm1747_vm1, %v1746_v1 }
  0x30   : > { %1500 = vmatprep.mubr.msk.bf16.mxu1 %vm1747_vm1, %v1746_v1 }
  0x36   : > { %1469 = vmatmul.mubr.msk.bf16.gmra.mxu0 %vm445_vm2, %v1631_v10 }
  0x37   : > { %1501 = vmatmul.mubr.msk.bf16.gmra.mxu1 %vm445_vm2, %v1632_v11  ;;  %1472 = vmatprep.mubr.msk.bf16.mxu0 %vm1747_vm1, %v1746_v1 }
  0x38   : > { %1504 = vmatprep.mubr.msk.bf16.mxu1 %vm1747_vm1, %v1746_v1 }
  0x3e   : > { %1473 = vmatmul.mubr.msk.bf16.gmra.mxu0 %vm445_vm2, %v1633_v12 }
  0x3f   : > { %1505 = vmatmul.mubr.msk.bf16.gmra.mxu1 %vm445_vm2, %v1634_v13  ;;  %1476 = vmatprep.mubr.msk.bf16.mxu0 %vm1747_vm1, %v1746_v1  ;;  %v327_v13 = vld [vmem:[#allocation2 + $0xa8] sm:$0xff] }
  0x40   : > { %1508 = vmatprep.mubr.msk.bf16.mxu1 %vm1747_vm1, %v1746_v1 }
  0x46   : > { %1477 = vmatmul.mubr.msk.bf16.gmra.mxu0 %vm445_vm2, %v1635_v14 }
  0x47   : > { %1509 = vmatmul.mubr.msk.bf16.gmra.mxu1 %vm445_vm2, %v1636_v15  ;;  %1480 = vmatprep.mubr.msk.bf16.mxu0 %vm1747_vm1, %v1746_v1 }
  0x4e   : > { %1481 = vmatmul.mubr.msk.bf16.gmra.mxu0 %vm445_vm2, %v1637_v16 }
  0xd6   : > { %v525_v19 = vpop.f32.mrf.mxu0 }
  0xd7   : > { %v643_v20 = vadd.f32 %v525_v19, %v306_v17  ;;  %v589_v21 = vpop.f32.mrf.mxu1 }
  0xd8   : > { %v1454_v22 = vpop.f32.mrf.mxu0  ;;  %v659_v24 = vadd.f32 %v589_v21, %v322_v18 }
  0xd9   : > { %673 = vst.msk [vmem:[#allocation2] sm:$0xff] %vm276_vm0, %v643_v20  ;;  %v1486_v25 = vpop.f32.mrf.mxu1 }
  0xda   : > { %v528_v27 = vpop.f32.mrf.mxu0  ;;  %689 = vst.msk [vmem:[#allocation2 + $0x80] sm:$0xff] %vm276_vm0, %v659_v24 }
  0xdb   : > { %v644_v28 = vadd.f32 %v528_v27, %v307_v23  ;;  %v592_v29 = vpop.f32.mrf.mxu1  ;;  %v312_v23 = vld [vmem:[#allocation2 + $0x30] sm:$0xff] }
  0xdc   : > { %v1455_v30 = vpop.f32.mrf.mxu0  ;;  %v660_v32 = vadd.f32 %v592_v29, %v323_v26  ;;  %v328_v29 = vld [vmem:[#allocation2 + $0xb0] sm:$0xff] }
  0xdd   : > { %674 = vst.msk [vmem:[#allocation2 + $0x8] sm:$0xff] %vm276_vm0, %v644_v28  ;;  %v1487_v33 = vpop.f32.mrf.mxu1 }
  0xde   : > { %v533_v36 = vpop.f32.mrf.mxu0  ;;  %690 = vst.msk [vmem:[#allocation2 + $0x88] sm:$0xff] %vm276_vm0, %v660_v32 }
  0xdf   : > { %v645_v37 = vadd.f32 %v533_v36, %v308_v31  ;;  %v597_v38 = vpop.f32.mrf.mxu1 }
  0xe0   : > { %v705_v39 = vld [vmem:[#allocation2] sm:$0xff]  ;;  %v1458_v40 = vpop.f32.mrf.mxu0  ;;  %v661_v42 = vadd.f32 %v597_v38, %v324_v34 }
  0xe1   : > { %v741_v43 = vadd.f32 %v1951_v35, %v705_v39  ;;  %v721_v44 = vld [vmem:[#allocation2 + $0x80] sm:$0xff]  ;;  %675 = vst.msk [vmem:[#allocation2 + $0x10] sm:$0xff] %vm276_vm0, %v645_v37  ;;  %v1490_v45 = vpop.f32.mrf.mxu1  ;;  %v313_v40 = vld [vmem:[#allocation2 + $0x38] sm:$0xff] }
  0xe2   : > { %v757_v47 = vadd.f32 %v1951_v35, %v721_v44  ;;  %v536_v48 = vpop.f32.mrf.mxu0  ;;  %691 = vst.msk [vmem:[#allocation2 + $0x90] sm:$0xff] %vm276_vm0, %v661_v42 }
  0xe3   : > { %v770_v49 = vmax.f32 %v741_v43, 0.0  ;;  %v646_v50 = vadd.f32 %v536_v48, %v309_v41  ;;  %v600_v51 = vpop.f32.mrf.mxu1 }
  0xe4   : > { %v706_v52 = vld [vmem:[#allocation2 + $0x8] sm:$0xff]  ;;  %v786_v53 = vmax.f32 %v757_v47, 0.0  ;;  %v1459_v54 = vpop.f32.mrf.mxu0  ;;  %v662_v56 = vadd.f32 %v600_v51, %v325_v46  ;;  %v329_v46 = vld [vmem:[#allocation2 + $0xb8] sm:$0xff] }
  0xe5   : > { %v1404_v57 = vpack.c.bf16 %v770_v49, %v770_v49  ;;  %v742_v58 = vadd.f32 %v1951_v35, %v706_v52  ;;  %v722_v59 = vld [vmem:[#allocation2 + $0x88] sm:$0xff]  ;;  %676 = vst.msk [vmem:[#allocation2 + $0x18] sm:$0xff] %vm276_vm0, %v646_v50  ;;  %v1491_v60 = vpop.f32.mrf.mxu1 }
  0xe6   : > { %v1420_v62 = vpack.c.bf16 %v786_v53, %v786_v53  ;;  %v758_v63 = vadd.f32 %v1951_v35, %v722_v59  ;;  %v541_v0 = vpop.f32.mrf.mxu0  ;;  %692 = vst.msk [vmem:[#allocation2 + $0x98] sm:$0xff] %vm276_vm0, %v662_v56  ;;  %v314_v56 = vld [vmem:[#allocation2 + $0x40] sm:$0xff] }
  0xe7   : > { %917 = vst.msk [vmem:[%s1965_s8] sm:$0xf] %vm916_vm3, %v1404_v57  ;;  %v771_v1 = vmax.f32 %v742_v58, 0.0  ;;  %v647_v2 = vadd.f32 %v541_v0, %v310_v55  ;;  %v605_v3 = vpop.f32.mrf.mxu1 }
  0xe8   : > { %933 = vst.msk [vmem:[%s1965_s8 + $0x40] sm:$0xf] %vm916_vm3, %v1420_v62  ;;  %v707_v4 = vld [vmem:[#allocation2 + $0x10] sm:$0xff]  ;;  %v787_v5 = vmax.f32 %v758_v63, 0.0  ;;  %v1462_v6 = vpop.f32.mrf.mxu0  ;;  %v663_v8 = vadd.f32 %v605_v3, %v326_v61  ;;  %v330_v62 = vld [vmem:[#allocation2 + $0xc0] sm:$0xff] }
  0xe9   : > { %v1405_v9 = vpack.c.bf16 %v771_v1, %v771_v1  ;;  %v743_v10 = vadd.f32 %v1951_v35, %v707_v4  ;;  %v723_v11 = vld [vmem:[#allocation2 + $0x90] sm:$0xff]  ;;  %677 = vst.msk [vmem:[#allocation2 + $0x20] sm:$0xff] %vm276_vm0, %v647_v2  ;;  %v1494_v12 = vpop.f32.mrf.mxu1 }
  0xea   : > { %v1421_v14 = vpack.c.bf16 %v787_v5, %v787_v5  ;;  %v759_v15 = vadd.f32 %v1951_v35, %v723_v11  ;;  %v544_v16 = vpop.f32.mrf.mxu0  ;;  %693 = vst.msk [vmem:[#allocation2 + $0xa0] sm:$0xff] %vm276_vm0, %v663_v8  ;;  %v315_v8 = vld [vmem:[#allocation2 + $0x48] sm:$0xff] }
  0xeb   : > { %918 = vst.msk [vmem:[%s1965_s8 + $0x4] sm:$0xf] %vm916_vm3, %v1405_v9  ;;  %v772_v17 = vmax.f32 %v743_v10, 0.0  ;;  %v648_v18 = vadd.f32 %v544_v16, %v311_v7  ;;  %v608_v19 = vpop.f32.mrf.mxu1 }
  0xec   : > { %934 = vst.msk [vmem:[%s1965_s8 + $0x44] sm:$0xf] %vm916_vm3, %v1421_v14  ;;  %v708_v20 = vld [vmem:[#allocation2 + $0x18] sm:$0xff]  ;;  %v788_v21 = vmax.f32 %v759_v15, 0.0  ;;  %v1463_v22 = vpop.f32.mrf.mxu0  ;;  %v664_v24 = vadd.f32 %v608_v19, %v327_v13  ;;  %v331_v14 = vld [vmem:[#allocation2 + $0xc8] sm:$0xff] }
  0xed   : > { %v1406_v25 = vpack.c.bf16 %v772_v17, %v772_v17  ;;  %v744_v26 = vadd.f32 %v1951_v35, %v708_v20  ;;  %v724_v27 = vld [vmem:[#allocation2 + $0x98] sm:$0xff]  ;;  %678 = vst.msk [vmem:[#allocation2 + $0x28] sm:$0xff] %vm276_vm0, %v648_v18  ;;  %v1495_v28 = vpop.f32.mrf.mxu1 }
  0xee   : > { %v1422_v30 = vpack.c.bf16 %v788_v21, %v788_v21  ;;  %v760_v31 = vadd.f32 %v1951_v35, %v724_v27  ;;  %v549_v32 = vpop.f32.mrf.mxu0  ;;  %694 = vst.msk [vmem:[#allocation2 + $0xa8] sm:$0xff] %vm276_vm0, %v664_v24  ;;  %v316_v24 = vld [vmem:[#allocation2 + $0x50] sm:$0xff] }
  0xef   : > { %919 = vst.msk [vmem:[%s1965_s8 + $0x8] sm:$0xf] %vm916_vm3, %v1406_v25  ;;  %v773_v33 = vmax.f32 %v744_v26, 0.0  ;;  %v649_v34 = vadd.f32 %v549_v32, %v312_v23  ;;  %v613_v36 = vpop.f32.mrf.mxu1 }
  0xf0   : > { %935 = vst.msk [vmem:[%s1965_s8 + $0x48] sm:$0xf] %vm916_vm3, %v1422_v30  ;;  %v709_v37 = vld [vmem:[#allocation2 + $0x20] sm:$0xff]  ;;  %v789_v38 = vmax.f32 %v760_v31, 0.0  ;;  %v1466_v39 = vpop.f32.mrf.mxu0  ;;  %v665_v41 = vadd.f32 %v613_v36, %v328_v29  ;;  %v332_v30 = vld [vmem:[#allocation2 + $0xd0] sm:$0xff] }
  0xf1   : > { %v1407_v42 = vpack.c.bf16 %v773_v33, %v773_v33  ;;  %v745_v43 = vadd.f32 %v1951_v35, %v709_v37  ;;  %v725_v44 = vld [vmem:[#allocation2 + $0xa0] sm:$0xff]  ;;  %679 = vst.msk [vmem:[#allocation2 + $0x30] sm:$0xff] %vm276_vm0, %v649_v34  ;;  %v1498_v45 = vpop.f32.mrf.mxu1 }
  0xf2   : > { %v1423_v47 = vpack.c.bf16 %v789_v38, %v789_v38  ;;  %v761_v48 = vadd.f32 %v1951_v35, %v725_v44  ;;  %v552_v49 = vpop.f32.mrf.mxu0  ;;  %695 = vst.msk [vmem:[#allocation2 + $0xb0] sm:$0xff] %vm276_vm0, %v665_v41  ;;  %v317_v41 = vld [vmem:[#allocation2 + $0x58] sm:$0xff] }
  0xf3   : > { %920 = vst.msk [vmem:[%s1965_s8 + $0xc] sm:$0xf] %vm916_vm3, %v1407_v42  ;;  %v774_v50 = vmax.f32 %v745_v43, 0.0  ;;  %v650_v51 = vadd.f32 %v552_v49, %v313_v40  ;;  %v616_v52 = vpop.f32.mrf.mxu1 }
  0xf4   : > { %936 = vst.msk [vmem:[%s1965_s8 + $0x4c] sm:$0xf] %vm916_vm3, %v1423_v47  ;;  %v710_v53 = vld [vmem:[#allocation2 + $0x28] sm:$0xff]  ;;  %v790_v54 = vmax.f32 %v761_v48, 0.0  ;;  %v1467_v55 = vpop.f32.mrf.mxu0  ;;  %v666_v57 = vadd.f32 %v616_v52, %v329_v46  ;;  %v333_v47 = vld [vmem:[#allocation2 + $0xd8] sm:$0xff] }
  0xf5   : > { %v1408_v58 = vpack.c.bf16 %v774_v50, %v774_v50  ;;  %v746_v59 = vadd.f32 %v1951_v35, %v710_v53  ;;  %v726_v60 = vld [vmem:[#allocation2 + $0xa8] sm:$0xff]  ;;  %680 = vst.msk [vmem:[#allocation2 + $0x38] sm:$0xff] %vm276_vm0, %v650_v51  ;;  %v1499_v61 = vpop.f32.mrf.mxu1 }
  0xf6   : > { %v1424_v63 = vpack.c.bf16 %v790_v54, %v790_v54  ;;  %v762_v0 = vadd.f32 %v1951_v35, %v726_v60  ;;  %v557_v1 = vpop.f32.mrf.mxu0  ;;  %696 = vst.msk [vmem:[#allocation2 + $0xb8] sm:$0xff] %vm276_vm0, %v666_v57  ;;  %v318_v57 = vld [vmem:[#allocation2 + $0x60] sm:$0xff] }
  0xf7   : > { %921 = vst.msk [vmem:[%s1965_s8 + $0x10] sm:$0xf] %vm916_vm3, %v1408_v58  ;;  %v775_v2 = vmax.f32 %v746_v59, 0.0  ;;  %v651_v3 = vadd.f32 %v557_v1, %v314_v56  ;;  %v621_v4 = vpop.f32.mrf.mxu1 }
  0xf8   : > { %937 = vst.msk [vmem:[%s1965_s8 + $0x50] sm:$0xf] %vm916_vm3, %v1424_v63  ;;  %v711_v5 = vld [vmem:[#allocation2 + $0x30] sm:$0xff]  ;;  %v791_v6 = vmax.f32 %v762_v0, 0.0  ;;  %v1470_v7 = vpop.f32.mrf.mxu0  ;;  %v667_v9 = vadd.f32 %v621_v4, %v330_v62  ;;  %v334_v63 = vld [vmem:[#allocation2 + $0xe0] sm:$0xff] }
  0xf9   : > { %v1409_v10 = vpack.c.bf16 %v775_v2, %v775_v2  ;;  %v747_v11 = vadd.f32 %v1951_v35, %v711_v5  ;;  %v727_v12 = vld [vmem:[#allocation2 + $0xb0] sm:$0xff]  ;;  %681 = vst.msk [vmem:[#allocation2 + $0x40] sm:$0xff] %vm276_vm0, %v651_v3  ;;  %v1502_v13 = vpop.f32.mrf.mxu1 }
  0xfa   : > { %v1425_v15 = vpack.c.bf16 %v791_v6, %v791_v6  ;;  %v763_v16 = vadd.f32 %v1951_v35, %v727_v12  ;;  %v560_v17 = vpop.f32.mrf.mxu0  ;;  %697 = vst.msk [vmem:[#allocation2 + $0xc0] sm:$0xff] %vm276_vm0, %v667_v9  ;;  %v319_v9 = vld [vmem:[#allocation2 + $0x68] sm:$0xff] }
  0xfb   : > { %922 = vst.msk [vmem:[%s1965_s8 + $0x14] sm:$0xf] %vm916_vm3, %v1409_v10  ;;  %v776_v18 = vmax.f32 %v747_v11, 0.0  ;;  %v652_v19 = vadd.f32 %v560_v17, %v315_v8  ;;  %v624_v20 = vpop.f32.mrf.mxu1 }
  0xfc   : > { %938 = vst.msk [vmem:[%s1965_s8 + $0x54] sm:$0xf] %vm916_vm3, %v1425_v15  ;;  %v712_v21 = vld [vmem:[#allocation2 + $0x38] sm:$0xff]  ;;  %v792_v22 = vmax.f32 %v763_v16, 0.0  ;;  %v1471_v23 = vpop.f32.mrf.mxu0  ;;  %v668_v25 = vadd.f32 %v624_v20, %v331_v14 }
  0xfd   : > { %v1410_v26 = vpack.c.bf16 %v776_v18, %v776_v18  ;;  %v748_v27 = vadd.f32 %v1951_v35, %v712_v21  ;;  %v728_v28 = vld [vmem:[#allocation2 + $0xb8] sm:$0xff]  ;;  %682 = vst.msk [vmem:[#allocation2 + $0x48] sm:$0xff] %vm276_vm0, %v652_v19  ;;  %v1503_v29 = vpop.f32.mrf.mxu1 }
  0xfe   : > { %v1426_v31 = vpack.c.bf16 %v792_v22, %v792_v22  ;;  %v764_v32 = vadd.f32 %v1951_v35, %v728_v28  ;;  %v565_v33 = vpop.f32.mrf.mxu0  ;;  %698 = vst.msk [vmem:[#allocation2 + $0xc8] sm:$0xff] %vm276_vm0, %v668_v25 }
  0xff   : > { %923 = vst.msk [vmem:[%s1965_s8 + $0x18] sm:$0xf] %vm916_vm3, %v1410_v26  ;;  %v777_v34 = vmax.f32 %v748_v27, 0.0  ;;  %v653_v36 = vadd.f32 %v565_v33, %v316_v24  ;;  %v629_v37 = vpop.f32.mrf.mxu1  ;;  %v320_v24 = vld [vmem:[#allocation2 + $0x70] sm:$0xff] }
 0x100   : > { %939 = vst.msk [vmem:[%s1965_s8 + $0x58] sm:$0xf] %vm916_vm3, %v1426_v31  ;;  %v713_v38 = vld [vmem:[#allocation2 + $0x40] sm:$0xff]  ;;  %v793_v39 = vmax.f32 %v764_v32, 0.0  ;;  %v1474_v40 = vpop.f32.mrf.mxu0  ;;  %v669_v42 = vadd.f32 %v629_v37, %v332_v30 }
 0x101   : > { %v1411_v43 = vpack.c.bf16 %v777_v34, %v777_v34  ;;  %v749_v44 = vadd.f32 %v1951_v35, %v713_v38  ;;  %v729_v45 = vld [vmem:[#allocation2 + $0xc0] sm:$0xff]  ;;  %683 = vst.msk [vmem:[#allocation2 + $0x50] sm:$0xff] %vm276_vm0, %v653_v36  ;;  %v1506_v46 = vpop.f32.mrf.mxu1  ;;  %v321_v38 = vld [vmem:[#allocation2 + $0x78] sm:$0xff] }
 0x102   : > { %v1427_v48 = vpack.c.bf16 %v793_v39, %v793_v39  ;;  %v765_v49 = vadd.f32 %v1951_v35, %v729_v45  ;;  %v568_v50 = vpop.f32.mrf.mxu0  ;;  %699 = vst.msk [vmem:[#allocation2 + $0xd0] sm:$0xff] %vm276_vm0, %v669_v42 }
 0x103   : > { %924 = vst.msk [vmem:[%s1965_s8 + $0x1c] sm:$0xf] %vm916_vm3, %v1411_v43  ;;  %v778_v51 = vmax.f32 %v749_v44, 0.0  ;;  %v654_v52 = vadd.f32 %v568_v50, %v317_v41  ;;  %v632_v53 = vpop.f32.mrf.mxu1 }
 0x104   : > { %940 = vst.msk [vmem:[%s1965_s8 + $0x5c] sm:$0xf] %vm916_vm3, %v1427_v48  ;;  %v714_v54 = vld [vmem:[#allocation2 + $0x48] sm:$0xff]  ;;  %v794_v55 = vmax.f32 %v765_v49, 0.0  ;;  %v1475_v56 = vpop.f32.mrf.mxu0  ;;  %v670_v58 = vadd.f32 %v632_v53, %v333_v47 }
 0x105   : > { %v1412_v59 = vpack.c.bf16 %v778_v51, %v778_v51  ;;  %v750_v60 = vadd.f32 %v1951_v35, %v714_v54  ;;  %v730_v61 = vld [vmem:[#allocation2 + $0xc8] sm:$0xff]  ;;  %684 = vst.msk [vmem:[#allocation2 + $0x58] sm:$0xff] %vm276_vm0, %v654_v52  ;;  %v1507_v62 = vpop.f32.mrf.mxu1 }
 0x106   : > { %v1428_v0 = vpack.c.bf16 %v794_v55, %v794_v55  ;;  %v766_v1 = vadd.f32 %v1951_v35, %v730_v61  ;;  %v573_v2 = vpop.f32.mrf.mxu0  ;;  %700 = vst.msk [vmem:[#allocation2 + $0xd8] sm:$0xff] %vm276_vm0, %v670_v58 }
 0x107   : > { %925 = vst.msk [vmem:[%s1965_s8 + $0x20] sm:$0xf] %vm916_vm3, %v1412_v59  ;;  %v779_v3 = vmax.f32 %v750_v60, 0.0  ;;  %v655_v4 = vadd.f32 %v573_v2, %v318_v57  ;;  %v637_v5 = vpop.f32.mrf.mxu1 }
 0x108   : > { %941 = vst.msk [vmem:[%s1965_s8 + $0x60] sm:$0xf] %vm916_vm3, %v1428_v0  ;;  %v715_v6 = vld [vmem:[#allocation2 + $0x50] sm:$0xff]  ;;  %v795_v7 = vmax.f32 %v766_v1, 0.0  ;;  %v1478_v8 = vpop.f32.mrf.mxu0  ;;  %v671_v10 = vadd.f32 %v637_v5, %v334_v63 }
 0x109   : > { %v1413_v11 = vpack.c.bf16 %v779_v3, %v779_v3  ;;  %v751_v12 = vadd.f32 %v1951_v35, %v715_v6  ;;  %v731_v13 = vld [vmem:[#allocation2 + $0xd0] sm:$0xff]  ;;  %685 = vst.msk [vmem:[#allocation2 + $0x60] sm:$0xff] %vm276_vm0, %v655_v4  ;;  %v1510_v14 = vpop.f32.mrf.mxu1 }
 0x10a   : > { %v1429_v15 = vpack.c.bf16 %v795_v7, %v795_v7  ;;  %v767_v16 = vadd.f32 %v1951_v35, %v731_v13  ;;  %v576_v17 = vpop.f32.mrf.mxu0  ;;  %701 = vst.msk [vmem:[#allocation2 + $0xe0] sm:$0xff] %vm276_vm0, %v671_v10 }
 0x10b   : > { %926 = vst.msk [vmem:[%s1965_s8 + $0x24] sm:$0xf] %vm916_vm3, %v1413_v11  ;;  %v780_v18 = vmax.f32 %v751_v12, 0.0  ;;  %v656_v19 = vadd.f32 %v576_v17, %v319_v9  ;;  %v640_v20 = vpop.f32.mrf.mxu1 }
 0x10c   : > { %942 = vst.msk [vmem:[%s1965_s8 + $0x64] sm:$0xf] %vm916_vm3, %v1429_v15  ;;  %v716_v21 = vld [vmem:[#allocation2 + $0x58] sm:$0xff]  ;;  %v796_v22 = vmax.f32 %v767_v16, 0.0  ;;  %v1479_v23 = vpop.f32.mrf.mxu0 }
 0x10d   : > { %v1414_v25 = vpack.c.bf16 %v780_v18, %v780_v18  ;;  %v752_v26 = vadd.f32 %v1951_v35, %v716_v21  ;;  %v732_v27 = vld [vmem:[#allocation2 + $0xd8] sm:$0xff]  ;;  %686 = vst.msk [vmem:[#allocation2 + $0x68] sm:$0xff] %vm276_vm0, %v656_v19  ;;  %v1511_v28 = vpop.f32.mrf.mxu1 }
 0x10e   : > { %v1430_v29 = vpack.c.bf16 %v796_v22, %v796_v22  ;;  %v768_v30 = vadd.f32 %v1951_v35, %v732_v27  ;;  %v581_v31 = vpop.f32.mrf.mxu0 }
 0x10f   : > { %927 = vst.msk [vmem:[%s1965_s8 + $0x28] sm:$0xf] %vm916_vm3, %v1414_v25  ;;  %v781_v32 = vmax.f32 %v752_v26, 0.0  ;;  %v657_v33 = vadd.f32 %v581_v31, %v320_v24 }
 0x110   : > { %943 = vst.msk [vmem:[%s1965_s8 + $0x68] sm:$0xf] %vm916_vm3, %v1430_v29  ;;  %v717_v34 = vld [vmem:[#allocation2 + $0x60] sm:$0xff]  ;;  %v797_v36 = vmax.f32 %v768_v30, 0.0  ;;  %v1482_v37 = vpop.f32.mrf.mxu0 }
 0x111   : > { %v1415_v39 = vpack.c.bf16 %v781_v32, %v781_v32  ;;  %v753_v40 = vadd.f32 %v1951_v35, %v717_v34  ;;  %v733_v41 = vld [vmem:[#allocation2 + $0xe0] sm:$0xff]  ;;  %687 = vst.msk [vmem:[#allocation2 + $0x70] sm:$0xff] %vm276_vm0, %v657_v33 }
 0x112   : > { %v1431_v42 = vpack.c.bf16 %v797_v36, %v797_v36  ;;  %v769_v43 = vadd.f32 %v1951_v35, %v733_v41  ;;  %v584_v44 = vpop.f32.mrf.mxu0 }
 0x113   : > { %928 = vst.msk [vmem:[%s1965_s8 + $0x2c] sm:$0xf] %vm916_vm3, %v1415_v39  ;;  %v782_v45 = vmax.f32 %v753_v40, 0.0  ;;  %v658_v46 = vadd.f32 %v584_v44, %v321_v38 }
 0x114   : > { %944 = vst.msk [vmem:[%s1965_s8 + $0x6c] sm:$0xf] %vm916_vm3, %v1431_v42  ;;  %v718_v47 = vld [vmem:[#allocation2 + $0x68] sm:$0xff]  ;;  %v798_v48 = vmax.f32 %v769_v43, 0.0  ;;  %v1483_v49 = vpop.f32.mrf.mxu0 }
 0x115   : > { %v1416_v50 = vpack.c.bf16 %v782_v45, %v782_v45  ;;  %v754_v51 = vadd.f32 %v1951_v35, %v718_v47  ;;  %688 = vst.msk [vmem:[#allocation2 + $0x78] sm:$0xff] %vm276_vm0, %v658_v46 }
 0x116   : > { %v1432_v52 = vpack.c.bf16 %v798_v48, %v798_v48 }
 0x117   : > { %929 = vst.msk [vmem:[%s1965_s8 + $0x30] sm:$0xf] %vm916_vm3, %v1416_v50  ;;  %v783_v53 = vmax.f32 %v754_v51, 0.0 }
 0x118   : > { %945 = vst.msk [vmem:[%s1965_s8 + $0x70] sm:$0xf] %vm916_vm3, %v1432_v52  ;;  %v719_v54 = vld [vmem:[#allocation2 + $0x70] sm:$0xff] }
 0x119   : > { %v1417_v55 = vpack.c.bf16 %v783_v53, %v783_v53  ;;  %v755_v56 = vadd.f32 %v1951_v35, %v719_v54 }
 0x11b   : > { %930 = vst.msk [vmem:[%s1965_s8 + $0x34] sm:$0xf] %vm916_vm3, %v1417_v55  ;;  %v784_v57 = vmax.f32 %v755_v56, 0.0 }
 0x11c   : > { %v720_v58 = vld [vmem:[#allocation2 + $0x78] sm:$0xff] }
 0x11d   : > { %v1418_v59 = vpack.c.bf16 %v784_v57, %v784_v57  ;;  %v756_v60 = vadd.f32 %v1951_v35, %v720_v58 }
 0x11f   : > { %931 = vst.msk [vmem:[%s1965_s8 + $0x38] sm:$0xf] %vm916_vm3, %v1418_v59  ;;  %v785_v61 = vmax.f32 %v756_v60, 0.0  ;;  %952 = sbr.rel (!%p1800_p3) target bundleno = 365 (0x16d), region = 44 }
 0x121   : > { %v1419_v62 = vpack.c.bf16 %v785_v61, %v785_v61 }
 0x123   : > { %932 = vst.msk [vmem:[%s1965_s8 + $0x3c] sm:$0xf] %vm916_vm3, %v1419_v62 }
 0x124   : > { %s2215_s9 = smov (!%p955_p9, %s954_s9), 29 }
 0x125   : > { %s1392_s19 = sshll.u32 %s2215_s9, 6 }
 0x126   : > { %p1395_p10 = scmp.eq.s32.totalorder %s1392_s19, 0 }
 0x127   : > { %1638 = sdivrem.u32 (!%p1395_p10), %s2215_s9, 29 }
 0x128   : > { %964 = sbr.rel (%p1395_p10) target bundleno = 365 (0x16d), region = 48 }
 0x130   : > { %s2084_s20 = spop.drf %1638 }
 0x131   : > { %p1396_p11 = scmp.le.s32.totalorder %s2084_s20, 0 }
 0x132   : > { %s2205_s14 = smov (!%p1396_p11), %s2078_s17  ;;  %s2206_s21 = smov (!%p1396_p11), %s1965_s8 }
 0x133   : > { %1250 = sbr.rel (%p1396_p11) target bundleno = 340 (0x154), region = 126  ;;  %s2093_s23 = smov (!%p1396_p11), 0  }
 0x134   : > { %s2095_s24 = smov (!%p1396_p11), 0  }
 0x138 LB: >> { %v982_v35 = vld [vmem:[%s1720_s21] sm:$0xf]  ;;  %v984_v63 = vld [vmem:[%s1720_s21 + $0x4] sm:$0xf]  ;;  %v986_v0 = vld [vmem:[%s1720_s21 + $0x8] sm:$0xf]  ;;  %s1728_s24 = sphi %s2095_s24, %s976_s24   ;;  %s1724_s23 = sphi %s2093_s23, %s2207_s23   ;;  %s1720_s21 = sphi %s2206_s21, %s1045_s21   ;;  %s1716_s14 = sphi %s2205_s14, %s1046_s14  }
 0x139   : >> { %983 = vst [vmem:[%s1716_s14] sm:$0xf] %v982_v35  ;;  %985 = vst [vmem:[%s1716_s14 + $0x4] sm:$0xf] %v984_v63  ;;  %v988_v1 = vld [vmem:[%s1720_s21 + $0xc] sm:$0xf]  ;;  %s1040_s25 = sadd.s32 1, %s1724_s23 }
 0x13a   : >> { %987 = vst [vmem:[%s1716_s14 + $0x8] sm:$0xf] %v986_v0  ;;  %v990_v2 = vld [vmem:[%s1720_s21 + $0x10] sm:$0xf]  ;;  %v992_v3 = vld [vmem:[%s1720_s21 + $0x14] sm:$0xf]  ;;  %p1041_p12 = scmp.ge.s32.totalorder %s1040_s25, %s2084_s20 }
 0x13b   : >> { %989 = vst [vmem:[%s1716_s14 + $0xc] sm:$0xf] %v988_v1  ;;  %991 = vst [vmem:[%s1716_s14 + $0x10] sm:$0xf] %v990_v2  ;;  %v994_v4 = vld [vmem:[%s1720_s21 + $0x18] sm:$0xf] }
 0x13c   : >> { %993 = vst [vmem:[%s1716_s14 + $0x14] sm:$0xf] %v992_v3  ;;  %v996_v5 = vld [vmem:[%s1720_s21 + $0x1c] sm:$0xf]  ;;  %v998_v6 = vld [vmem:[%s1720_s21 + $0x20] sm:$0xf] }
 0x13d   : >> { %995 = vst [vmem:[%s1716_s14 + $0x18] sm:$0xf] %v994_v4  ;;  %997 = vst [vmem:[%s1716_s14 + $0x1c] sm:$0xf] %v996_v5  ;;  %v1000_v7 = vld [vmem:[%s1720_s21 + $0x24] sm:$0xf] }
 0x13e   : >> { %999 = vst [vmem:[%s1716_s14 + $0x20] sm:$0xf] %v998_v6  ;;  %v1002_v8 = vld [vmem:[%s1720_s21 + $0x28] sm:$0xf]  ;;  %v1004_v9 = vld [vmem:[%s1720_s21 + $0x2c] sm:$0xf] }
 0x13f   : >> { %1001 = vst [vmem:[%s1716_s14 + $0x24] sm:$0xf] %v1000_v7  ;;  %1003 = vst [vmem:[%s1716_s14 + $0x28] sm:$0xf] %v1002_v8  ;;  %v1006_v10 = vld [vmem:[%s1720_s21 + $0x30] sm:$0xf] }
 0x140   : >> { %1005 = vst [vmem:[%s1716_s14 + $0x2c] sm:$0xf] %v1004_v9  ;;  %v1008_v11 = vld [vmem:[%s1720_s21 + $0x34] sm:$0xf]  ;;  %v1010_v12 = vld [vmem:[%s1720_s21 + $0x38] sm:$0xf] }
 0x141   : >> { %1007 = vst [vmem:[%s1716_s14 + $0x30] sm:$0xf] %v1006_v10  ;;  %1009 = vst [vmem:[%s1716_s14 + $0x34] sm:$0xf] %v1008_v11  ;;  %v1012_v13 = vld [vmem:[%s1720_s21 + $0x3c] sm:$0xf] }
 0x142   : >> { %1011 = vst [vmem:[%s1716_s14 + $0x38] sm:$0xf] %v1010_v12  ;;  %v1014_v14 = vld [vmem:[%s1720_s21 + $0x40] sm:$0xf]  ;;  %v1016_v15 = vld [vmem:[%s1720_s21 + $0x44] sm:$0xf] }
 0x143   : >> { %1013 = vst [vmem:[%s1716_s14 + $0x3c] sm:$0xf] %v1012_v13  ;;  %1015 = vst [vmem:[%s1716_s14 + $0x40] sm:$0xf] %v1014_v14  ;;  %v1018_v16 = vld [vmem:[%s1720_s21 + $0x48] sm:$0xf] }
 0x144   : >> { %1017 = vst [vmem:[%s1716_s14 + $0x44] sm:$0xf] %v1016_v15  ;;  %v1020_v17 = vld [vmem:[%s1720_s21 + $0x4c] sm:$0xf]  ;;  %v1022_v18 = vld [vmem:[%s1720_s21 + $0x50] sm:$0xf] }
 0x145   : >> { %1019 = vst [vmem:[%s1716_s14 + $0x48] sm:$0xf] %v1018_v16  ;;  %1021 = vst [vmem:[%s1716_s14 + $0x4c] sm:$0xf] %v1020_v17  ;;  %v1024_v19 = vld [vmem:[%s1720_s21 + $0x54] sm:$0xf] }
 0x146   : >> { %1023 = vst [vmem:[%s1716_s14 + $0x50] sm:$0xf] %v1022_v18  ;;  %v1026_v20 = vld [vmem:[%s1720_s21 + $0x58] sm:$0xf]  ;;  %v1028_v21 = vld [vmem:[%s1720_s21 + $0x5c] sm:$0xf] }
 0x147   : >> { %1025 = vst [vmem:[%s1716_s14 + $0x54] sm:$0xf] %v1024_v19  ;;  %1027 = vst [vmem:[%s1716_s14 + $0x58] sm:$0xf] %v1026_v20  ;;  %v1030_v22 = vld [vmem:[%s1720_s21 + $0x60] sm:$0xf] }
 0x148   : >> { %1029 = vst [vmem:[%s1716_s14 + $0x5c] sm:$0xf] %v1028_v21  ;;  %v1032_v23 = vld [vmem:[%s1720_s21 + $0x64] sm:$0xf]  ;;  %v1034_v24 = vld [vmem:[%s1720_s21 + $0x68] sm:$0xf] }
 0x149   : >> { %1031 = vst [vmem:[%s1716_s14 + $0x60] sm:$0xf] %v1030_v22  ;;  %1033 = vst [vmem:[%s1716_s14 + $0x64] sm:$0xf] %v1032_v23  ;;  %v1036_v25 = vld [vmem:[%s1720_s21 + $0x6c] sm:$0xf] }
 0x14a   : >> { %1035 = vst [vmem:[%s1716_s14 + $0x68] sm:$0xf] %v1034_v24  ;;  %v1038_v26 = vld [vmem:[%s1720_s21 + $0x70] sm:$0xf]  ;;  %1037 = vst [vmem:[%s1716_s14 + $0x6c] sm:$0xf] %v1036_v25 }
 0x14b   : >> { %1039 = vst [vmem:[%s1716_s14 + $0x70] sm:$0xf] %v1038_v26  ;;  %s2217_s25 = smov (%p1041_p12, %s1040_s25), 0  ;;  %s976_s24 = sadd.s32 1, %s1728_s24  }
 0x14c   : >> { %s1043_s26 = smul.u32 116, %s2217_s25  ;;  %p975_p13 = scmp.ge.s32.totalorder %s976_s24, %s2084_s20 }
 0x14d   : >> { %s2207_s23 = smov %s2217_s25 }
 0x14e   : >> { %s1045_s21 = scalar_lea.vmem %s1965_s8, %s1043_s26 [#allocation3]   ;;  %s1046_s14 = scalar_lea.vmem %s2078_s17, %s1043_s26  }
 0x14f   : > { %978 = sbr.rel (!%p975_p13) target bundleno = 312 (0x138), region = 132 }
 0x154 PF: > { %1640 = sdivrem.u32 %s2215_s9, 29 }
 0x155   : > { %s1397_s27 = smul.u32 116, %s2084_s20 }
 0x157   : > { %s1051_s28 = scalar_lea.vmem %s1965_s8, %s1397_s27 [#allocation3]   ;;  %s1053_s29 = scalar_lea.vmem %s2078_s17, %s1397_s27  }
 0x15d   : > { %s1641_s30 = spop.drf %1640 }
 0x15e   : > { %p1399_p0 = scmp.le.s32.totalorder %s1641_s30, 0 }
 0x15f   : > { %s1730_s4 = smov (!%p1399_p0), %s1053_s29   ;;  %s1734_s5 = smov (!%p1399_p0), %s1051_s28  }
 0x160   : > { %1264 = sbr.rel (%p1399_p0) target bundleno = 365 (0x16d), region = 137  ;;  %s1738_s6 = smov (!%p1399_p0), 0  }
 0x161   : > { %s1742_s7 = smov (!%p1399_p0), 0  }
 0x165 LB: >> { %v1063_v27 = vld [vmem:[%s1736_s5] sm:$0xf]  ;;  %s1065_s10 = sadd.s32 1, %s1740_s6  ;;  %s1057_s7 = sadd.s32 1, %s1744_s7   ;;  %s1744_s7 = sphi %s1742_s7, %s1057_s7   ;;  %s1740_s6 = sphi %s1738_s6, %s1739_s6   ;;  %s1736_s5 = sphi %s1734_s5, %s1070_s5   ;;  %s1732_s4 = sphi %s1730_s4, %s1071_s4  }
 0x166   : >> { %1064 = vst [vmem:[%s1732_s4] sm:$0xf] %v1063_v27  ;;  %p1066_p1 = scmp.ge.s32.totalorder %s1065_s10, %s1641_s30  ;;  %p1056_p2 = scmp.ge.s32.totalorder %s1057_s7, %s1641_s30 }
 0x168   : >> { %s2219_s10 = smov (%p1066_p1, %s1065_s10), 0  ;;  %1059 = sbr.rel (!%p1056_p2) target bundleno = 357 (0x165), region = 143 }
 0x169   : >> { %s1400_s8 = sshll.u32 %s2219_s10, 2  ;;  %s1739_s6 = smov %s2219_s10  }
 0x16a   : >> { %s1070_s5 = scalar_lea.vmem %s1051_s28, %s1400_s8 [#allocation3]   ;;  %s1071_s4 = scalar_lea.vmem %s1053_s29, %s1400_s8  }
 0x16d PF: > { %s13_s16 = sadd.s32 1, %s1712_s16   ;;  %s2208_s12 = smov %s1700_s13 }
 0x16e   : > { %p10_p3 = scmp.ge.s32.totalorder %s13_s16, 4   ;;  %s2209_s13 = smov %s1809_s22 }
 0x16f   : > { %s2210_s14 = smov %s1708_s15  ;;  %s2211_s15 = smov %s2213_s18 }
 0x170   :  { %12 = sbr.rel (!%p10_p3) target bundleno = 3 (0x3), region = 154 }

// kernel: forward.9
= control target key start
LH: loop header
LB: loop body
LE: loop exit
PB: predicated region body
PF: predicated region fallthrough
CT: control target
= control target key end

     0   :  { %v2906_v8 = vmov 1935823168   ;;  %vm2557_vm0 = vcmask 1041409   ;;  %vm2560_vm1 = vcmask 1042434   ;;  %vm2563_vm2 = vcmask 1043459   ;;  %s5667_s0 = inlined_call_operand.vmem [shape: bf16[14,2,7,2,64], index: 0, kind: input, shape index: {}]   ;;  %s5668_s1 = inlined_call_operand.vmem [shape: bf16[14,7,64], index: 1, kind: output, shape index: {}]  }
   0x1   :  { %v8_v0 = vld [vmem:[%s5667_s0] sm:$0x1]  ;;  %v9_v1 = vld [vmem:[%s5667_s0 + $0x1] sm:$0x1]  ;;  %v10_v2 = vld [vmem:[%s5667_s0 + $0x2] sm:$0x1]  ;;  %v2941_v9 = vunpack.c.l.s4 %v2906_v8 }
   0x2   :  { %v11_v3 = vld [vmem:[%s5667_s0 + $0x3] sm:$0x1]  ;;  %v15_v4 = vld [vmem:[%s5667_s0 + $0x7] sm:$0x1]  ;;  %v16_v5 = vld [vmem:[%s5667_s0 + $0x8] sm:$0x1] }
   0x3   :  { %v17_v6 = vld [vmem:[%s5667_s0 + $0x9] sm:$0x1]  ;;  %v18_v7 = vld [vmem:[%s5667_s0 + $0xa] sm:$0x1]  ;;  %5806 = vst [vmem:[#allocation2_spill] sm:$0xff] %v2941_v9  ;;  %v3088_v52 = vmax.bf16 %v15_v4, %v8_v0  ;;  %v3090_v53 = vmax.bf16 %v16_v5, %v9_v1  ;;  %vm2566_vm3 = vcmask 1044484  }
   0x4   :  { %v12_v10 = vld [vmem:[%s5667_s0 + $0x4] sm:$0x1]  ;;  %v13_v11 = vld [vmem:[%s5667_s0 + $0x5] sm:$0x1]  ;;  %v14_v12 = vld [vmem:[%s5667_s0 + $0x6] sm:$0x1]  ;;  %v3092_v54 = vmax.bf16 %v17_v6, %v10_v2  ;;  %v3094_v55 = vmax.bf16 %v18_v7, %v11_v3 }
   0x5   :  { %v19_v13 = vld [vmem:[%s5667_s0 + $0xb] sm:$0x1]  ;;  %v20_v14 = vld [vmem:[%s5667_s0 + $0xc] sm:$0x1]  ;;  %v21_v15 = vld [vmem:[%s5667_s0 + $0xd] sm:$0x1] }
   0x6   :  { %v22_v16 = vld [vmem:[%s5667_s0 + $0xe] sm:$0x1]  ;;  %v29_v17 = vld [vmem:[%s5667_s0 + $0x15] sm:$0x1]  ;;  %v23_v18 = vld [vmem:[%s5667_s0 + $0xf] sm:$0x1]  ;;  %v3136_v0 = vmax.bf16 %v19_v13, %v12_v10  ;;  %v3138_v1 = vmax.bf16 %v20_v14, %v13_v11  ;;  %v3140_v2 = vmax.bf16 %v21_v15, %v14_v12 }
   0x7   :  { %v24_v19 = vld [vmem:[%s5667_s0 + $0x10] sm:$0x1]  ;;  %v25_v20 = vld [vmem:[%s5667_s0 + $0x11] sm:$0x1]  ;;  %v26_v21 = vld [vmem:[%s5667_s0 + $0x12] sm:$0x1]  ;;  %v3142_v3 = vmax.bf16 %v29_v17, %v22_v16 }
   0x8   :  { %v30_v22 = vld [vmem:[%s5667_s0 + $0x16] sm:$0x1]  ;;  %v31_v23 = vld [vmem:[%s5667_s0 + $0x17] sm:$0x1]  ;;  %v32_v24 = vld [vmem:[%s5667_s0 + $0x18] sm:$0x1] }
   0x9   :  { %v33_v25 = vld [vmem:[%s5667_s0 + $0x19] sm:$0x1]  ;;  %v27_v26 = vld [vmem:[%s5667_s0 + $0x13] sm:$0x1]  ;;  %v28_v27 = vld [vmem:[%s5667_s0 + $0x14] sm:$0x1]  ;;  %v3184_v13 = vmax.bf16 %v30_v22, %v23_v18  ;;  %v3186_v14 = vmax.bf16 %v31_v23, %v24_v19  ;;  %v3188_v15 = vmax.bf16 %v32_v24, %v25_v20 }
   0xa   :  { %v34_v28 = vld [vmem:[%s5667_s0 + $0x1a] sm:$0x1]  ;;  %v35_v29 = vld [vmem:[%s5667_s0 + $0x1b] sm:$0x1]  ;;  %v36_v30 = vld [vmem:[%s5667_s0 + $0x1c] sm:$0x1]  ;;  %v3190_v16 = vmax.bf16 %v33_v25, %v26_v21 }
   0xb   :  { %v37_v31 = vld [vmem:[%s5667_s0 + $0x1d] sm:$0x1]  ;;  %v43_v32 = vld [vmem:[%s5667_s0 + $0x23] sm:$0x1]  ;;  %v44_v33 = vld [vmem:[%s5667_s0 + $0x24] sm:$0x1]  ;;  %v3232_v24 = vmax.bf16 %v34_v28, %v27_v26  ;;  %v3234_v25 = vmax.bf16 %v35_v29, %v28_v27 }
   0xc   :  { %v3018_v34 = vld [vmem:[%s5667_s0 + $0x1e] sm:$0x1]  ;;  %v3023_v35 = vld [vmem:[%s5667_s0 + $0x1f] sm:$0x1]  ;;  %v3028_v36 = vld [vmem:[%s5667_s0 + $0x20] sm:$0x1]  ;;  %v3236_v43 = vmax.bf16 %v43_v32, %v36_v30  ;;  %v3238_v9 = vmax.bf16 %v44_v33, %v37_v31 }
   0xd   :  { %v3033_v37 = vld [vmem:[%s5667_s0 + $0x21] sm:$0x1]  ;;  %v45_v38 = vld [vmem:[%s5667_s0 + $0x25] sm:$0x1]  ;;  %v46_v39 = vld [vmem:[%s5667_s0 + $0x26] sm:$0x1] }
   0xe   :  { %v47_v40 = vld [vmem:[%s5667_s0 + $0x27] sm:$0x1]  ;;  %v48_v41 = vld [vmem:[%s5667_s0 + $0x28] sm:$0x1]  ;;  %v3051_v44 = vld [vmem:[%s5667_s0 + $0x22] sm:$0x1]  ;;  %v3281_v32 = vmax.bf16 %v45_v38, %v3018_v34  ;;  %v3284_v33 = vmax.bf16 %v46_v39, %v3023_v35 }
   0xf   :  { %v3056_v45 = vld [vmem:[%s5667_s0 + $0x29] sm:$0x1]  ;;  %v3061_v46 = vld [vmem:[%s5667_s0 + $0x2a] sm:$0x1]  ;;  %v3066_v47 = vld [vmem:[%s5667_s0 + $0x2b] sm:$0x1] }
  0x10   :  { %v3071_v48 = vld [vmem:[%s5667_s0 + $0x2c] sm:$0x1]  ;;  %v3076_v49 = vld [vmem:[%s5667_s0 + $0x31] sm:$0x1]  ;;  %v3081_v50 = vld [vmem:[%s5667_s0 + $0x32] sm:$0x1] }
  0x11   :  { %v3086_v51 = vld [vmem:[%s5667_s0 + $0x33] sm:$0x1]  ;;  %v3099_v56 = vld [vmem:[%s5667_s0 + $0x2d] sm:$0x1]  ;;  %v3104_v57 = vld [vmem:[%s5667_s0 + $0x2e] sm:$0x1] }
  0x12   :  { %v3109_v58 = vld [vmem:[%s5667_s0 + $0x2f] sm:$0x1]  ;;  %v3114_v59 = vld [vmem:[%s5667_s0 + $0x30] sm:$0x1]  ;;  %v3119_v60 = vld [vmem:[%s5667_s0 + $0x34] sm:$0x1] }
  0x13   :  { %v3124_v61 = vld [vmem:[%s5667_s0 + $0x35] sm:$0x1]  ;;  %v3129_v62 = vld [vmem:[%s5667_s0 + $0x36] sm:$0x1]  ;;  %v3134_v63 = vld [vmem:[%s5667_s0 + $0x37] sm:$0x1] }
  0x14   :  { %v3147_v4 = vld [vmem:[%s5667_s0 + $0x38] sm:$0x1]  ;;  %v3152_v5 = vld [vmem:[%s5667_s0 + $0x39] sm:$0x1]  ;;  %v3157_v6 = vld [vmem:[%s5667_s0 + $0x3a] sm:$0x1] }
  0x15   :  { %v3162_v7 = vld [vmem:[%s5667_s0 + $0x3b] sm:$0x1]  ;;  %v3167_v8 = vld [vmem:[%s5667_s0 + $0x3f] sm:$0x1]  ;;  %v3172_v10 = vld [vmem:[%s5667_s0 + $0x40] sm:$0x1] }
  0x16   :  { %v3177_v11 = vld [vmem:[%s5667_s0 + $0x41] sm:$0x1]  ;;  %v3182_v12 = vld [vmem:[%s5667_s0 + $0x42] sm:$0x1]  ;;  %5807 = vst [vmem:[#allocation3_spill] sm:$0xff] %v3188_v15  ;;  %5808 = vst [vmem:[#allocation4_spill] sm:$0xff] %v3190_v16 }
  0x17   :  { %v3195_v17 = vld [vmem:[%s5667_s0 + $0x3c] sm:$0x1]  ;;  %v3200_v42 = vld [vmem:[%s5667_s0 + $0x3d] sm:$0x1]  ;;  %v3205_v18 = vld [vmem:[%s5667_s0 + $0x3e] sm:$0x1] }
  0x18   :  { %v3210_v19 = vld [vmem:[%s5667_s0 + $0x43] sm:$0x1]  ;;  %v3215_v20 = vld [vmem:[%s5667_s0 + $0x44] sm:$0x1]  ;;  %v3220_v21 = vld [vmem:[%s5667_s0 + $0x45] sm:$0x1] }
  0x19   :  { %v3225_v22 = vld [vmem:[%s5667_s0 + $0x46] sm:$0x1]  ;;  %v3230_v23 = vld [vmem:[%s5667_s0 + $0x4d] sm:$0x1]  ;;  %5809 = vst [vmem:[#allocation5_spill] sm:$0xff] %v3232_v24  ;;  %5810 = vst [vmem:[#allocation6_spill] sm:$0xff] %v3234_v25 }
  0x1a   :  { %5811 = vst [vmem:[#allocation7_spill] sm:$0xff] %v3236_v43  ;;  %5812 = vst [vmem:[#allocation8_spill] sm:$0xff] %v3238_v9  ;;  %v3243_v16 = vld [vmem:[%s5667_s0 + $0x47] sm:$0x1]  ;;  %v3248_v15 = vld [vmem:[%s5667_s0 + $0x48] sm:$0x1]  ;;  %v3287_v9 = vmax.bf16 %v47_v40, %v3028_v36  ;;  %v3290_v43 = vmax.bf16 %v48_v41, %v3033_v37  ;;  %v3334_v40 = vmax.bf16 %v3056_v45, %v3051_v44 }
  0x1b   :  { %v3253_v26 = vld [vmem:[%s5667_s0 + $0x49] sm:$0x1]  ;;  %v3258_v27 = vld [vmem:[%s5667_s0 + $0x4a] sm:$0x1]  ;;  %v3263_v28 = vld [vmem:[%s5667_s0 + $0x4e] sm:$0x1]  ;;  %v3338_v41 = vmax.bf16 %v3076_v49, %v3061_v46 }
  0x1c   :  { %v3268_v29 = vld [vmem:[%s5667_s0 + $0x4f] sm:$0x1]  ;;  %v3273_v30 = vld [vmem:[%s5667_s0 + $0x50] sm:$0x1]  ;;  %v3278_v31 = vld [vmem:[%s5667_s0 + $0x51] sm:$0x1] }
  0x1d   :  { %5813 = vst [vmem:[#allocation9_spill] sm:$0xff] %v3281_v32  ;;  %5814 = vst [vmem:[#allocation10_spill] sm:$0xff] %v3284_v33  ;;  %v3295_v25 = vld [vmem:[%s5667_s0 + $0x4b] sm:$0x1]  ;;  %v3300_v24 = vld [vmem:[%s5667_s0 + $0x4c] sm:$0x1] }
  0x1e   :  { %5815 = vst [vmem:[#allocation11_spill] sm:$0xff] %v3287_v9  ;;  %5816 = vst [vmem:[#allocation12_spill] sm:$0xff] %v3290_v43  ;;  %v3305_v34 = vld [vmem:[%s5667_s0 + $0x52] sm:$0x1]  ;;  %v3310_v35 = vld [vmem:[%s5667_s0 + $0x53] sm:$0x1]  ;;  %v3342_v43 = vmax.bf16 %v3081_v50, %v3066_v47  ;;  %v3346_v9 = vmax.bf16 %v3086_v51, %v3071_v48  ;;  %v3390_v51 = vmax.bf16 %v3119_v60, %v3099_v56 }
  0x1f   :  { %v3315_v36 = vld [vmem:[%s5667_s0 + $0x54] sm:$0x1]  ;;  %v3320_v37 = vld [vmem:[%s5667_s0 + $0x55] sm:$0x1]  ;;  %v3325_v38 = vld [vmem:[%s5667_s0 + $0x5b] sm:$0x1] }
  0x20   :  { %v3330_v39 = vld [vmem:[%s5667_s0 + $0x5c] sm:$0x1]  ;;  %5817 = vst [vmem:[#allocation13_spill] sm:$0xff] %v3334_v40  ;;  %5818 = vst [vmem:[#allocation14_spill] sm:$0xff] %v3338_v41  ;;  %v3351_v33 = vld [vmem:[%s5667_s0 + $0x56] sm:$0x1]  ;;  %v3402_v41 = vmax.bf16 %v3134_v63, %v3114_v59  ;;  %v3446_v63 = vmax.bf16 %v3167_v8, %v3147_v4 }
  0x21   :  { %5819 = vst [vmem:[#allocation15_spill] sm:$0xff] %v3342_v43  ;;  %5820 = vst [vmem:[#allocation16_spill] sm:$0xff] %v3346_v9  ;;  %v3356_v44 = vld [vmem:[%s5667_s0 + $0x57] sm:$0x1]  ;;  %v3361_v45 = vld [vmem:[%s5667_s0 + $0x58] sm:$0x1]  ;;  %v3394_v9 = vmax.bf16 %v3124_v61, %v3104_v57  ;;  %v3398_v43 = vmax.bf16 %v3129_v62, %v3109_v58 }
  0x22   :  { %v3366_v46 = vld [vmem:[%s5667_s0 + $0x59] sm:$0x1]  ;;  %v3371_v47 = vld [vmem:[%s5667_s0 + $0x5d] sm:$0x1]  ;;  %v3376_v48 = vld [vmem:[%s5667_s0 + $0x5e] sm:$0x1] }
  0x23   :  { %v3381_v49 = vld [vmem:[%s5667_s0 + $0x5f] sm:$0x1]  ;;  %v3386_v50 = vld [vmem:[%s5667_s0 + $0x60] sm:$0x1]  ;;  %5821 = vst [vmem:[#allocation17_spill] sm:$0xff] %v3390_v51  ;;  %5822 = vst [vmem:[#allocation18_spill] sm:$0xff] %v3394_v9  ;;  %v3458_v9 = vmax.bf16 %v3182_v12, %v3162_v7  ;;  %v3502_v12 = vmax.bf16 %v3210_v19, %v3195_v17 }
  0x24   :  { %5823 = vst [vmem:[#allocation19_spill] sm:$0xff] %v3398_v43  ;;  %5824 = vst [vmem:[#allocation20_spill] sm:$0xff] %v3402_v41  ;;  %v3407_v40 = vld [vmem:[%s5667_s0 + $0x5a] sm:$0x1]  ;;  %v3412_v56 = vld [vmem:[%s5667_s0 + $0x61] sm:$0x1]  ;;  %v3450_v41 = vmax.bf16 %v3172_v10, %v3152_v5  ;;  %v3454_v43 = vmax.bf16 %v3177_v11, %v3157_v6 }
  0x25   :  { %v3417_v57 = vld [vmem:[%s5667_s0 + $0x62] sm:$0x1]  ;;  %v3422_v58 = vld [vmem:[%s5667_s0 + $0x63] sm:$0x1]  ;;  %v3427_v59 = vld [vmem:[%s5667_s0 + $0x64] sm:$0x1] }
  0x26   :  { %v3432_v60 = vld [vmem:[%s5667_s0 + $0x69] sm:$0x1]  ;;  %v3437_v61 = vld [vmem:[%s5667_s0 + $0x6a] sm:$0x1]  ;;  %v3442_v62 = vld [vmem:[%s5667_s0 + $0x6b] sm:$0x1] }
  0x27   :  { %5825 = vst [vmem:[#allocation21_spill] sm:$0xff] %v3446_v63  ;;  %5826 = vst [vmem:[#allocation22_spill] sm:$0xff] %v3450_v41  ;;  %v3463_v51 = vld [vmem:[%s5667_s0 + $0x65] sm:$0x1]  ;;  %v3468_v4 = vld [vmem:[%s5667_s0 + $0x66] sm:$0x1]  ;;  %v3514_v41 = vmax.bf16 %v3230_v23, %v3225_v22  ;;  %v3558_v23 = vmax.bf16 %v3263_v28, %v3243_v16 }
  0x28   :  { %5827 = vst [vmem:[#allocation23_spill] sm:$0xff] %v3454_v43  ;;  %5828 = vst [vmem:[#allocation24_spill] sm:$0xff] %v3458_v9  ;;  %v3473_v5 = vld [vmem:[%s5667_s0 + $0x67] sm:$0x1]  ;;  %v3478_v6 = vld [vmem:[%s5667_s0 + $0x68] sm:$0x1]  ;;  %v3506_v9 = vmax.bf16 %v3215_v20, %v3200_v42  ;;  %v3510_v43 = vmax.bf16 %v3220_v21, %v3205_v18 }
  0x29   :  { %v3483_v7 = vld [vmem:[%s5667_s0 + $0x6c] sm:$0x1]  ;;  %v3488_v8 = vld [vmem:[%s5667_s0 + $0x6d] sm:$0x1]  ;;  %v3493_v10 = vld [vmem:[%s5667_s0 + $0x6e] sm:$0x1] }
  0x2a   :  { %v3498_v11 = vld [vmem:[%s5667_s0 + $0x6f] sm:$0x1]  ;;  %5829 = vst [vmem:[#allocation25_spill] sm:$0xff] %v3502_v12  ;;  %5830 = vst [vmem:[#allocation26_spill] sm:$0xff] %v3506_v9  ;;  %v3519_v63 = vld [vmem:[%s5667_s0 + $0x70] sm:$0x1]  ;;  %v3570_v9 = vmax.bf16 %v3278_v31, %v3258_v27  ;;  %v3614_v31 = vmax.bf16 %v3305_v34, %v3295_v25 }
  0x2b   :  { %5831 = vst [vmem:[#allocation27_spill] sm:$0xff] %v3510_v43  ;;  %5832 = vst [vmem:[#allocation28_spill] sm:$0xff] %v3514_v41  ;;  %v3524_v17 = vld [vmem:[%s5667_s0 + $0x71] sm:$0x1]  ;;  %v3529_v42 = vld [vmem:[%s5667_s0 + $0x72] sm:$0x1]  ;;  %v3562_v41 = vmax.bf16 %v3268_v29, %v3248_v15  ;;  %v3566_v43 = vmax.bf16 %v3273_v30, %v3253_v26 }
  0x2c   :  { %v3534_v18 = vld [vmem:[%s5667_s0 + $0x73] sm:$0x1]  ;;  %v3539_v19 = vld [vmem:[%s5667_s0 + $0x77] sm:$0x1]  ;;  %v3544_v20 = vld [vmem:[%s5667_s0 + $0x78] sm:$0x1] }
  0x2d   :  { %v3549_v21 = vld [vmem:[%s5667_s0 + $0x79] sm:$0x1]  ;;  %v3554_v22 = vld [vmem:[%s5667_s0 + $0x7a] sm:$0x1]  ;;  %5833 = vst [vmem:[#allocation29_spill] sm:$0xff] %v3558_v23  ;;  %5834 = vst [vmem:[#allocation30_spill] sm:$0xff] %v3562_v41  ;;  %v3626_v41 = vmax.bf16 %v3330_v39, %v3320_v37  ;;  %v3670_v39 = vmax.bf16 %v3371_v47, %v3351_v33 }
  0x2e   :  { %5835 = vst [vmem:[#allocation31_spill] sm:$0xff] %v3566_v43  ;;  %5836 = vst [vmem:[#allocation32_spill] sm:$0xff] %v3570_v9  ;;  %v3575_v12 = vld [vmem:[%s5667_s0 + $0x74] sm:$0x1]  ;;  %v3580_v16 = vld [vmem:[%s5667_s0 + $0x75] sm:$0x1]  ;;  %v3618_v9 = vmax.bf16 %v3310_v35, %v3300_v24  ;;  %v3622_v43 = vmax.bf16 %v3325_v38, %v3315_v36 }
  0x2f   :  { %v3585_v15 = vld [vmem:[%s5667_s0 + $0x76] sm:$0x1]  ;;  %v3590_v26 = vld [vmem:[%s5667_s0 + $0x7b] sm:$0x1]  ;;  %v3595_v27 = vld [vmem:[%s5667_s0 + $0x7c] sm:$0x1] }
  0x30   :  { %v3600_v28 = vld [vmem:[%s5667_s0 + $0x7d] sm:$0x1]  ;;  %v3605_v29 = vld [vmem:[%s5667_s0 + $0x7e] sm:$0x1]  ;;  %v3610_v30 = vld [vmem:[%s5667_s0 + $0x85] sm:$0x1] }
  0x31   :  { %5837 = vst [vmem:[#allocation33_spill] sm:$0xff] %v3614_v31  ;;  %5838 = vst [vmem:[#allocation34_spill] sm:$0xff] %v3618_v9  ;;  %v3631_v23 = vld [vmem:[%s5667_s0 + $0x7f] sm:$0x1]  ;;  %v3636_v25 = vld [vmem:[%s5667_s0 + $0x80] sm:$0x1]  ;;  %v3682_v9 = vmax.bf16 %v3386_v50, %v3366_v46  ;;  %v3726_v50 = vmax.bf16 %v3412_v56, %v3407_v40 }
  0x32   :  { %5839 = vst [vmem:[#allocation35_spill] sm:$0xff] %v3622_v43  ;;  %5840 = vst [vmem:[#allocation36_spill] sm:$0xff] %v3626_v41  ;;  %v3641_v24 = vld [vmem:[%s5667_s0 + $0x81] sm:$0x1]  ;;  %v3646_v34 = vld [vmem:[%s5667_s0 + $0x82] sm:$0x1]  ;;  %v3674_v41 = vmax.bf16 %v3376_v48, %v3356_v44  ;;  %v3678_v43 = vmax.bf16 %v3381_v49, %v3361_v45 }
  0x33   :  { %v3651_v35 = vld [vmem:[%s5667_s0 + $0x86] sm:$0x1]  ;;  %v3656_v36 = vld [vmem:[%s5667_s0 + $0x87] sm:$0x1]  ;;  %v3661_v37 = vld [vmem:[%s5667_s0 + $0x88] sm:$0x1] }
  0x34   :  { %v3666_v38 = vld [vmem:[%s5667_s0 + $0x89] sm:$0x1]  ;;  %5841 = vst [vmem:[#allocation37_spill] sm:$0xff] %v3670_v39  ;;  %5842 = vst [vmem:[#allocation38_spill] sm:$0xff] %v3674_v41  ;;  %v3687_v31 = vld [vmem:[%s5667_s0 + $0x83] sm:$0x1]  ;;  %v3738_v41 = vmax.bf16 %v3442_v62, %v3427_v59  ;;  %v3774_v62 = vmax.bf16 %v3483_v7, %v3463_v51 }
  0x35   :  { %5843 = vst [vmem:[#allocation39_spill] sm:$0xff] %v3678_v43  ;;  %5844 = vst [vmem:[#allocation40_spill] sm:$0xff] %v3682_v9  ;;  %v3692_v33 = vld [vmem:[%s5667_s0 + $0x84] sm:$0x1]  ;;  %v3697_v44 = vld [vmem:[%s5667_s0 + $0x8a] sm:$0x1]  ;;  %v3730_v9 = vmax.bf16 %v3432_v60, %v3417_v57  ;;  %v3734_v43 = vmax.bf16 %v3437_v61, %v3422_v58 }
  0x36   :  { %v3702_v45 = vld [vmem:[%s5667_s0 + $0x8b] sm:$0x1]  ;;  %v3707_v46 = vld [vmem:[%s5667_s0 + $0x8c] sm:$0x1]  ;;  %v3712_v47 = vld [vmem:[%s5667_s0 + $0x8d] sm:$0x1] }
  0x37   :  { %v3717_v48 = vld [vmem:[%s5667_s0 + $0x93] sm:$0x1]  ;;  %v3722_v49 = vld [vmem:[%s5667_s0 + $0x94] sm:$0x1]  ;;  %5845 = vst [vmem:[#allocation41_spill] sm:$0xff] %v3726_v50  ;;  %5846 = vst [vmem:[#allocation42_spill] sm:$0xff] %v3730_v9  ;;  %v3786_v9 = vmax.bf16 %v3498_v11, %v3478_v6  ;;  %v3814_v11 = vmax.bf16 %v3539_v19, %v3519_v63 }
  0x38   :  { %5847 = vst [vmem:[#allocation43_spill] sm:$0xff] %v3734_v43  ;;  %5848 = vst [vmem:[#allocation44_spill] sm:$0xff] %v3738_v41  ;;  %v3743_v39 = vld [vmem:[%s5667_s0 + $0x8e] sm:$0x1]  ;;  %v3748_v40 = vld [vmem:[%s5667_s0 + $0x8f] sm:$0x1]  ;;  %v3778_v41 = vmax.bf16 %v3488_v8, %v3468_v4  ;;  %v3782_v43 = vmax.bf16 %v3493_v10, %v3473_v5 }
  0x39   :  { %v3753_v56 = vld [vmem:[%s5667_s0 + $0x90] sm:$0x1]  ;;  %v3758_v57 = vld [vmem:[%s5667_s0 + $0x91] sm:$0x1]  ;;  %v157_v58 = vld [vmem:[%s5667_s0 + $0x95] sm:$0x1] }
  0x3a   :  { %v158_v59 = vld [vmem:[%s5667_s0 + $0x96] sm:$0x1]  ;;  %v159_v60 = vld [vmem:[%s5667_s0 + $0x97] sm:$0x1]  ;;  %v160_v61 = vld [vmem:[%s5667_s0 + $0x98] sm:$0x1] }
  0x3b   :  { %5849 = vst [vmem:[#allocation45_spill] sm:$0xff] %v3774_v62  ;;  %5850 = vst [vmem:[#allocation46_spill] sm:$0xff] %v3778_v41  ;;  %v154_v50 = vld [vmem:[%s5667_s0 + $0x92] sm:$0x1]  ;;  %v161_v51 = vld [vmem:[%s5667_s0 + $0x99] sm:$0x1]  ;;  %v3826_v41 = vmax.bf16 %v3554_v22, %v3534_v18  ;;  %v3854_v22 = vmax.bf16 %v3590_v26, %v3575_v12 }
  0x3c   :  { %5851 = vst [vmem:[#allocation47_spill] sm:$0xff] %v3782_v43  ;;  %5852 = vst [vmem:[#allocation48_spill] sm:$0xff] %v3786_v9  ;;  %v162_v4 = vld [vmem:[%s5667_s0 + $0x9a] sm:$0x1]  ;;  %v163_v5 = vld [vmem:[%s5667_s0 + $0x9b] sm:$0x1]  ;;  %v3818_v9 = vmax.bf16 %v3544_v20, %v3524_v17  ;;  %v3822_v43 = vmax.bf16 %v3549_v21, %v3529_v42 }
  0x3d   :  { %v164_v6 = vld [vmem:[%s5667_s0 + $0x9c] sm:$0x1]  ;;  %v169_v7 = vld [vmem:[%s5667_s0 + $0xa1] sm:$0x1]  ;;  %v170_v8 = vld [vmem:[%s5667_s0 + $0xa2] sm:$0x1] }
  0x3e   :  { %v171_v10 = vld [vmem:[%s5667_s0 + $0xa3] sm:$0x1]  ;;  %5853 = vst [vmem:[#allocation49_spill] sm:$0xff] %v3814_v11  ;;  %5854 = vst [vmem:[#allocation50_spill] sm:$0xff] %v3818_v9  ;;  %v165_v62 = vld [vmem:[%s5667_s0 + $0x9d] sm:$0x1]  ;;  %v3866_v9 = vmax.bf16 %v3610_v30, %v3605_v29  ;;  %v3894_v30 = vmax.bf16 %v3651_v35, %v3631_v23 }
  0x3f   :  { %5855 = vst [vmem:[#allocation51_spill] sm:$0xff] %v3822_v43  ;;  %5856 = vst [vmem:[#allocation52_spill] sm:$0xff] %v3826_v41  ;;  %v166_v63 = vld [vmem:[%s5667_s0 + $0x9e] sm:$0x1]  ;;  %v167_v17 = vld [vmem:[%s5667_s0 + $0x9f] sm:$0x1]  ;;  %v3858_v41 = vmax.bf16 %v3595_v27, %v3580_v16  ;;  %v3862_v43 = vmax.bf16 %v3600_v28, %v3585_v15 }
  0x40   :  { %v168_v42 = vld [vmem:[%s5667_s0 + $0xa0] sm:$0x1]  ;;  %v172_v18 = vld [vmem:[%s5667_s0 + $0xa4] sm:$0x1]  ;;  %v173_v19 = vld [vmem:[%s5667_s0 + $0xa5] sm:$0x1] }
  0x41   :  { %v174_v20 = vld [vmem:[%s5667_s0 + $0xa6] sm:$0x1]  ;;  %v175_v21 = vld [vmem:[%s5667_s0 + $0xa7] sm:$0x1]  ;;  %5857 = vst [vmem:[#allocation53_spill] sm:$0xff] %v3854_v22  ;;  %5858 = vst [vmem:[#allocation54_spill] sm:$0xff] %v3858_v41  ;;  %v3906_v41 = vmax.bf16 %v3666_v38, %v3646_v34  ;;  %v3935_v38 = vmax.bf16 %v3702_v45, %v3692_v33  ;;  %v3958_v45 = vmax.bf16 %v157_v58, %v3743_v39 }
  0x42   :  { %5859 = vst [vmem:[#allocation55_spill] sm:$0xff] %v3862_v43  ;;  %5860 = vst [vmem:[#allocation56_spill] sm:$0xff] %v3866_v9  ;;  %v176_v11 = vld [vmem:[%s5667_s0 + $0xa8] sm:$0x1]  ;;  %v177_v12 = vld [vmem:[%s5667_s0 + $0xa9] sm:$0x1]  ;;  %v3898_v9 = vmax.bf16 %v3656_v36, %v3636_v25  ;;  %v3902_v43 = vmax.bf16 %v3661_v37, %v3641_v24  ;;  %v3931_v37 = vmax.bf16 %v3697_v44, %v3687_v31 }
  0x43   :  { %v178_v16 = vld [vmem:[%s5667_s0 + $0xaa] sm:$0x1]  ;;  %v179_v15 = vld [vmem:[%s5667_s0 + $0xab] sm:$0x1]  ;;  %v183_v26 = vld [vmem:[%s5667_s0 + $0xaf] sm:$0x1]  ;;  %v3980_v58 = vmax.bf16 %v169_v7, %v162_v4  ;;  %v3999_v4 = vmax.bf16 %v174_v20, %v167_v17 }
  0x44   :  { %v184_v27 = vld [vmem:[%s5667_s0 + $0xb0] sm:$0x1]  ;;  %v185_v28 = vld [vmem:[%s5667_s0 + $0xb1] sm:$0x1]  ;;  %v186_v29 = vld [vmem:[%s5667_s0 + $0xb2] sm:$0x1] }
  0x45   :  { %5861 = vst [vmem:[#allocation57_spill] sm:$0xff] %v3898_v9  ;;  %5862 = vst [vmem:[#allocation58_spill] sm:$0xff] %v3902_v43  ;;  %v180_v22 = vld [vmem:[%s5667_s0 + $0xac] sm:$0x1]  ;;  %v181_v23 = vld [vmem:[%s5667_s0 + $0xad] sm:$0x1]  ;;  %v3943_v43 = vmax.bf16 %v3722_v49, %v3712_v47  ;;  %v3964_v47 = vmax.bf16 %v159_v60, %v3753_v56  ;;  %v3982_v56 = vmax.bf16 %v170_v8, %v163_v5 }
  0x46   :  { %5863 = vst [vmem:[#allocation59_spill] sm:$0xff] %v3906_v41  ;;  %v182_v25 = vld [vmem:[%s5667_s0 + $0xae] sm:$0x1]  ;;  %v187_v24 = vld [vmem:[%s5667_s0 + $0xb3] sm:$0x1]  ;;  %v3939_v41 = vmax.bf16 %v3717_v48, %v3707_v46  ;;  %5865 = vst [vmem:[#allocation61_spill] sm:$0xff] %v3958_v45  ;;  %v3961_v46 = vmax.bf16 %v158_v59, %v3748_v40  ;;  %v3967_v48 = vmax.bf16 %v160_v61, %v3758_v57 }
  0x47   :  { %v188_v34 = vld [vmem:[%s5667_s0 + $0xb4] sm:$0x1]  ;;  %v189_v35 = vld [vmem:[%s5667_s0 + $0xb5] sm:$0x1]  ;;  %v190_v36 = vld [vmem:[%s5667_s0 + $0xb6] sm:$0x1]  ;;  %v3978_v40 = vmax.bf16 %v161_v51, %v154_v50  ;;  %v3984_v57 = vmax.bf16 %v171_v10, %v164_v6  ;;  %v3995_v50 = vmax.bf16 %v172_v18, %v165_v62  ;;  %v3997_v51 = vmax.bf16 %v173_v19, %v166_v63 }
  0x48   :  { %5864 = vst [vmem:[#allocation60_spill] sm:$0xff] %v3943_v43  ;;  %v191_v9 = vld [vmem:[%s5667_s0 + $0xb7] sm:$0x1]  ;;  %v192_v31 = vld [vmem:[%s5667_s0 + $0xb8] sm:$0x1]  ;;  %v4001_v5 = vmax.bf16 %v175_v21, %v168_v42  ;;  %v4012_v62 = vmax.bf16 %v183_v26, %v176_v11  ;;  %v4014_v10 = vmax.bf16 %v184_v27, %v177_v12  ;;  %v4016_v63 = vmax.bf16 %v185_v28, %v178_v16 }
  0x49   :  { %v193_v33 = vld [vmem:[%s5667_s0 + $0xb9] sm:$0x1]  ;;  %v194_v44 = vld [vmem:[%s5667_s0 + $0xba] sm:$0x1]  ;;  %v195_v49 = vld [vmem:[%s5667_s0 + $0xbb] sm:$0x1]  ;;  %v4018_v17 = vmax.bf16 %v186_v29, %v179_v15  ;;  %v4020_v42 = vmax.bf16 %v187_v24, %v180_v22  ;;  %v4022_v18 = vmax.bf16 %v188_v34, %v181_v23  ;;  %v4024_v19 = vmax.bf16 %v189_v35, %v182_v25 }
  0x4a   :  { %v197_v43 = vld [vmem:[%s5667_s0 + $0xbd] sm:$0x1]  ;;  %v198_v39 = vld [vmem:[%s5667_s0 + $0xbe] sm:$0x1]  ;;  %v199_v59 = vld [vmem:[%s5667_s0 + $0xbf] sm:$0x1] }
  0x4b   :  { %v200_v60 = vld [vmem:[%s5667_s0 + $0xc0] sm:$0x1]  ;;  %v201_v61 = vld [vmem:[%s5667_s0 + $0xc1] sm:$0x1]  ;;  %5866 = vst [vmem:[#allocation62_spill] sm:$0xff] %v4001_v5  ;;  %v4026_v20 = vmax.bf16 %v197_v43, %v190_v36  ;;  %v4028_v21 = vmax.bf16 %v198_v39, %v191_v9  ;;  %v4030_v5 = vmax.bf16 %v199_v59, %v192_v31  ;;  %v5867_v34 = vld [vmem:[#allocation3_spill] sm:$0xff] }
  0x4c   :  { %v196_v6 = vld [vmem:[%s5667_s0 + $0xbc] sm:$0x1]  ;;  %v202_v7 = vld [vmem:[%s5667_s0 + $0xc2] sm:$0x1]  ;;  %v203_v8 = vld [vmem:[%s5667_s0 + $0xc3] sm:$0x1]  ;;  %v4032_v11 = vmax.bf16 %v200_v60, %v193_v33  ;;  %v4034_v12 = vmax.bf16 %v201_v61, %v194_v44 }
  0x4d   :  { %v4036_v16 = vmax.bf16 %v202_v7, %v195_v49  ;;  %v4038_v15 = vmax.bf16 %v203_v8, %v196_v6  ;;  %v5868_v36 = vld [vmem:[#allocation4_spill] sm:$0xff]  ;;  %v5869_v33 = vld [vmem:[#allocation5_spill] sm:$0xff]  ;;  %v5870_v49 = vld [vmem:[#allocation6_spill] sm:$0xff]  ;;  %v5925_v25 = vshrl.u32 %v3088_v52, 16  ;;  %v5926_v31 = vshrl.u32 %v3090_v53, 16 }
  0x4e   :  { %v5909_v9 = vld [vmem:[#allocation46_spill] sm:$0xff]  ;;  %v5914_v59 = vld [vmem:[#allocation51_spill] sm:$0xff]  ;;  %v5915_v61 = vld [vmem:[#allocation52_spill] sm:$0xff]  ;;  %v5927_v39 = vshrl.u32 %v3092_v54, 16  ;;  %v5928_v7 = vshrl.u32 %v3094_v55, 16  ;;  %v5929_v23 = vshrl.u32 %v3136_v0, 16 }
  0x4f   :  { %v5913_v22 = vld [vmem:[#allocation50_spill] sm:$0xff]  ;;  %v5918_v29 = vld [vmem:[#allocation55_spill] sm:$0xff]  ;;  %v5919_v28 = vld [vmem:[#allocation56_spill] sm:$0xff]  ;;  %v4141_v24 = vmax.bf16 %v5925_v25, %v3088_v52  ;;  %v4146_v35 = vmax.bf16 %v5926_v31, %v3090_v53  ;;  %v5930_v25 = vshrl.u32 %v3138_v1, 16  ;;  %v5931_v31 = vshrl.u32 %v3140_v2, 16 }
  0x50   :  { %v5917_v8 = vld [vmem:[#allocation54_spill] sm:$0xff]  ;;  %v5920_v43 = vld [vmem:[#allocation57_spill] sm:$0xff]  ;;  %v5922_v26 = vld [vmem:[#allocation59_spill] sm:$0xff]  ;;  %v4151_v60 = vmax.bf16 %v5927_v39, %v3092_v54  ;;  %v4156_v6 = vmax.bf16 %v5928_v7, %v3094_v55  ;;  %v4161_v52 = vmax.bf16 %v5929_v23, %v3136_v0  ;;  %v5932_v39 = vshrl.u32 %v3142_v3, 16 }
  0x51   :  { %v5921_v27 = vld [vmem:[#allocation58_spill] sm:$0xff]  ;;  %v5923_v32 = vld [vmem:[#allocation60_spill] sm:$0xff]  ;;  %v4166_v53 = vmax.bf16 %v5930_v25, %v3138_v1  ;;  %v4171_v54 = vmax.bf16 %v5931_v31, %v3140_v2  ;;  %v5933_v7 = vshrl.u32 %v3184_v13, 16  ;;  %v5934_v23 = vshrl.u32 %v3186_v14, 16 }
  0x52   :  { %v5924_v45 = vld [vmem:[#allocation62_spill] sm:$0xff]  ;;  %v4176_v55 = vmax.bf16 %v5932_v39, %v3142_v3  ;;  %v5935_v25 = vshrl.u32 %v5867_v34, 16  ;;  %v5937_v31 = vshrl.u32 %v5868_v36, 16  ;;  %v5939_v39 = vshrl.u32 %v5869_v33, 16 }
  0x53   :  { %v4181_v0 = vmax.bf16 %v5933_v7, %v3184_v13  ;;  %v4186_v1 = vmax.bf16 %v5934_v23, %v3186_v14  ;;  %v5941_v7 = vshrl.u32 %v5870_v49, 16  ;;  %v5943_v23 = vld [vmem:[#allocation7_spill] sm:$0xff]  ;;  %vm2569_vm4 = vcmask 1045509  }
  0x54   :  { %v4191_v2 = vmax.bf16 %v5935_v25, %v5867_v34  ;;  %v4196_v3 = vmax.bf16 %v5937_v31, %v5868_v36  ;;  %v4201_v13 = vmax.bf16 %v5939_v39, %v5869_v33  ;;  %v5944_v44 = vshrl.u32 %v5943_v23, 16  ;;  %v5946_v25 = vld [vmem:[#allocation8_spill] sm:$0xff]  ;;  %v5949_v31 = vld [vmem:[#allocation9_spill] sm:$0xff]  ;;  %v5952_v39 = vld [vmem:[#allocation10_spill] sm:$0xff] }
  0x55   :  { %v4206_v14 = vmax.bf16 %v5941_v7, %v5870_v49  ;;  %v5955_v7 = vld [vmem:[#allocation11_spill] sm:$0xff]  ;;  %vm2572_vm5 = vcmask 1046534   ;;  %vm2758_vm6 = vcmask 519168   ;;  %vm2759_vm7 = vsmask.f32 3328 }
  0x56   :  { %5936 = vst [vmem:[#allocation3_spill] sm:$0xff] %v4191_v2  ;;  %5938 = vst [vmem:[#allocation4_spill] sm:$0xff] %v4196_v3  ;;  %v4211_v34 = vmax.bf16 %v5944_v44, %v5943_v23  ;;  %v5947_v2 = vshrl.u32 %v5946_v25, 16  ;;  %v5950_v3 = vshrl.u32 %v5949_v31, 16  ;;  %v5958_v23 = vld [vmem:[#allocation12_spill] sm:$0xff] }
  0x57   :  { %5940 = vst [vmem:[#allocation5_spill] sm:$0xff] %v4201_v13  ;;  %5942 = vst [vmem:[#allocation6_spill] sm:$0xff] %v4206_v14  ;;  %v5953_v13 = vshrl.u32 %v5952_v39, 16  ;;  %v5956_v14 = vshrl.u32 %v5955_v7, 16 }
  0x58   :  { %5945 = vst [vmem:[#allocation46_spill] sm:$0xff] %v4211_v34  ;;  %v4216_v36 = vmax.bf16 %v5947_v2, %v5946_v25  ;;  %v4221_v33 = vmax.bf16 %v5950_v3, %v5949_v31  ;;  %v5959_v34 = vshrl.u32 %v5958_v23, 16  ;;  %v5961_v25 = vld [vmem:[#allocation13_spill] sm:$0xff]  ;;  %v5964_v31 = vld [vmem:[#allocation14_spill] sm:$0xff]  ;;  %vm5537_vm8 = vmand %vm2758_vm6, %vm2759_vm7 }
  0x59   :  { %v4226_v49 = vmax.bf16 %v5953_v13, %v5952_v39  ;;  %v4231_v44 = vmax.bf16 %v5956_v14, %v5955_v7  ;;  %v5967_v39 = vld [vmem:[#allocation15_spill] sm:$0xff]  ;;  %v5970_v7 = vld [vmem:[#allocation16_spill] sm:$0xff] }
  0x5a   :  { %5948 = vst [vmem:[#allocation50_spill] sm:$0xff] %v4216_v36  ;;  %5951 = vst [vmem:[#allocation51_spill] sm:$0xff] %v4221_v33  ;;  %v4236_v2 = vmax.bf16 %v5959_v34, %v5958_v23  ;;  %v5962_v36 = vshrl.u32 %v5961_v25, 16  ;;  %v5965_v33 = vshrl.u32 %v5964_v31, 16  ;;  %v5973_v23 = vld [vmem:[#allocation17_spill] sm:$0xff] }
  0x5b   :  { %5954 = vst [vmem:[#allocation52_spill] sm:$0xff] %v4226_v49  ;;  %5957 = vst [vmem:[#allocation54_spill] sm:$0xff] %v4231_v44  ;;  %v5968_v49 = vshrl.u32 %v5967_v39, 16  ;;  %v5971_v44 = vshrl.u32 %v5970_v7, 16 }
  0x5c   :  { %5960 = vst [vmem:[#allocation55_spill] sm:$0xff] %v4236_v2  ;;  %v4241_v3 = vmax.bf16 %v5962_v36, %v5961_v25  ;;  %v4246_v13 = vmax.bf16 %v5965_v33, %v5964_v31  ;;  %v5974_v2 = vshrl.u32 %v5973_v23, 16  ;;  %v5976_v25 = vld [vmem:[#allocation18_spill] sm:$0xff]  ;;  %v5979_v31 = vld [vmem:[#allocation19_spill] sm:$0xff] }
  0x5d   :  { %v4251_v14 = vmax.bf16 %v5968_v49, %v5967_v39  ;;  %v4256_v34 = vmax.bf16 %v5971_v44, %v5970_v7  ;;  %v5982_v39 = vld [vmem:[#allocation20_spill] sm:$0xff]  ;;  %v5985_v7 = vld [vmem:[#allocation21_spill] sm:$0xff] }
  0x5e   :  { %5963 = vst [vmem:[#allocation56_spill] sm:$0xff] %v4241_v3  ;;  %5966 = vst [vmem:[#allocation57_spill] sm:$0xff] %v4246_v13  ;;  %v4261_v36 = vmax.bf16 %v5974_v2, %v5973_v23  ;;  %v5977_v3 = vshrl.u32 %v5976_v25, 16  ;;  %v5980_v13 = vshrl.u32 %v5979_v31, 16  ;;  %v5988_v23 = vld [vmem:[#allocation22_spill] sm:$0xff] }
  0x5f   :  { %5969 = vst [vmem:[#allocation58_spill] sm:$0xff] %v4251_v14  ;;  %5972 = vst [vmem:[#allocation59_spill] sm:$0xff] %v4256_v34  ;;  %v5983_v14 = vshrl.u32 %v5982_v39, 16  ;;  %v5986_v34 = vshrl.u32 %v5985_v7, 16 }
  0x60   :  { %5975 = vst [vmem:[#allocation60_spill] sm:$0xff] %v4261_v36  ;;  %v4266_v33 = vmax.bf16 %v5977_v3, %v5976_v25  ;;  %v4271_v49 = vmax.bf16 %v5980_v13, %v5979_v31  ;;  %v5989_v36 = vshrl.u32 %v5988_v23, 16  ;;  %v5991_v25 = vld [vmem:[#allocation23_spill] sm:$0xff]  ;;  %v5994_v31 = vld [vmem:[#allocation24_spill] sm:$0xff] }
  0x61   :  { %v4276_v44 = vmax.bf16 %v5983_v14, %v5982_v39  ;;  %v4281_v2 = vmax.bf16 %v5986_v34, %v5985_v7  ;;  %v5997_v39 = vld [vmem:[#allocation25_spill] sm:$0xff]  ;;  %v6000_v7 = vld [vmem:[#allocation26_spill] sm:$0xff] }
  0x62   :  { %5978 = vst [vmem:[#allocation62_spill] sm:$0xff] %v4266_v33  ;;  %5981 = vst [vmem:[#allocation7_spill] sm:$0xff] %v4271_v49  ;;  %v4286_v3 = vmax.bf16 %v5989_v36, %v5988_v23  ;;  %v5992_v33 = vshrl.u32 %v5991_v25, 16  ;;  %v5995_v49 = vshrl.u32 %v5994_v31, 16  ;;  %v6003_v23 = vld [vmem:[#allocation27_spill] sm:$0xff] }
  0x63   :  { %5984 = vst [vmem:[#allocation8_spill] sm:$0xff] %v4276_v44  ;;  %5987 = vst [vmem:[#allocation9_spill] sm:$0xff] %v4281_v2  ;;  %v5998_v44 = vshrl.u32 %v5997_v39, 16  ;;  %v6001_v2 = vshrl.u32 %v6000_v7, 16 }
  0x64   :  { %5990 = vst [vmem:[#allocation10_spill] sm:$0xff] %v4286_v3  ;;  %v4291_v13 = vmax.bf16 %v5992_v33, %v5991_v25  ;;  %v4296_v14 = vmax.bf16 %v5995_v49, %v5994_v31  ;;  %v6004_v3 = vshrl.u32 %v6003_v23, 16  ;;  %v6006_v25 = vld [vmem:[#allocation28_spill] sm:$0xff]  ;;  %v6009_v31 = vld [vmem:[#allocation29_spill] sm:$0xff] }
  0x65   :  { %v4301_v34 = vmax.bf16 %v5998_v44, %v5997_v39  ;;  %v4306_v36 = vmax.bf16 %v6001_v2, %v6000_v7  ;;  %v6012_v39 = vld [vmem:[#allocation30_spill] sm:$0xff]  ;;  %v6015_v7 = vld [vmem:[#allocation31_spill] sm:$0xff] }
  0x66   :  { %5993 = vst [vmem:[#allocation11_spill] sm:$0xff] %v4291_v13  ;;  %5996 = vst [vmem:[#allocation12_spill] sm:$0xff] %v4296_v14  ;;  %v4311_v33 = vmax.bf16 %v6004_v3, %v6003_v23  ;;  %v6007_v13 = vshrl.u32 %v6006_v25, 16  ;;  %v6010_v14 = vshrl.u32 %v6009_v31, 16  ;;  %v6018_v23 = vld [vmem:[#allocation32_spill] sm:$0xff] }
  0x67   :  { %5999 = vst [vmem:[#allocation13_spill] sm:$0xff] %v4301_v34  ;;  %6002 = vst [vmem:[#allocation14_spill] sm:$0xff] %v4306_v36  ;;  %v6013_v34 = vshrl.u32 %v6012_v39, 16  ;;  %v6016_v36 = vshrl.u32 %v6015_v7, 16 }
  0x68   :  { %6005 = vst [vmem:[#allocation15_spill] sm:$0xff] %v4311_v33  ;;  %v4316_v49 = vmax.bf16 %v6007_v13, %v6006_v25  ;;  %v4321_v44 = vmax.bf16 %v6010_v14, %v6009_v31  ;;  %v6019_v33 = vshrl.u32 %v6018_v23, 16  ;;  %v6021_v25 = vld [vmem:[#allocation33_spill] sm:$0xff]  ;;  %v6024_v31 = vld [vmem:[#allocation34_spill] sm:$0xff] }
  0x69   :  { %v4326_v2 = vmax.bf16 %v6013_v34, %v6012_v39  ;;  %v4331_v3 = vmax.bf16 %v6016_v36, %v6015_v7  ;;  %v6027_v39 = vld [vmem:[#allocation35_spill] sm:$0xff]  ;;  %v6030_v7 = vld [vmem:[#allocation36_spill] sm:$0xff] }
  0x6a   :  { %6008 = vst [vmem:[#allocation16_spill] sm:$0xff] %v4316_v49  ;;  %6011 = vst [vmem:[#allocation17_spill] sm:$0xff] %v4321_v44  ;;  %v4336_v13 = vmax.bf16 %v6019_v33, %v6018_v23  ;;  %v6022_v49 = vshrl.u32 %v6021_v25, 16  ;;  %v6025_v44 = vshrl.u32 %v6024_v31, 16  ;;  %v6033_v23 = vld [vmem:[#allocation37_spill] sm:$0xff] }
  0x6b   :  { %6014 = vst [vmem:[#allocation18_spill] sm:$0xff] %v4326_v2  ;;  %6017 = vst [vmem:[#allocation19_spill] sm:$0xff] %v4331_v3  ;;  %v6028_v2 = vshrl.u32 %v6027_v39, 16  ;;  %v6031_v3 = vshrl.u32 %v6030_v7, 16 }
  0x6c   :  { %6020 = vst [vmem:[#allocation20_spill] sm:$0xff] %v4336_v13  ;;  %v4341_v14 = vmax.bf16 %v6022_v49, %v6021_v25  ;;  %v4346_v34 = vmax.bf16 %v6025_v44, %v6024_v31  ;;  %v6034_v13 = vshrl.u32 %v6033_v23, 16  ;;  %v6036_v25 = vld [vmem:[#allocation38_spill] sm:$0xff]  ;;  %v6039_v31 = vld [vmem:[#allocation39_spill] sm:$0xff] }
  0x6d   :  { %v4351_v36 = vmax.bf16 %v6028_v2, %v6027_v39  ;;  %v4356_v33 = vmax.bf16 %v6031_v3, %v6030_v7  ;;  %v6042_v39 = vld [vmem:[#allocation40_spill] sm:$0xff]  ;;  %v6045_v7 = vld [vmem:[#allocation41_spill] sm:$0xff] }
  0x6e   :  { %6023 = vst [vmem:[#allocation21_spill] sm:$0xff] %v4341_v14  ;;  %6026 = vst [vmem:[#allocation22_spill] sm:$0xff] %v4346_v34  ;;  %v4361_v49 = vmax.bf16 %v6034_v13, %v6033_v23  ;;  %v6037_v14 = vshrl.u32 %v6036_v25, 16  ;;  %v6040_v34 = vshrl.u32 %v6039_v31, 16  ;;  %v6047_v23 = vld [vmem:[#allocation42_spill] sm:$0xff] }
  0x6f   :  { %6029 = vst [vmem:[#allocation23_spill] sm:$0xff] %v4351_v36  ;;  %6032 = vst [vmem:[#allocation24_spill] sm:$0xff] %v4356_v33  ;;  %v6043_v36 = vshrl.u32 %v6042_v39, 16  ;;  %v6046_v33 = vshrl.u32 %v6045_v7, 16 }
  0x70   :  { %6035 = vst [vmem:[#allocation25_spill] sm:$0xff] %v4361_v49  ;;  %v4366_v44 = vmax.bf16 %v6037_v14, %v6036_v25  ;;  %v4371_v2 = vmax.bf16 %v6040_v34, %v6039_v31  ;;  %v6048_v49 = vshrl.u32 %v6047_v23, 16  ;;  %v6050_v25 = vld [vmem:[#allocation43_spill] sm:$0xff]  ;;  %v6053_v31 = vld [vmem:[#allocation44_spill] sm:$0xff] }
  0x71   :  { %v4376_v3 = vmax.bf16 %v6043_v36, %v6042_v39  ;;  %v4381_v13 = vmax.bf16 %v6046_v33, %v6045_v7  ;;  %v6056_v39 = vld [vmem:[#allocation45_spill] sm:$0xff]  ;;  %v6058_v7 = vshrl.u32 %v5909_v9, 16 }
  0x72   :  { %6038 = vst [vmem:[#allocation26_spill] sm:$0xff] %v4366_v44  ;;  %6041 = vst [vmem:[#allocation27_spill] sm:$0xff] %v4371_v2  ;;  %v4386_v14 = vmax.bf16 %v6048_v49, %v6047_v23  ;;  %v6051_v44 = vshrl.u32 %v6050_v25, 16  ;;  %v6054_v2 = vshrl.u32 %v6053_v31, 16  ;;  %v6059_v23 = vld [vmem:[#allocation47_spill] sm:$0xff] }
  0x73   :  { %6044 = vst [vmem:[#allocation28_spill] sm:$0xff] %v4376_v3  ;;  %v6057_v3 = vshrl.u32 %v6056_v39, 16  ;;  %v4406_v49 = vmax.bf16 %v6058_v7, %v5909_v9  ;;  %v6067_v7 = vshrl.u32 %v5914_v59, 16 }
  0x74   :  { %6049 = vst [vmem:[#allocation29_spill] sm:$0xff] %v4386_v14  ;;  %v4391_v34 = vmax.bf16 %v6051_v44, %v6050_v25  ;;  %v4396_v36 = vmax.bf16 %v6054_v2, %v6053_v31  ;;  %v6060_v14 = vshrl.u32 %v6059_v23, 16  ;;  %v6061_v25 = vld [vmem:[#allocation48_spill] sm:$0xff]  ;;  %v6064_v31 = vld [vmem:[#allocation49_spill] sm:$0xff] }
  0x75   :  { %v4401_v33 = vmax.bf16 %v6057_v3, %v6056_v39  ;;  %v6066_v39 = vshrl.u32 %v5913_v22, 16 }
  0x76   :  { %6052 = vst [vmem:[#allocation30_spill] sm:$0xff] %v4391_v34  ;;  %6055 = vst [vmem:[#allocation31_spill] sm:$0xff] %v4396_v36  ;;  %v4411_v44 = vmax.bf16 %v6060_v14, %v6059_v23  ;;  %v6062_v34 = vshrl.u32 %v6061_v25, 16  ;;  %v6065_v36 = vshrl.u32 %v6064_v31, 16  ;;  %v4431_v14 = vmax.bf16 %v6067_v7, %v5914_v59 }
  0x77   :  { %v4426_v9 = vmax.bf16 %v6066_v39, %v5913_v22  ;;  %v6068_v23 = vshrl.u32 %v5915_v61, 16  ;;  %v6072_v39 = vshrl.u32 %v5918_v29, 16  ;;  %v6073_v7 = vshrl.u32 %v5919_v28, 16 }
  0x78   :  { %v4416_v2 = vmax.bf16 %v6062_v34, %v6061_v25  ;;  %v4421_v3 = vmax.bf16 %v6065_v36, %v6064_v31  ;;  %v6069_v25 = vld [vmem:[#allocation53_spill] sm:$0xff]  ;;  %v6071_v31 = vshrl.u32 %v5917_v8, 16 }
  0x79   :  { %v4436_v34 = vmax.bf16 %v6068_v23, %v5915_v61  ;;  %v4451_v59 = vmax.bf16 %v6072_v39, %v5918_v29  ;;  %v4456_v61 = vmax.bf16 %v6073_v7, %v5919_v28  ;;  %v6074_v23 = vshrl.u32 %v3894_v30, 16 }
  0x7a   :  { %6063 = vst [vmem:[#allocation32_spill] sm:$0xff] %v4416_v2  ;;  %v6070_v2 = vshrl.u32 %v6069_v25, 16  ;;  %v4446_v22 = vmax.bf16 %v6071_v31, %v5917_v8  ;;  %v6076_v31 = vshrl.u32 %v5921_v27, 16  ;;  %v6077_v39 = vshrl.u32 %v5922_v26, 16 }
  0x7b   :  { %v6079_v7 = vshrl.u32 %v3931_v37, 16 }
  0x7c   :  { %v4441_v36 = vmax.bf16 %v6070_v2, %v6069_v25  ;;  %v4461_v2 = vmax.bf16 %v6074_v23, %v3894_v30  ;;  %v6075_v25 = vshrl.u32 %v5920_v43, 16  ;;  %v4471_v29 = vmax.bf16 %v6076_v31, %v5921_v27 }
  0x7d   :  { %v4476_v28 = vmax.bf16 %v6077_v39, %v5922_v26  ;;  %v4481_v30 = vmax.bf16 %v6079_v7, %v3931_v37  ;;  %v6080_v23 = vshrl.u32 %v3935_v38, 16  ;;  %v6082_v31 = vshrl.u32 %v5923_v32, 16  ;;  %v6083_v39 = vld [vmem:[#allocation61_spill] sm:$0xff] }
  0x7e   :  { %v4466_v8 = vmax.bf16 %v6075_v25, %v5920_v43  ;;  %v6081_v25 = vshrl.u32 %v3939_v41, 16  ;;  %v6085_v7 = vshrl.u32 %v3961_v46, 16 }
  0x7f   :  { %6078 = vst [vmem:[#allocation33_spill] sm:$0xff] %v4476_v28  ;;  %v4486_v43 = vmax.bf16 %v6080_v23, %v3935_v38  ;;  %v4496_v26 = vmax.bf16 %v6082_v31, %v5923_v32  ;;  %v6084_v28 = vshrl.u32 %v6083_v39, 16  ;;  %v6086_v23 = vshrl.u32 %v3964_v47, 16 }
  0x80   :  { %v4491_v27 = vmax.bf16 %v6081_v25, %v3939_v41  ;;  %v4506_v38 = vmax.bf16 %v6085_v7, %v3961_v46  ;;  %v6087_v25 = vshrl.u32 %v3967_v48, 16  ;;  %v6088_v31 = vshrl.u32 %v3978_v40, 16 }
  0x81   :  { %v4501_v37 = vmax.bf16 %v6084_v28, %v6083_v39  ;;  %v4511_v41 = vmax.bf16 %v6086_v23, %v3964_v47  ;;  %v6089_v39 = vshrl.u32 %v3980_v58, 16  ;;  %v6090_v7 = vshrl.u32 %v3982_v56, 16 }
  0x82   :  { %v4516_v32 = vmax.bf16 %v6087_v25, %v3967_v48  ;;  %v4521_v28 = vmax.bf16 %v6088_v31, %v3978_v40  ;;  %v6091_v23 = vshrl.u32 %v3984_v57, 16  ;;  %v6092_v25 = vshrl.u32 %v3995_v50, 16 }
  0x83   :  { %v4526_v46 = vmax.bf16 %v6089_v39, %v3980_v58  ;;  %v4531_v47 = vmax.bf16 %v6090_v7, %v3982_v56  ;;  %v6093_v31 = vshrl.u32 %v3997_v51, 16  ;;  %v6094_v39 = vshrl.u32 %v3999_v4, 16 }
  0x84   :  { %v4536_v48 = vmax.bf16 %v6091_v23, %v3984_v57  ;;  %v4541_v40 = vmax.bf16 %v6092_v25, %v3995_v50  ;;  %v6096_v7 = vshrl.u32 %v5924_v45, 16  ;;  %v6097_v23 = vshrl.u32 %v4012_v62, 16 }
  0x85   :  { %v4546_v58 = vmax.bf16 %v6093_v31, %v3997_v51  ;;  %v4551_v56 = vmax.bf16 %v6094_v39, %v3999_v4  ;;  %v6098_v25 = vshrl.u32 %v4014_v10, 16  ;;  %v6099_v31 = vshrl.u32 %v4016_v63, 16 }
  0x86   :  { %v4556_v57 = vmax.bf16 %v6096_v7, %v5924_v45  ;;  %v4561_v50 = vmax.bf16 %v6097_v23, %v4012_v62  ;;  %v6100_v39 = vlaneseq  ;;  %v6101_v45 = vshrl.u32 %v4018_v17, 16 }
  0x87   :  { %6095 = vst [vmem:[#allocation34_spill] sm:$0xff] %v4551_v56  ;;  %v4566_v51 = vmax.bf16 %v6098_v25, %v4014_v10  ;;  %v4571_v4 = vmax.bf16 %v6099_v31, %v4016_v63  ;;  %v6102_v62 = vshrl.u32 %v4020_v42, 16  ;;  %v6104_v10 = vshrl.u32 %v4022_v18, 16 }
  0x88   :  { %v1090_v56 = vshrl.u32 %v6100_v39, 7  ;;  %v4577_v7 = vmax.bf16 %v6101_v45, %v4018_v17  ;;  %v6106_v63 = vshrl.u32 %v4024_v19, 16  ;;  %v6107_v39 = vshrl.u32 %v4026_v20, 16 }
  0x89   :  { %v4582_v23 = vmax.bf16 %v6102_v62, %v4020_v42  ;;  %v4587_v25 = vmax.bf16 %v6104_v10, %v4022_v18  ;;  %v6108_v45 = vshrl.u32 %v4028_v21, 16  ;;  %v6109_v62 = vshrl.u32 %v4030_v5, 16  ;;  %v6110_v10 = vld [vmem:[#allocation2_spill] sm:$0xff] }
  0x8a   :  { %v4592_v31 = vmax.bf16 %v6106_v63, %v4024_v19  ;;  %v4597_v17 = vmax.bf16 %v6107_v39, %v4026_v20  ;;  %v6112_v19 = vshrl.u32 %v4032_v11, 16  ;;  %v6113_v20 = vshrl.u32 %v4034_v12, 16 }
  0x8b   :  { %6103 = vst [vmem:[#allocation35_spill] sm:$0xff] %v4582_v23  ;;  %6105 = vst [vmem:[#allocation36_spill] sm:$0xff] %v4587_v25  ;;  %v4602_v42 = vmax.bf16 %v6108_v45, %v4028_v21  ;;  %v4607_v18 = vmax.bf16 %v6109_v62, %v4030_v5  ;;  %v6111_v25 = vunpack.c.0.s8 %v6110_v10  ;;  %v6114_v21 = vshrl.u32 %v4036_v16, 16 }
  0x8c   :  { %v4616_v63 = vmax.bf16 %v6112_v19, %v4032_v11  ;;  %v4621_v39 = vmax.bf16 %v6113_v20, %v4034_v12  ;;  %v6115_v5 = vshrl.u32 %v4038_v15, 16 }
  0x8d   :  { %v4611_v23 = vsub.s32 %v6111_v25, %v1090_v56  ;;  %v4626_v45 = vmax.bf16 %v6114_v21, %v4036_v16 }
  0x8e   :  { %v4631_v56 = vmax.bf16 %v6115_v5, %v4038_v15  ;;  %v6124_v5 = vld [vmem:[#allocation3_spill] sm:$0xff] }
  0x8f   :  { %v1092_v25 = vrot.slane %v4141_v24, %v4611_v23  ;;  %v1106_v11 = vrot.slane %v4146_v35, %v4611_v23  ;;  %v1120_v12 = vrot.slane %v4151_v60, %v4611_v23  ;;  %v1134_v62 = vrot.slane %v4156_v6, %v4611_v23 }
  0x90   :  { %v1148_v16 = vrot.slane %v4161_v52, %v4611_v23  ;;  %v1162_v10 = vrot.slane %v4166_v53, %v4611_v23  ;;  %v1176_v15 = vrot.slane %v4171_v54, %v4611_v23  ;;  %v1190_v24 = vrot.slane %v4176_v55, %v4611_v23 }
  0x91   :  { %v4650_v35 = vrot.slane %v1092_v25, %v4611_v23  ;;  %v4653_v60 = vrot.slane %v1106_v11, %v4611_v23  ;;  %v4656_v6 = vrot.slane %v1120_v12, %v4611_v23  ;;  %v4659_v52 = vrot.slane %v1134_v62, %v4611_v23  ;;  %v6125_v11 = vld [vmem:[#allocation4_spill] sm:$0xff]  ;;  %v6126_v62 = vld [vmem:[#allocation5_spill] sm:$0xff] }
  0x92   :  { %v4662_v53 = vrot.slane %v1148_v16, %v4611_v23  ;;  %v4665_v54 = vrot.slane %v1162_v10, %v4611_v23  ;;  %v4668_v55 = vrot.slane %v1176_v15, %v4611_v23  ;;  %v4671_v19 = vrot.slane %v1190_v24, %v4611_v23  ;;  %v6127_v10 = vld [vmem:[#allocation6_spill] sm:$0xff] }
  0x93   :  { %6116 = vst [vmem:[#allocation37_spill] sm:$0xff] %v4650_v35  ;;  %6117 = vst [vmem:[#allocation38_spill] sm:$0xff] %v4653_v60  ;;  %v1204_v20 = vrot.slane %v4181_v0, %v4611_v23  ;;  %v1218_v21 = vrot.slane %v4186_v1, %v4611_v23  ;;  %v1232_v25 = vrot.slane %v6124_v5, %v4611_v23  ;;  %v6128_v24 = vld [vmem:[#allocation46_spill] sm:$0xff] }
  0x94   :  { %6118 = vst [vmem:[#allocation39_spill] sm:$0xff] %v4656_v6  ;;  %6119 = vst [vmem:[#allocation40_spill] sm:$0xff] %v4659_v52  ;;  %v1246_v12 = vrot.slane %v6125_v11, %v4611_v23  ;;  %v1260_v16 = vrot.slane %v6126_v62, %v4611_v23  ;;  %v1274_v15 = vrot.slane %v6127_v10, %v4611_v23  ;;  %v6129_v0 = vld [vmem:[#allocation50_spill] sm:$0xff] }
  0x95   :  { %6120 = vst [vmem:[#allocation41_spill] sm:$0xff] %v4662_v53  ;;  %6121 = vst [vmem:[#allocation42_spill] sm:$0xff] %v4665_v54  ;;  %v4690_v1 = vrot.slane %v1204_v20, %v4611_v23  ;;  %v4693_v5 = vrot.slane %v1218_v21, %v4611_v23  ;;  %v4696_v11 = vrot.slane %v1232_v25, %v4611_v23  ;;  %v6138_v21 = vld [vmem:[#allocation51_spill] sm:$0xff]  ;;  %v6139_v25 = vld [vmem:[#allocation52_spill] sm:$0xff] }
  0x96   :  { %6122 = vst [vmem:[#allocation43_spill] sm:$0xff] %v4668_v55  ;;  %6123 = vst [vmem:[#allocation44_spill] sm:$0xff] %v4671_v19  ;;  %v1288_v19 = vrot.slane %v6128_v24, %v4611_v23  ;;  %v1302_v55 = vrot.slane %v6129_v0, %v4611_v23  ;;  %v4699_v62 = vrot.slane %v1246_v12, %v4611_v23  ;;  %v6140_v12 = vld [vmem:[#allocation54_spill] sm:$0xff] }
  0x97   :  { %6130 = vst [vmem:[#allocation45_spill] sm:$0xff] %v4690_v1  ;;  %6131 = vst [vmem:[#allocation47_spill] sm:$0xff] %v4693_v5  ;;  %v4702_v10 = vrot.slane %v1260_v16, %v4611_v23  ;;  %v4705_v24 = vrot.slane %v1274_v15, %v4611_v23  ;;  %v1316_v5 = vrot.slane %v6138_v21, %v4611_v23  ;;  %v6141_v16 = vld [vmem:[#allocation55_spill] sm:$0xff]  ;;  %v6142_v15 = vld [vmem:[#allocation56_spill] sm:$0xff] }
  0x98   :  { %6132 = vst [vmem:[#allocation48_spill] sm:$0xff] %v4696_v11  ;;  %6133 = vst [vmem:[#allocation49_spill] sm:$0xff] %v4699_v62  ;;  %v4708_v0 = vrot.slane %v1288_v19, %v4611_v23  ;;  %v4711_v20 = vrot.slane %v1302_v55, %v4611_v23  ;;  %v1330_v11 = vrot.slane %v6139_v25, %v4611_v23  ;;  %v6143_v19 = vld [vmem:[#allocation57_spill] sm:$0xff]  ;;  %v6144_v55 = vld [vmem:[#allocation58_spill] sm:$0xff] }
  0x99   :  { %6134 = vst [vmem:[#allocation53_spill] sm:$0xff] %v4702_v10  ;;  %6135 = vst [vmem:[#allocation61_spill] sm:$0xff] %v4705_v24  ;;  %v1344_v62 = vrot.slane %v6140_v12, %v4611_v23  ;;  %v1358_v10 = vrot.slane %v6141_v16, %v4611_v23  ;;  %v1372_v24 = vrot.slane %v6142_v15, %v4611_v23  ;;  %v6145_v21 = vld [vmem:[#allocation59_spill] sm:$0xff] }
  0x9a   :  { %6136 = vst [vmem:[#allocation2_spill] sm:$0xff] %v4708_v0  ;;  %6137 = vst [vmem:[#allocation3_spill] sm:$0xff] %v4711_v20  ;;  %v1386_v0 = vrot.slane %v6143_v19, %v4611_v23  ;;  %v1400_v20 = vrot.slane %v6144_v55, %v4611_v23  ;;  %v1414_v1 = vrot.slane %v6145_v21, %v4611_v23 }
  0x9b   :  { %v4730_v25 = vrot.slane %v1316_v5, %v4611_v23  ;;  %v4733_v12 = vrot.slane %v1330_v11, %v4611_v23  ;;  %v4736_v16 = vrot.slane %v1344_v62, %v4611_v23  ;;  %v4739_v15 = vrot.slane %v1358_v10, %v4611_v23  ;;  %v6154_v11 = vld [vmem:[#allocation60_spill] sm:$0xff]  ;;  %v6155_v62 = vld [vmem:[#allocation62_spill] sm:$0xff]  ;;  %v6156_v10 = vld [vmem:[#allocation7_spill] sm:$0xff] }
  0x9c   :  { %v4742_v19 = vrot.slane %v1372_v24, %v4611_v23  ;;  %v4745_v55 = vrot.slane %v1386_v0, %v4611_v23  ;;  %v4748_v21 = vrot.slane %v1400_v20, %v4611_v23  ;;  %v4751_v5 = vrot.slane %v1414_v1, %v4611_v23  ;;  %v6157_v24 = vld [vmem:[#allocation8_spill] sm:$0xff]  ;;  %v6158_v0 = vld [vmem:[#allocation9_spill] sm:$0xff]  ;;  %v6159_v20 = vld [vmem:[#allocation10_spill] sm:$0xff] }
  0x9d   :  { %6146 = vst [vmem:[#allocation4_spill] sm:$0xff] %v4730_v25  ;;  %6147 = vst [vmem:[#allocation5_spill] sm:$0xff] %v4733_v12  ;;  %v1428_v12 = vrot.slane %v6154_v11, %v4611_v23  ;;  %v6160_v1 = vld [vmem:[#allocation11_spill] sm:$0xff]  ;;  %v6161_v11 = vld [vmem:[#allocation12_spill] sm:$0xff] }
  0x9e   :  { %6148 = vst [vmem:[#allocation6_spill] sm:$0xff] %v4736_v16  ;;  %6149 = vst [vmem:[#allocation46_spill] sm:$0xff] %v4739_v15  ;;  %v1442_v16 = vrot.slane %v6155_v62, %v4611_v23  ;;  %v1456_v15 = vrot.slane %v6156_v10, %v4611_v23  ;;  %v1526_v25 = vrot.slane %v6161_v11, %v4611_v23 }
  0x9f   :  { %6150 = vst [vmem:[#allocation50_spill] sm:$0xff] %v4742_v19  ;;  %6151 = vst [vmem:[#allocation51_spill] sm:$0xff] %v4745_v55  ;;  %v1470_v19 = vrot.slane %v6157_v24, %v4611_v23  ;;  %v1484_v55 = vrot.slane %v6158_v0, %v4611_v23  ;;  %v4770_v62 = vrot.slane %v1428_v12, %v4611_v23 }
  0xa0   :  { %6152 = vst [vmem:[#allocation52_spill] sm:$0xff] %v4748_v21  ;;  %6153 = vst [vmem:[#allocation54_spill] sm:$0xff] %v4751_v5  ;;  %v1498_v21 = vrot.slane %v6159_v20, %v4611_v23  ;;  %v1512_v5 = vrot.slane %v6160_v1, %v4611_v23  ;;  %v4773_v10 = vrot.slane %v1442_v16, %v4611_v23  ;;  %v6170_v16 = vld [vmem:[#allocation13_spill] sm:$0xff] }
  0xa1   :  { %6162 = vst [vmem:[#allocation55_spill] sm:$0xff] %v4770_v62  ;;  %v4776_v24 = vrot.slane %v1456_v15, %v4611_v23  ;;  %v4779_v0 = vrot.slane %v1470_v19, %v4611_v23  ;;  %v4782_v20 = vrot.slane %v1484_v55, %v4611_v23  ;;  %v4791_v12 = vrot.slane %v1526_v25, %v4611_v23  ;;  %v6171_v15 = vld [vmem:[#allocation14_spill] sm:$0xff]  ;;  %v6172_v19 = vld [vmem:[#allocation15_spill] sm:$0xff]  ;;  %v6173_v55 = vld [vmem:[#allocation16_spill] sm:$0xff] }
  0xa2   :  { %6163 = vst [vmem:[#allocation56_spill] sm:$0xff] %v4773_v10  ;;  %v4785_v1 = vrot.slane %v1498_v21, %v4611_v23  ;;  %v4788_v11 = vrot.slane %v1512_v5, %v4611_v23  ;;  %v1540_v10 = vrot.slane %v6170_v16, %v4611_v23  ;;  %v6174_v21 = vld [vmem:[#allocation17_spill] sm:$0xff]  ;;  %v6175_v5 = vld [vmem:[#allocation18_spill] sm:$0xff]  ;;  %v6176_v25 = vld [vmem:[#allocation19_spill] sm:$0xff] }
  0xa3   :  { %6164 = vst [vmem:[#allocation57_spill] sm:$0xff] %v4776_v24  ;;  %6165 = vst [vmem:[#allocation58_spill] sm:$0xff] %v4779_v0  ;;  %v1554_v24 = vrot.slane %v6171_v15, %v4611_v23  ;;  %v1568_v0 = vrot.slane %v6172_v19, %v4611_v23  ;;  %v6177_v16 = vld [vmem:[#allocation20_spill] sm:$0xff] }
  0xa4   :  { %6166 = vst [vmem:[#allocation59_spill] sm:$0xff] %v4782_v20  ;;  %6167 = vst [vmem:[#allocation60_spill] sm:$0xff] %v4785_v1  ;;  %v1582_v20 = vrot.slane %v6173_v55, %v4611_v23  ;;  %v1596_v1 = vrot.slane %v6174_v21, %v4611_v23  ;;  %v1638_v62 = vrot.slane %v6177_v16, %v4611_v23 }
  0xa5   :  { %6168 = vst [vmem:[#allocation62_spill] sm:$0xff] %v4788_v11  ;;  %6169 = vst [vmem:[#allocation7_spill] sm:$0xff] %v4791_v12  ;;  %v1610_v11 = vrot.slane %v6175_v5, %v4611_v23  ;;  %v1624_v12 = vrot.slane %v6176_v25, %v4611_v23  ;;  %v4810_v15 = vrot.slane %v1540_v10, %v4611_v23 }
  0xa6   :  { %v4813_v19 = vrot.slane %v1554_v24, %v4611_v23  ;;  %v4816_v55 = vrot.slane %v1568_v0, %v4611_v23  ;;  %v4819_v21 = vrot.slane %v1582_v20, %v4611_v23  ;;  %v4822_v5 = vrot.slane %v1596_v1, %v4611_v23  ;;  %v6186_v24 = vld [vmem:[#allocation21_spill] sm:$0xff]  ;;  %v6187_v0 = vld [vmem:[#allocation22_spill] sm:$0xff]  ;;  %v6188_v20 = vld [vmem:[#allocation23_spill] sm:$0xff] }
  0xa7   :  { %6178 = vst [vmem:[#allocation8_spill] sm:$0xff] %v4810_v15  ;;  %v4825_v25 = vrot.slane %v1610_v11, %v4611_v23  ;;  %v4828_v16 = vrot.slane %v1624_v12, %v4611_v23  ;;  %v4831_v10 = vrot.slane %v1638_v62, %v4611_v23  ;;  %v6189_v1 = vld [vmem:[#allocation24_spill] sm:$0xff]  ;;  %v6190_v11 = vld [vmem:[#allocation25_spill] sm:$0xff]  ;;  %v6191_v12 = vld [vmem:[#allocation26_spill] sm:$0xff] }
  0xa8   :  { %6179 = vst [vmem:[#allocation9_spill] sm:$0xff] %v4813_v19  ;;  %6180 = vst [vmem:[#allocation10_spill] sm:$0xff] %v4816_v55  ;;  %v1652_v19 = vrot.slane %v6186_v24, %v4611_v23  ;;  %v1666_v55 = vrot.slane %v6187_v0, %v4611_v23  ;;  %v6192_v62 = vld [vmem:[#allocation27_spill] sm:$0xff]  ;;  %v6193_v24 = vld [vmem:[#allocation28_spill] sm:$0xff] }
  0xa9   :  { %6181 = vst [vmem:[#allocation11_spill] sm:$0xff] %v4819_v21  ;;  %6182 = vst [vmem:[#allocation12_spill] sm:$0xff] %v4822_v5  ;;  %v1680_v21 = vrot.slane %v6188_v20, %v4611_v23  ;;  %v1694_v5 = vrot.slane %v6189_v1, %v4611_v23  ;;  %v1750_v15 = vrot.slane %v6193_v24, %v4611_v23 }
  0xaa   :  { %6183 = vst [vmem:[#allocation13_spill] sm:$0xff] %v4825_v25  ;;  %6184 = vst [vmem:[#allocation14_spill] sm:$0xff] %v4828_v16  ;;  %v1708_v25 = vrot.slane %v6190_v11, %v4611_v23  ;;  %v1722_v16 = vrot.slane %v6191_v12, %v4611_v23  ;;  %v4850_v0 = vrot.slane %v1652_v19, %v4611_v23 }
  0xab   :  { %6185 = vst [vmem:[#allocation15_spill] sm:$0xff] %v4831_v10  ;;  %v1736_v10 = vrot.slane %v6192_v62, %v4611_v23  ;;  %v4853_v20 = vrot.slane %v1666_v55, %v4611_v23  ;;  %v4856_v1 = vrot.slane %v1680_v21, %v4611_v23  ;;  %v4859_v11 = vrot.slane %v1694_v5, %v4611_v23  ;;  %v6198_v21 = vld [vmem:[#allocation29_spill] sm:$0xff]  ;;  %v6199_v5 = vld [vmem:[#allocation30_spill] sm:$0xff] }
  0xac   :  { %v4862_v12 = vrot.slane %v1708_v25, %v4611_v23  ;;  %v4865_v62 = vrot.slane %v1722_v16, %v4611_v23  ;;  %v4871_v19 = vrot.slane %v1750_v15, %v4611_v23  ;;  %v1764_v55 = vrot.slane %v4381_v13, %v4611_v23  ;;  %v6200_v25 = vld [vmem:[#allocation31_spill] sm:$0xff]  ;;  %v6201_v13 = vld [vmem:[#allocation32_spill] sm:$0xff]  ;;  %v6260_v35 = vld [vmem:[#allocation62_spill] sm:$0xff] }
  0xad   :  { %6194 = vst [vmem:[#allocation16_spill] sm:$0xff] %v4856_v1  ;;  %6195 = vst [vmem:[#allocation17_spill] sm:$0xff] %v4859_v11  ;;  %v4868_v24 = vrot.slane %v1736_v10, %v4611_v23  ;;  %v1778_v1 = vrot.slane %v6198_v21, %v4611_v23  ;;  %v1792_v11 = vrot.slane %v6199_v5, %v4611_v23 }
  0xae   :  { %6196 = vst [vmem:[#allocation18_spill] sm:$0xff] %v4862_v12  ;;  %6197 = vst [vmem:[#allocation19_spill] sm:$0xff] %v4871_v19  ;;  %v1806_v12 = vrot.slane %v6200_v25, %v4611_v23  ;;  %v1820_v16 = vrot.slane %v4401_v33, %v4611_v23  ;;  %v1834_v10 = vrot.slane %v4406_v49, %v4611_v23 }
  0xaf   :  { %v1848_v15 = vrot.slane %v4411_v44, %v4611_v23  ;;  %v1862_v19 = vrot.slane %v6201_v13, %v4611_v23  ;;  %v4890_v21 = vrot.slane %v1764_v55, %v4611_v23  ;;  %v4893_v5 = vrot.slane %v1778_v1, %v4611_v23  ;;  %v6264_v53 = vld [vmem:[#allocation10_spill] sm:$0xff] }
  0xb0   :  { %v4896_v25 = vrot.slane %v1792_v11, %v4611_v23  ;;  %v4899_v33 = vrot.slane %v1806_v12, %v4611_v23  ;;  %v4902_v49 = vrot.slane %v1820_v16, %v4611_v23  ;;  %v4905_v44 = vrot.slane %v1834_v10, %v4611_v23 }
  0xb1   :  { %6202 = vst [vmem:[#allocation20_spill] sm:$0xff] %v4893_v5  ;;  %v4908_v13 = vrot.slane %v1848_v15, %v4611_v23  ;;  %v4911_v55 = vrot.slane %v1862_v19, %v4611_v23  ;;  %v1876_v1 = vrot.slane %v4421_v3, %v4611_v23  ;;  %v1890_v11 = vrot.slane %v4426_v9, %v4611_v23 }
  0xb2   :  { %v1904_v12 = vrot.slane %v4431_v14, %v4611_v23  ;;  %v1918_v16 = vrot.slane %v4436_v34, %v4611_v23  ;;  %v1932_v10 = vrot.slane %v4441_v36, %v4611_v23  ;;  %v1946_v15 = vrot.slane %v4446_v22, %v4611_v23 }
  0xb3   :  { %v1960_v19 = vrot.slane %v4451_v59, %v4611_v23  ;;  %v1974_v3 = vrot.slane %v4456_v61, %v4611_v23  ;;  %v4930_v9 = vrot.slane %v1876_v1, %v4611_v23  ;;  %v4933_v14 = vrot.slane %v1890_v11, %v4611_v23 }
  0xb4   :  { %v4936_v34 = vrot.slane %v1904_v12, %v4611_v23  ;;  %v4939_v36 = vrot.slane %v1918_v16, %v4611_v23  ;;  %v4942_v22 = vrot.slane %v1932_v10, %v4611_v23  ;;  %v4945_v59 = vrot.slane %v1946_v15, %v4611_v23  ;;  %v6204_v10 = vld [vmem:[#allocation33_spill] sm:$0xff]  ;;  %v6270_v60 = vld [vmem:[#allocation16_spill] sm:$0xff] }
  0xb5   :  { %v4948_v61 = vrot.slane %v1960_v19, %v4611_v23  ;;  %v4951_v1 = vrot.slane %v1974_v3, %v4611_v23  ;;  %v1988_v11 = vrot.slane %v4461_v2, %v4611_v23  ;;  %v2002_v12 = vrot.slane %v4466_v8, %v4611_v23  ;;  %v6271_v6 = vld [vmem:[#allocation17_spill] sm:$0xff]  ;;  %v6272_v52 = vld [vmem:[#allocation18_spill] sm:$0xff]  ;;  %v6273_v54 = vld [vmem:[#allocation19_spill] sm:$0xff] }
  0xb6   :  { %6203 = vst [vmem:[#allocation21_spill] sm:$0xff] %v4942_v22  ;;  %v2016_v16 = vrot.slane %v4471_v29, %v4611_v23  ;;  %v2030_v22 = vrot.slane %v6204_v10, %v4611_v23  ;;  %v2044_v15 = vrot.slane %v4481_v30, %v4611_v23  ;;  %v2058_v19 = vrot.slane %v4486_v43, %v4611_v23 }
  0xb7   :  { %v2072_v3 = vrot.slane %v4491_v27, %v4611_v23  ;;  %v2086_v2 = vrot.slane %v4496_v26, %v4611_v23  ;;  %v4970_v8 = vrot.slane %v1988_v11, %v4611_v23  ;;  %v4973_v29 = vrot.slane %v2002_v12, %v4611_v23 }
  0xb8   :  { %v4976_v10 = vrot.slane %v2016_v16, %v4611_v23  ;;  %v4979_v30 = vrot.slane %v2030_v22, %v4611_v23  ;;  %v4982_v43 = vrot.slane %v2044_v15, %v4611_v23  ;;  %v4985_v27 = vrot.slane %v2058_v19, %v4611_v23 }
  0xb9   :  { %v4988_v26 = vrot.slane %v2072_v3, %v4611_v23  ;;  %v4991_v11 = vrot.slane %v2086_v2, %v4611_v23  ;;  %v2100_v12 = vrot.slane %v4501_v37, %v4611_v23  ;;  %v2114_v16 = vrot.slane %v4506_v38, %v4611_v23 }
  0xba   :  { %v2128_v22 = vrot.slane %v4511_v41, %v4611_v23  ;;  %v2142_v15 = vrot.slane %v4516_v32, %v4611_v23  ;;  %v2156_v19 = vrot.slane %v4521_v28, %v4611_v23  ;;  %v2170_v3 = vrot.slane %v4526_v46, %v4611_v23 }
  0xbb   :  { %6205 = vst [vmem:[#allocation22_spill] sm:$0xff] %v4988_v26  ;;  %6206 = vst [vmem:[#allocation23_spill] sm:$0xff] %v4991_v11  ;;  %v2184_v2 = vrot.slane %v4531_v47, %v4611_v23  ;;  %v2198_v37 = vrot.slane %v4536_v48, %v4611_v23  ;;  %v5010_v38 = vrot.slane %v2100_v12, %v4611_v23 }
  0xbc   :  { %v5013_v41 = vrot.slane %v2114_v16, %v4611_v23  ;;  %v5016_v32 = vrot.slane %v2128_v22, %v4611_v23  ;;  %v5019_v28 = vrot.slane %v2142_v15, %v4611_v23  ;;  %v5022_v46 = vrot.slane %v2156_v19, %v4611_v23  ;;  %v6215_v15 = vld [vmem:[#allocation34_spill] sm:$0xff] }
  0xbd   :  { %6207 = vst [vmem:[#allocation24_spill] sm:$0xff] %v5010_v38  ;;  %v5025_v47 = vrot.slane %v2170_v3, %v4611_v23  ;;  %v5028_v48 = vrot.slane %v2184_v2, %v4611_v23  ;;  %v5031_v12 = vrot.slane %v2198_v37, %v4611_v23  ;;  %v2212_v16 = vrot.slane %v4541_v40, %v4611_v23  ;;  %v6274_v5 = vld [vmem:[#allocation21_spill] sm:$0xff] }
  0xbe   :  { %6208 = vst [vmem:[#allocation25_spill] sm:$0xff] %v5013_v41  ;;  %6209 = vst [vmem:[#allocation26_spill] sm:$0xff] %v5016_v32  ;;  %v2226_v22 = vrot.slane %v4546_v58, %v4611_v23  ;;  %v2254_v19 = vrot.slane %v4556_v57, %v4611_v23  ;;  %v2268_v3 = vrot.slane %v4561_v50, %v4611_v23  ;;  %v6291_v38 = vld [vmem:[#allocation41_spill] sm:$0xff]  ;;  %v6315_v41 = vld [vmem:[#allocation4_spill] sm:$0xff] }
  0xbf   :  { %6210 = vst [vmem:[#allocation27_spill] sm:$0xff] %v5019_v28  ;;  %6211 = vst [vmem:[#allocation28_spill] sm:$0xff] %v5022_v46  ;;  %v2240_v28 = vrot.slane %v6215_v15, %v4611_v23  ;;  %v2282_v2 = vrot.slane %v4566_v51, %v4611_v23  ;;  %v2296_v37 = vrot.slane %v4571_v4, %v4611_v23 }
  0xc0   :  { %6212 = vst [vmem:[#allocation29_spill] sm:$0xff] %v5025_v47  ;;  %6213 = vst [vmem:[#allocation30_spill] sm:$0xff] %v5028_v48  ;;  %v2310_v40 = vrot.slane %v4577_v7, %v4611_v23  ;;  %v5050_v58 = vrot.slane %v2212_v16, %v4611_v23  ;;  %v5053_v15 = vrot.slane %v2226_v22, %v4611_v23  ;;  %v6224_v22 = vld [vmem:[#allocation35_spill] sm:$0xff] }
  0xc1   :  { %6214 = vst [vmem:[#allocation31_spill] sm:$0xff] %v5031_v12  ;;  %v5056_v57 = vrot.slane %v2240_v28, %v4611_v23  ;;  %v5059_v50 = vrot.slane %v2254_v19, %v4611_v23  ;;  %v5062_v51 = vrot.slane %v2268_v3, %v4611_v23  ;;  %v5065_v4 = vrot.slane %v2282_v2, %v4611_v23  ;;  %v6225_v28 = vld [vmem:[#allocation36_spill] sm:$0xff]  ;;  %v6287_v47 = vld [vmem:[#allocation39_spill] sm:$0xff] }
  0xc2   :  { %6216 = vst [vmem:[#allocation32_spill] sm:$0xff] %v5050_v58  ;;  %6217 = vst [vmem:[#allocation33_spill] sm:$0xff] %v5053_v15  ;;  %v5068_v7 = vrot.slane %v2296_v37, %v4611_v23  ;;  %v5071_v16 = vrot.slane %v2310_v40, %v4611_v23  ;;  %v2324_v15 = vrot.slane %v6224_v22, %v4611_v23 }
  0xc3   :  { %6218 = vst [vmem:[#allocation34_spill] sm:$0xff] %v5056_v57  ;;  %6219 = vst [vmem:[#allocation63_spill] sm:$0xff] %v5059_v50  ;;  %v2338_v57 = vrot.slane %v6225_v28, %v4611_v23  ;;  %v2352_v19 = vrot.slane %v4592_v31, %v4611_v23  ;;  %v2366_v3 = vrot.slane %v4597_v17, %v4611_v23 }
  0xc4   :  { %6220 = vst [vmem:[#allocation64_spill] sm:$0xff] %v5062_v51  ;;  %6221 = vst [vmem:[#allocation65_spill] sm:$0xff] %v5065_v4  ;;  %v2380_v2 = vrot.slane %v4602_v42, %v4611_v23  ;;  %v2394_v37 = vrot.slane %v4607_v18, %v4611_v23  ;;  %v2408_v40 = vrot.slane %v4616_v63, %v4611_v23  ;;  %v6297_v4 = vld [vmem:[#allocation37_spill] sm:$0xff] }
  0xc5   :  { %6222 = vst [vmem:[#allocation66_spill] sm:$0xff] %v5068_v7  ;;  %6223 = vst [vmem:[#allocation67_spill] sm:$0xff] %v5071_v16  ;;  %v2422_v22 = vrot.slane %v4621_v39, %v4611_v23  ;;  %v5090_v28 = vrot.slane %v2324_v15, %v4611_v23  ;;  %v5093_v31 = vrot.slane %v2338_v57, %v4611_v23  ;;  %v6285_v16 = vld [vmem:[#allocation38_spill] sm:$0xff] }
  0xc6   :  { %v5096_v17 = vrot.slane %v2352_v19, %v4611_v23  ;;  %v5099_v42 = vrot.slane %v2366_v3, %v4611_v23  ;;  %v5102_v18 = vrot.slane %v2380_v2, %v4611_v23  ;;  %v5105_v63 = vrot.slane %v2394_v37, %v4611_v23  ;;  %v6295_v3 = vld [vmem:[#allocation43_spill] sm:$0xff] }
  0xc7   :  { %6226 = vst [vmem:[#allocation35_spill] sm:$0xff] %v5090_v28  ;;  %6227 = vst [vmem:[#allocation36_spill] sm:$0xff] %v5093_v31  ;;  %v5108_v39 = vrot.slane %v2408_v40, %v4611_v23  ;;  %v5111_v15 = vrot.slane %v2422_v22, %v4611_v23  ;;  %v2436_v57 = vrot.slane %v4626_v45, %v4611_v23  ;;  %v6286_v40 = vunpack.c.l.b16 %v6285_v16 }
  0xc8   :  { %6228 = vst [vmem:[#allocation68_spill] sm:$0xff] %v5096_v17  ;;  %6229 = vst [vmem:[#allocation69_spill] sm:$0xff] %v5099_v42  ;;  %v2450_v19 = vrot.slane %v4631_v56, %v4611_v23  ;;  %v6288_v31 = vunpack.c.l.b16 %v6287_v47  ;;  %v6289_v17 = vld [vmem:[#allocation40_spill] sm:$0xff]  ;;  %v6292_v42 = vunpack.c.l.b16 %v6291_v38  ;;  %v6296_v51 = vunpack.c.l.b16 %v6295_v3  ;;  %v6307_v3 = vld [vmem:[#allocation53_spill] sm:$0xff] }
  0xc9   :  { %6230 = vst [vmem:[#allocation70_spill] sm:$0xff] %v5102_v18  ;;  %6231 = vst [vmem:[#allocation71_spill] sm:$0xff] %v5105_v63  ;;  %v5124_v22 = vrot.slane %v2436_v57, %v4611_v23  ;;  %v6259_v63 = vld [vmem:[#allocation60_spill] sm:$0xff]  ;;  %v2556_v28 = vrot.slane %v6286_v40, 7  ;;  %v6290_v26 = vunpack.c.l.b16 %v6289_v17  ;;  %v6298_v37 = vunpack.c.l.b16 %v6297_v4  ;;  %v6299_v40 = vld [vmem:[#allocation45_spill] sm:$0xff] }
  0xca   :  { %6232 = vst [vmem:[#allocation72_spill] sm:$0xff] %v5108_v39  ;;  %6233 = vst [vmem:[#allocation73_spill] sm:$0xff] %v5111_v15  ;;  %v5127_v45 = vrot.slane %v2450_v19, %v4611_v23  ;;  %v6267_v23 = vld [vmem:[#allocation13_spill] sm:$0xff]  ;;  %v6269_v15 = vld [vmem:[#allocation15_spill] sm:$0xff]  ;;  %v2559_v39 = vrot.slane %v6288_v31, 6  ;;  %v2565_v50 = vrot.slane %v6292_v42, 4  ;;  %v6300_v7 = vunpack.c.l.b16 %v6299_v40 }
  0xcb   :  { %6234 = vst [vmem:[#allocation74_spill] sm:$0xff] %v5124_v22  ;;  %v6266_v22 = vld [vmem:[#allocation12_spill] sm:$0xff]  ;;  %v2562_v57 = vrot.slane %v6290_v26, 5  ;;  %v6293_v19 = vld [vmem:[#allocation42_spill] sm:$0xff]  ;;  %v2571_v18 = vrot.slane %v6296_v51, 2  ;;  %v2558_v16 = vsel %vm2557_vm0, %v2556_v28, %v6298_v37  ;;  %v6301_v31 = vld [vmem:[#allocation47_spill] sm:$0xff]  ;;  %v6308_v51 = vunpack.c.l.b16 %v6307_v3 }
  0xcc   :  { %6235 = vst [vmem:[#allocation75_spill] sm:$0xff] %v5127_v45  ;;  %v6268_v45 = vld [vmem:[#allocation14_spill] sm:$0xff]  ;;  %v6294_v56 = vunpack.c.l.b16 %v6293_v19  ;;  %v2574_v47 = vrot.slane %v6300_v7, 7  ;;  %v6302_v12 = vunpack.c.l.b16 %v6301_v31  ;;  %v6303_v26 = vld [vmem:[#allocation48_spill] sm:$0xff]  ;;  %v2561_v42 = vsel %vm2560_vm1, %v2559_v39, %v2558_v16  ;;  %v6305_v19 = vld [vmem:[#allocation49_spill] sm:$0xff] }
  0xcd   :  { %v6304_v48 = vunpack.c.l.b16 %v6303_v26  ;;  %v2582_v2 = vrot.slane %v6308_v51, 3  ;;  %v6309_v4 = vld [vmem:[#allocation61_spill] sm:$0xff]  ;;  %v2564_v37 = vsel %vm2563_vm2, %v2562_v57, %v2561_v42  ;;  %v6311_v7 = vld [vmem:[#allocation44_spill] sm:$0xff]  ;;  %v6313_v31 = vld [vmem:[#allocation3_spill] sm:$0xff]  ;;  %v6316_v39 = vunpack.c.l.b16 %v6315_v41 }
  0xce   :  { %v2568_v58 = vrot.slane %v6294_v56, 3  ;;  %v2576_v17 = vrot.slane %v6302_v12, 6  ;;  %v6306_v56 = vunpack.c.l.b16 %v6305_v19  ;;  %v6310_v32 = vunpack.c.l.b16 %v6309_v4  ;;  %v6317_v3 = vld [vmem:[#allocation5_spill] sm:$0xff]  ;;  %v6323_v41 = vld [vmem:[#allocation46_spill] sm:$0xff] }
  0xcf   :  { %v2578_v38 = vrot.slane %v6304_v48, 5  ;;  %v6312_v40 = vunpack.c.l.b16 %v6311_v7  ;;  %v6314_v26 = vunpack.c.l.b16 %v6313_v31  ;;  %v2588_v16 = vrot.slane %v6316_v39, 6  ;;  %v6321_v7 = vld [vmem:[#allocation2_spill] sm:$0xff] }
  0xd0   :  { %v2580_v46 = vrot.slane %v6306_v56, 4  ;;  %v2584_v28 = vrot.slane %v6310_v32, 2  ;;  %v2567_v19 = vsel %vm2566_vm3, %v2565_v50, %v2564_v37  ;;  %v6318_v51 = vunpack.c.l.b16 %v6317_v3  ;;  %v6319_v32 = vld [vmem:[#allocation6_spill] sm:$0xff] }
  0xd1   :  { %v2575_v12 = vsel %vm2557_vm0, %v2574_v47, %v6312_v40  ;;  %v2586_v48 = vrot.slane %v6314_v26, 7  ;;  %v6320_v11 = vunpack.c.l.b16 %v6319_v32  ;;  %v2570_v42 = vsel %vm2569_vm4, %v2568_v58, %v2567_v19  ;;  %v6327_v19 = vld [vmem:[#allocation52_spill] sm:$0xff] }
  0xd2   :  { %v2577_v56 = vsel %vm2560_vm1, %v2576_v17, %v2575_v12  ;;  %v2590_v4 = vrot.slane %v6318_v51, 5  ;;  %v6322_v40 = vunpack.c.l.b16 %v6321_v7  ;;  %v6324_v26 = vunpack.c.l.b16 %v6323_v41  ;;  %v6325_v12 = vld [vmem:[#allocation50_spill] sm:$0xff] }
  0xd3   :  { %v2592_v57 = vrot.slane %v6320_v11, 4  ;;  %v2579_v47 = vsel %vm2563_vm2, %v2578_v38, %v2577_v56  ;;  %v5271_v50 = vsel %vm2572_vm5, %v2571_v18, %v2570_v42  ;;  %v6326_v11 = vunpack.c.l.b16 %v6325_v12  ;;  %v6329_v51 = vld [vmem:[#allocation54_spill] sm:$0xff]  ;;  %v6331_v42 = vld [vmem:[#allocation55_spill] sm:$0xff] }
  0xd4   :  { %v2587_v31 = vsel %vm2557_vm0, %v2586_v48, %v6322_v40  ;;  %v2594_v39 = vrot.slane %v6324_v26, 3  ;;  %v2581_v17 = vsel %vm2566_vm3, %v2580_v46, %v2579_v47  ;;  %v6328_v56 = vunpack.c.l.b16 %v6327_v19  ;;  %v6333_v40 = vld [vmem:[#allocation56_spill] sm:$0xff]  ;;  %v6339_v19 = vld [vmem:[#allocation58_spill] sm:$0xff] }
  0xd5   :  { %v2589_v37 = vsel %vm2560_vm1, %v2588_v16, %v2587_v31  ;;  %v2596_v3 = vrot.slane %v6326_v11, 2  ;;  %v2583_v58 = vsel %vm2569_vm4, %v2582_v2, %v2581_v17  ;;  %v6330_v32 = vunpack.c.l.b16 %v6329_v51 }
  0xd6   :  { %v2591_v38 = vsel %vm2563_vm2, %v2590_v4, %v2589_v37  ;;  %v2598_v48 = vrot.slane %v6328_v56, 7  ;;  %v5284_v18 = vsel %vm2572_vm5, %v2584_v28, %v2583_v58  ;;  %v6332_v16 = vunpack.c.l.b16 %v6331_v42  ;;  %v6335_v4 = vld [vmem:[#allocation51_spill] sm:$0xff]  ;;  %v6337_v37 = vld [vmem:[#allocation57_spill] sm:$0xff] }
  0xd7   :  { %v2600_v7 = vrot.slane %v6330_v32, 6  ;;  %v2593_v46 = vsel %vm2566_vm3, %v2592_v57, %v2591_v38  ;;  %v6334_v31 = vunpack.c.l.b16 %v6333_v40  ;;  %v6336_v26 = vunpack.c.l.b16 %v6335_v4  ;;  %v6345_v40 = vld [vmem:[#allocation8_spill] sm:$0xff] }
  0xd8   :  { %v2602_v47 = vrot.slane %v6332_v16, 5  ;;  %v2595_v2 = vsel %vm2569_vm4, %v2594_v39, %v2593_v46  ;;  %v6338_v12 = vunpack.c.l.b16 %v6337_v37  ;;  %v6340_v28 = vunpack.c.l.b16 %v6339_v19 }
  0xd9   :  { %v2604_v41 = vrot.slane %v6334_v31, 4  ;;  %v2599_v17 = vsel %vm2557_vm0, %v2598_v48, %v6336_v26  ;;  %v5300_v57 = vsel %vm2572_vm5, %v2596_v3, %v2595_v2  ;;  %v6341_v56 = vunpack.c.l.b16 %v6259_v63  ;;  %v6343_v48 = vld [vmem:[#allocation7_spill] sm:$0xff]  ;;  %v6347_v26 = vld [vmem:[#allocation9_spill] sm:$0xff] }
  0xda   :  { %v2606_v11 = vrot.slane %v6338_v12, 3  ;;  %v2608_v58 = vrot.slane %v6340_v28, 2  ;;  %v2601_v38 = vsel %vm2560_vm1, %v2600_v7, %v2599_v17  ;;  %v6342_v39 = vunpack.c.l.b16 %v6260_v35  ;;  %v6349_v7 = vld [vmem:[#allocation59_spill] sm:$0xff] }
  0xdb   :  { %v2610_v51 = vrot.slane %v6341_v56, 7  ;;  %v2603_v46 = vsel %vm2563_vm2, %v2602_v47, %v2601_v38  ;;  %v6344_v42 = vunpack.c.l.b16 %v6343_v48  ;;  %v6346_v31 = vunpack.c.l.b16 %v6345_v40 }
  0xdc   :  { %v2612_v32 = vrot.slane %v6342_v39, 6  ;;  %v6348_v37 = vunpack.c.l.b16 %v6347_v26  ;;  %v2605_v2 = vsel %vm2566_vm3, %v2604_v41, %v2603_v46  ;;  %v6350_v17 = vunpack.c.l.b16 %v6349_v7 }
  0xdd   :  { %v2614_v16 = vrot.slane %v6344_v42, 5  ;;  %v2616_v4 = vrot.slane %v6346_v31, 4  ;;  %v6351_v35 = vunpack.c.l.b16 %v6264_v53  ;;  %v6352_v47 = vunpack.c.l.b16 %v6266_v22  ;;  %v6355_v53 = vld [vmem:[#allocation11_spill] sm:$0xff] }
  0xde   :  { %v2618_v3 = vrot.slane %v6348_v37, 3  ;;  %v2611_v63 = vsel %vm2557_vm0, %v2610_v51, %v6350_v17  ;;  %v2607_v28 = vsel %vm2569_vm4, %v2606_v11, %v2605_v2  ;;  %v6353_v56 = vunpack.c.l.b16 %v6267_v23 }
  0xdf   :  { %v2620_v12 = vrot.slane %v6351_v35, 2  ;;  %v2622_v19 = vrot.slane %v6352_v47, 7  ;;  %v2613_v38 = vsel %vm2560_vm1, %v2612_v32, %v2611_v63  ;;  %v6354_v48 = vunpack.c.l.b16 %v6268_v45 }
  0xe0   :  { %v2624_v39 = vrot.slane %v6353_v56, 6  ;;  %v5329_v46 = vsel %vm2572_vm5, %v2608_v58, %v2607_v28  ;;  %v2615_v51 = vsel %vm2563_vm2, %v2614_v16, %v2613_v38  ;;  %v6356_v42 = vunpack.c.l.b16 %v6355_v53 }
  0xe1   :  { %v2626_v41 = vrot.slane %v6354_v48, 5  ;;  %v6357_v40 = vunpack.c.l.b16 %v6269_v15  ;;  %v2617_v32 = vsel %vm2566_vm3, %v2616_v4, %v2615_v51  ;;  %v6358_v31 = vunpack.c.l.b16 %v4850_v0 }
  0xe2   :  { %v2623_v22 = vsel %vm2557_vm0, %v2622_v19, %v6356_v42  ;;  %v6359_v26 = vunpack.c.l.b16 %v4853_v20  ;;  %v2619_v37 = vsel %vm2569_vm4, %v2618_v3, %v2617_v32  ;;  %v6360_v2 = vunpack.c.l.b16 %v6271_v6 }
  0xe3   :  { %v2628_v11 = vrot.slane %v6357_v40, 4  ;;  %v2625_v23 = vsel %vm2560_vm1, %v2624_v39, %v2623_v22  ;;  %v2630_v45 = vrot.slane %v6358_v31, 3  ;;  %v6361_v15 = vunpack.c.l.b16 %v6272_v52 }
  0xe4   :  { %v2632_v58 = vrot.slane %v6359_v26, 2  ;;  %v2627_v16 = vsel %vm2563_vm2, %v2626_v41, %v2625_v23  ;;  %v2634_v7 = vrot.slane %v6360_v2, 7  ;;  %v5350_v4 = vsel %vm2572_vm5, %v2620_v12, %v2619_v37 }
  0xe5   :  { %v2636_v17 = vrot.slane %v6361_v15, 6  ;;  %v2629_v63 = vsel %vm2566_vm3, %v2628_v11, %v2627_v16  ;;  %v6362_v0 = vunpack.c.l.b16 %v4865_v62  ;;  %v6363_v20 = vunpack.c.l.b16 %v4868_v24  ;;  %v6372_v11 = vld [vmem:[#allocation20_spill] sm:$0xff] }
  0xe6   :  { %v2631_v3 = vsel %vm2569_vm4, %v2630_v45, %v2629_v63  ;;  %v6364_v19 = vunpack.c.l.b16 %v6270_v60  ;;  %v6365_v52 = vunpack.c.l.b16 %v6273_v54  ;;  %v6366_v12 = vunpack.c.l.b16 %v4890_v21 }
  0xe7   :  { %v2638_v35 = vrot.slane %v6362_v0, 5  ;;  %v2640_v47 = vrot.slane %v6363_v20, 4  ;;  %v5366_v56 = vsel %vm2572_vm5, %v2632_v58, %v2631_v3  ;;  %v6367_v24 = vunpack.c.l.b16 %v4896_v25 }
  0xe8   :  { %v2635_v6 = vsel %vm2557_vm0, %v2634_v7, %v6364_v19  ;;  %v2642_v28 = vrot.slane %v6365_v52, 3  ;;  %v2644_v38 = vrot.slane %v6366_v12, 2  ;;  %v6368_v48 = vunpack.c.l.b16 %v4899_v33 }
  0xe9   :  { %v2637_v62 = vsel %vm2560_vm1, %v2636_v17, %v2635_v6  ;;  %v2646_v39 = vrot.slane %v6367_v24, 7  ;;  %v6369_v51 = vunpack.c.l.b16 %v4902_v49  ;;  %v6370_v53 = vunpack.c.l.b16 %v4905_v44 }
  0xea   :  { %v2648_v41 = vrot.slane %v6368_v48, 6  ;;  %v2639_v60 = vsel %vm2563_vm2, %v2638_v35, %v2637_v62  ;;  %v6371_v42 = vunpack.c.l.b16 %v4908_v13  ;;  %v6373_v32 = vunpack.c.l.b16 %v6372_v11 }
  0xeb   :  { %v2650_v54 = vrot.slane %v6369_v51, 5  ;;  %v2652_v21 = vrot.slane %v6370_v53, 4  ;;  %v2641_v40 = vsel %vm2566_vm3, %v2640_v47, %v2639_v60  ;;  %v6374_v33 = vunpack.c.l.b16 %v4911_v55  ;;  %v6389_v60 = vld [vmem:[#allocation23_spill] sm:$0xff] }
  0xec   :  { %v2654_v22 = vrot.slane %v6371_v42, 3  ;;  %v2647_v25 = vsel %vm2557_vm0, %v2646_v39, %v6373_v32  ;;  %v6375_v31 = vunpack.c.l.b16 %v4933_v14  ;;  %v2643_v49 = vsel %vm2569_vm4, %v2642_v28, %v2641_v40  ;;  %v6393_v42 = vld [vmem:[#allocation25_spill] sm:$0xff]  ;;  %v6395_v40 = vld [vmem:[#allocation26_spill] sm:$0xff]  ;;  %v6397_v32 = vld [vmem:[#allocation27_spill] sm:$0xff] }
  0xed   :  { %v2656_v23 = vrot.slane %v6374_v33, 2  ;;  %v2649_v44 = vsel %vm2560_vm1, %v2648_v41, %v2647_v25  ;;  %v6376_v26 = vunpack.c.l.b16 %v4936_v34  ;;  %v6377_v58 = vunpack.c.l.b16 %v4939_v36 }
  0xee   :  { %v2658_v45 = vrot.slane %v6375_v31, 7  ;;  %v5395_v16 = vsel %vm2572_vm5, %v2644_v38, %v2643_v49  ;;  %v2651_v2 = vsel %vm2563_vm2, %v2650_v54, %v2649_v44  ;;  %v6378_v55 = vunpack.c.l.b16 %v4930_v9  ;;  %v6391_v54 = vld [vmem:[#allocation24_spill] sm:$0xff]  ;;  %v6399_v31 = vld [vmem:[#allocation22_spill] sm:$0xff] }
  0xef   :  { %v2660_v13 = vrot.slane %v6376_v26, 6  ;;  %v2662_v37 = vrot.slane %v6377_v58, 5  ;;  %v6379_v7 = vunpack.c.l.b16 %v6274_v5  ;;  %v2653_v17 = vsel %vm2566_vm3, %v2652_v21, %v2651_v2  ;;  %v6401_v44 = vld [vmem:[#allocation28_spill] sm:$0xff]  ;;  %v6403_v58 = vld [vmem:[#allocation30_spill] sm:$0xff] }
  0xf0   :  { %v2659_v14 = vsel %vm2557_vm0, %v2658_v45, %v6378_v55  ;;  %v6380_v63 = vunpack.c.l.b16 %v4945_v59  ;;  %v6381_v0 = vunpack.c.l.b16 %v4948_v61  ;;  %v2655_v20 = vsel %vm2569_vm4, %v2654_v22, %v2653_v17 }
  0xf1   :  { %v2664_v15 = vrot.slane %v6379_v7, 4  ;;  %v2661_v34 = vsel %vm2560_vm1, %v2660_v13, %v2659_v14  ;;  %v6382_v9 = vunpack.c.l.b16 %v4970_v8  ;;  %v6383_v5 = vunpack.c.l.b16 %v4973_v29  ;;  %v6405_v7 = vld [vmem:[#allocation31_spill] sm:$0xff] }
  0xf2   :  { %v2666_v36 = vrot.slane %v6380_v63, 3  ;;  %v2668_v35 = vrot.slane %v6381_v0, 2  ;;  %v2663_v47 = vsel %vm2563_vm2, %v2662_v37, %v2661_v34  ;;  %v5416_v6 = vsel %vm2572_vm5, %v2656_v23, %v2655_v20  ;;  %v6407_v34 = vld [vmem:[#allocation32_spill] sm:$0xff]  ;;  %v6409_v20 = vld [vmem:[#allocation29_spill] sm:$0xff] }
  0xf3   :  { %v2670_v3 = vrot.slane %v6382_v9, 7  ;;  %v2672_v19 = vrot.slane %v6383_v5, 6  ;;  %v2665_v52 = vsel %vm2566_vm3, %v2664_v15, %v2663_v47  ;;  %v6384_v59 = vunpack.c.l.b16 %v4976_v10 }
  0xf4   :  { %v6385_v61 = vunpack.c.l.b16 %v4979_v30  ;;  %v2667_v38 = vsel %vm2569_vm4, %v2666_v36, %v2665_v52  ;;  %v6386_v62 = vunpack.c.l.b16 %v4951_v1  ;;  %v6387_v29 = vunpack.c.l.b16 %v4982_v43 }
  0xf5   :  { %v2674_v28 = vrot.slane %v6384_v59, 5  ;;  %v6388_v39 = vunpack.c.l.b16 %v4985_v27  ;;  %v5432_v41 = vsel %vm2572_vm5, %v2668_v35, %v2667_v38  ;;  %v6390_v30 = vunpack.c.l.b16 %v6389_v60  ;;  %v6415_v38 = vld [vmem:[#allocation63_spill] sm:$0xff]  ;;  %v6419_v60 = vld [vmem:[#allocation66_spill] sm:$0xff] }
  0xf6   :  { %v2676_v12 = vrot.slane %v6385_v61, 4  ;;  %v2671_v8 = vsel %vm2557_vm0, %v2670_v3, %v6386_v62  ;;  %v2678_v24 = vrot.slane %v6387_v29, 3  ;;  %v6392_v53 = vunpack.c.l.b16 %v6391_v54  ;;  %v6411_v3 = vld [vmem:[#allocation33_spill] sm:$0xff] }
  0xf7   :  { %v2680_v48 = vrot.slane %v6388_v39, 2  ;;  %v2673_v10 = vsel %vm2560_vm1, %v2672_v19, %v2671_v8  ;;  %v2682_v51 = vrot.slane %v6390_v30, 7  ;;  %v6394_v22 = vunpack.c.l.b16 %v6393_v42  ;;  %v6417_v39 = vld [vmem:[#allocation65_spill] sm:$0xff] }
  0xf8   :  { %v2684_v21 = vrot.slane %v6392_v53, 6  ;;  %v2675_v1 = vsel %vm2563_vm2, %v2674_v28, %v2673_v10  ;;  %v6396_v11 = vunpack.c.l.b16 %v6395_v40  ;;  %v6398_v25 = vunpack.c.l.b16 %v6397_v32  ;;  %v6413_v28 = vld [vmem:[#allocation34_spill] sm:$0xff] }
  0xf9   :  { %v2686_v43 = vrot.slane %v6394_v22, 5  ;;  %v2677_v23 = vsel %vm2566_vm3, %v2676_v12, %v2675_v1  ;;  %v6400_v45 = vunpack.c.l.b16 %v6399_v31  ;;  %v6402_v26 = vunpack.c.l.b16 %v6401_v44  ;;  %v6423_v22 = vld [vmem:[#allocation35_spill] sm:$0xff] }
  0xfa   :  { %v2688_v27 = vrot.slane %v6396_v11, 4  ;;  %v2690_v33 = vrot.slane %v6398_v25, 3  ;;  %v6404_v37 = vunpack.c.l.b16 %v6403_v58  ;;  %v2679_v55 = vsel %vm2569_vm4, %v2678_v24, %v2677_v23  ;;  %v6431_v58 = vld [vmem:[#allocation70_spill] sm:$0xff] }
  0xfb   :  { %v2683_v49 = vsel %vm2557_vm0, %v2682_v51, %v6400_v45  ;;  %v2692_v13 = vrot.slane %v6402_v26, 2  ;;  %v6406_v15 = vunpack.c.l.b16 %v6405_v7  ;;  %v6408_v63 = vunpack.c.l.b16 %v6407_v34  ;;  %v6429_v45 = vld [vmem:[#allocation68_spill] sm:$0xff] }
  0xfc   :  { %v2694_v2 = vrot.slane %v6404_v37, 7  ;;  %v2685_v14 = vsel %vm2560_vm1, %v2684_v21, %v2683_v49  ;;  %v5461_v0 = vsel %vm2572_vm5, %v2680_v48, %v2679_v55  ;;  %v6410_v47 = vunpack.c.l.b16 %v6409_v20  ;;  %v6421_v21 = vld [vmem:[#allocation67_spill] sm:$0xff] }
  0xfd   :  { %v2696_v17 = vrot.slane %v6406_v15, 6  ;;  %v2698_v36 = vrot.slane %v6408_v63, 5  ;;  %v2687_v35 = vsel %vm2563_vm2, %v2686_v43, %v2685_v14  ;;  %v6412_v5 = vunpack.c.l.b16 %v6411_v3  ;;  %v6433_v55 = vld [vmem:[#allocation71_spill] sm:$0xff] }
  0xfe   :  { %v2695_v9 = vsel %vm2557_vm0, %v2694_v2, %v6410_v47  ;;  %v2689_v52 = vsel %vm2566_vm3, %v2688_v27, %v2687_v35  ;;  %v6414_v61 = vunpack.c.l.b16 %v6413_v28  ;;  %v6416_v62 = vunpack.c.l.b16 %v6415_v38  ;;  %v6425_v27 = vld [vmem:[#allocation64_spill] sm:$0xff]  ;;  %v6439_v47 = vld [vmem:[#allocation74_spill] sm:$0xff]  ;;  %v6443_v28 = vld [vmem:[#allocation75_spill] sm:$0xff] }
  0xff   :  { %v2700_v19 = vrot.slane %v6412_v5, 4  ;;  %v2697_v59 = vsel %vm2560_vm1, %v2696_v17, %v2695_v9  ;;  %v2691_v29 = vsel %vm2569_vm4, %v2690_v33, %v2689_v52  ;;  %v6418_v48 = vunpack.c.l.b16 %v6417_v39  ;;  %v6427_v33 = vld [vmem:[#allocation36_spill] sm:$0xff]  ;;  %v2761_v39 = vld [vmem:[%s5668_s1] sm:$0xf] }
 0x100   :  { %v2702_v12 = vrot.slane %v6414_v61, 3  ;;  %v2704_v8 = vrot.slane %v6416_v62, 2  ;;  %v2699_v24 = vsel %vm2563_vm2, %v2698_v36, %v2697_v59  ;;  %v6420_v30 = vunpack.c.l.b16 %v6419_v60  ;;  %v6435_v17 = vld [vmem:[#allocation72_spill] sm:$0xff]  ;;  %v6437_v36 = vld [vmem:[#allocation73_spill] sm:$0xff] }
 0x101   :  { %v2706_v10 = vrot.slane %v6418_v48, 7  ;;  %v5482_v54 = vsel %vm2572_vm5, %v2692_v13, %v2691_v29  ;;  %v2701_v53 = vsel %vm2566_vm3, %v2700_v19, %v2699_v24  ;;  %v6422_v1 = vunpack.c.l.b16 %v6421_v21  ;;  %v6441_v19 = vld [vmem:[#allocation69_spill] sm:$0xff]  ;;  %v2770_v21 = vld [vmem:[%s5668_s1 + $0xc] sm:$0xf] }
 0x102   :  { %v2708_v51 = vrot.slane %v6420_v30, 6  ;;  %v6424_v43 = vunpack.c.l.b16 %v6423_v22  ;;  %v2703_v11 = vsel %vm2569_vm4, %v2702_v12, %v2701_v53  ;;  %v6426_v32 = vunpack.c.l.b16 %v6425_v27  ;;  %v2767_v30 = vld [vmem:[%s5668_s1 + $0x8] sm:$0xf] }
 0x103   :  { %v2710_v42 = vrot.slane %v6422_v1, 5  ;;  %v6428_v23 = vunpack.c.l.b16 %v6427_v33  ;;  %v6430_v49 = vunpack.c.l.b16 %v6429_v45  ;;  %v5498_v26 = vsel %vm2572_vm5, %v2704_v8, %v2703_v11  ;;  %v2773_v1 = vld [vmem:[%s5668_s1 + $0x10] sm:$0xf]  ;;  %v2785_v11 = vld [vmem:[%s5668_s1 + $0x20] sm:$0xf] }
 0x104   :  { %v2712_v40 = vrot.slane %v6424_v43, 4  ;;  %v2707_v25 = vsel %vm2557_vm0, %v2706_v10, %v6426_v32  ;;  %v6432_v37 = vunpack.c.l.b16 %v6431_v58  ;;  %v6434_v14 = vunpack.c.l.b16 %v6433_v55  ;;  %v2779_v43 = vld [vmem:[%s5668_s1 + $0x18] sm:$0xf]  ;;  %v2788_v32 = vld [vmem:[%s5668_s1 + $0x24] sm:$0xf] }
 0x105   :  { %v2714_v31 = vrot.slane %v6428_v23, 3  ;;  %v2716_v44 = vrot.slane %v6430_v49, 2  ;;  %v2709_v13 = vsel %vm2560_vm1, %v2708_v51, %v2707_v25  ;;  %v6436_v34 = vunpack.c.l.b16 %v6435_v17  ;;  %v2791_v25 = vld [vmem:[%s5668_s1 + $0x28] sm:$0xf]  ;;  %v2794_v33 = vld [vmem:[%s5668_s1 + $0x2c] sm:$0xf] }
 0x106   :  { %v2718_v2 = vrot.slane %v6432_v37, 7  ;;  %v2720_v7 = vrot.slane %v6434_v14, 6  ;;  %v2711_v15 = vsel %vm2563_vm2, %v2710_v42, %v2709_v13  ;;  %v6438_v35 = vunpack.c.l.b16 %v6437_v36  ;;  %v2776_v42 = vld [vmem:[%s5668_s1 + $0x14] sm:$0xf] }
 0x107   :  { %v2722_v63 = vrot.slane %v6436_v34, 5  ;;  %v6440_v9 = vunpack.c.l.b16 %v6439_v47  ;;  %v2713_v5 = vsel %vm2566_vm3, %v2712_v40, %v2711_v15  ;;  %v6442_v52 = vunpack.c.l.b16 %v6441_v19  ;;  %v2782_v40 = vld [vmem:[%s5668_s1 + $0x1c] sm:$0xf] }
 0x108   :  { %v2724_v20 = vrot.slane %v6438_v35, 4  ;;  %v6444_v61 = vunpack.c.l.b16 %v6443_v28  ;;  %v2730_v38 = vpack.c.b16 %v5271_v50, %v5271_v50  ;;  %v2715_v62 = vsel %vm2569_vm4, %v2714_v31, %v2713_v5 }
 0x109   :  { %v2726_v3 = vrot.slane %v6440_v9, 3  ;;  %v2719_v59 = vsel %vm2557_vm0, %v2718_v2, %v6442_v52  ;;  %v2731_v29 = vpack.c.b16 %v5284_v18, %v5284_v18  ;;  %v2732_v24 = vpack.c.b16 %v5300_v57, %v5300_v57  ;;  %v2764_v57 = vld [vmem:[%s5668_s1 + $0x4] sm:$0xf] }
 0x10a   :  { %v2728_v12 = vrot.slane %v6444_v61, 2  ;;  %v2721_v8 = vsel %vm2560_vm1, %v2720_v7, %v2719_v59  ;;  %v2717_v48 = vsel %vm2572_vm5, %v2716_v44, %v2715_v62  ;;  %v2733_v50 = vpack.c.b16 %v5329_v46, %v5329_v46  ;;  %v2797_v44 = vld [vmem:[%s5668_s1 + $0x30] sm:$0xf] }
 0x10b   :  { %v2723_v10 = vsel %vm2563_vm2, %v2722_v63, %v2721_v8  ;;  %v2734_v60 = vpack.c.b16 %v5350_v4, %v5350_v4  ;;  %v2735_v46 = vpack.c.b16 %v5366_v56, %v5366_v56  ;;  %v2736_v4 = vpack.c.b16 %v5395_v16, %v5395_v16 }
 0x10c   :  { %v2725_v51 = vsel %vm2566_vm3, %v2724_v20, %v2723_v10  ;;  %v2737_v53 = vpack.c.b16 %v5416_v6, %v5416_v6  ;;  %v2738_v16 = vpack.c.b16 %v5432_v41, %v5432_v41  ;;  %v2739_v6 = vpack.c.b16 %v5461_v0, %v5461_v0 }
 0x10d   :  { %v2727_v56 = vsel %vm2569_vm4, %v2726_v3, %v2725_v51  ;;  %v2740_v22 = vpack.c.b16 %v5482_v54, %v5482_v54  ;;  %v2741_v0 = vpack.c.b16 %v5498_v26, %v5498_v26  ;;  %v2742_v27 = vpack.c.b16 %v2717_v48, %v2717_v48  ;;  %v2800_v26 = vld [vmem:[%s5668_s1 + $0x34] sm:$0xf] }
 0x10e   :  { %v2729_v41 = vsel %vm2572_vm5, %v2728_v12, %v2727_v56  ;;  %v2762_v54 = vsel %vm5537_vm8, %v2730_v38, %v2761_v39  ;;  %v2765_v31 = vsel %vm5537_vm8, %v2731_v29, %v2764_v57  ;;  %v2768_v45 = vsel %vm5537_vm8, %v2732_v24, %v2767_v30 }
 0x10f   :  { %v2743_v23 = vpack.c.b16 %v2729_v41, %v2729_v41  ;;  %2763 = vst [vmem:[%s5668_s1] sm:$0xf] %v2762_v54  ;;  %v2771_v49 = vsel %vm5537_vm8, %v2733_v50, %v2770_v21  ;;  %2766 = vst [vmem:[%s5668_s1 + $0x4] sm:$0xf] %v2765_v31  ;;  %v2774_v13 = vsel %vm5537_vm8, %v2734_v60, %v2773_v1 }
 0x110   :  { %2769 = vst [vmem:[%s5668_s1 + $0x8] sm:$0xf] %v2768_v45  ;;  %2772 = vst [vmem:[%s5668_s1 + $0xc] sm:$0xf] %v2771_v49  ;;  %v2777_v58 = vsel %vm5537_vm8, %v2735_v46, %v2776_v42  ;;  %v2780_v37 = vsel %vm5537_vm8, %v2736_v4, %v2779_v43  ;;  %v2783_v2 = vsel %vm5537_vm8, %v2737_v53, %v2782_v40 }
 0x111   :  { %2775 = vst [vmem:[%s5668_s1 + $0x10] sm:$0xf] %v2774_v13  ;;  %2778 = vst [vmem:[%s5668_s1 + $0x14] sm:$0xf] %v2777_v58  ;;  %v2786_v55 = vsel %vm5537_vm8, %v2738_v16, %v2785_v11  ;;  %v2789_v14 = vsel %vm5537_vm8, %v2739_v6, %v2788_v32  ;;  %v2792_v7 = vsel %vm5537_vm8, %v2740_v22, %v2791_v25 }
 0x112   :  { %2781 = vst [vmem:[%s5668_s1 + $0x18] sm:$0xf] %v2780_v37  ;;  %2784 = vst [vmem:[%s5668_s1 + $0x1c] sm:$0xf] %v2783_v2  ;;  %v2795_v15 = vsel %vm5537_vm8, %v2741_v0, %v2794_v33  ;;  %v2798_v17 = vsel %vm5537_vm8, %v2742_v27, %v2797_v44  ;;  %v2801_v34 = vsel %vm5537_vm8, %v2743_v23, %v2800_v26 }
 0x113   :  { %2787 = vst [vmem:[%s5668_s1 + $0x20] sm:$0xf] %v2786_v55  ;;  %2790 = vst [vmem:[%s5668_s1 + $0x24] sm:$0xf] %v2789_v14 }
 0x114   :  { %2793 = vst [vmem:[%s5668_s1 + $0x28] sm:$0xf] %v2792_v7  ;;  %2796 = vst [vmem:[%s5668_s1 + $0x2c] sm:$0xf] %v2795_v15 }
 0x115   :  { %2799 = vst [vmem:[%s5668_s1 + $0x30] sm:$0xf] %v2798_v17  ;;  %2802 = vst [vmem:[%s5668_s1 + $0x34] sm:$0xf] %v2801_v34 }

// kernel: forward.13
= control target key start
LH: loop header
LB: loop body
LE: loop exit
PB: predicated region body
PF: predicated region fallthrough
CT: control target
= control target key end

     0   :  { %vm28_vm0 = vcmask 1040384   ;;  %vm29_vm1 = vsmask.f32 256  ;;  %vm31_vm2 = vcmask 1041409   ;;  %vm32_vm3 = vsmask.f32 1280  ;;  %s87_s0 = inlined_call_operand.vmem [shape: bf16[2,2,1,2,256], index: 0, kind: input, shape index: {}]   ;;  %s88_s1 = inlined_call_operand.vmem [shape: bf16[2,1,256], index: 1, kind: output, shape index: {}]  }
   0x1   :  { %v8_v0 = vld [vmem:[%s87_s0] sm:$0x3]  ;;  %v9_v1 = vld [vmem:[%s87_s0 + $0x2] sm:$0x3]  ;;  %vm63_vm4 = vmand %vm28_vm0, %vm29_vm1 }
   0x2   :  { %v12_v3 = vmax.bf16 %v9_v1, %v8_v0  ;;  %vm33_vm5 = vmand %vm31_vm2, %vm32_vm3  ;;  %v10_v4 = vld [vmem:[%s87_s0 + $0x4] sm:$0x3]  ;;  %v11_v5 = vld [vmem:[%s87_s0 + $0x6] sm:$0x3] }
   0x3   :  { %v13_v7 = vmax.bf16 %v11_v5, %v10_v4  ;;  %vm34_vm6 = vmor %vm33_vm5, %vm63_vm4  ;;  %v35_v8 = vld [vmem:[%s88_s1] sm:$0x3]  ;;  %v38_v11 = vld [vmem:[%s88_s1 + $0x2] sm:$0x3] }
   0x4   :  { %v15_v6 = vshrl.u32 %v12_v3, 16 }
   0x5   :  { %v20_v10 = vshrl.u32 %v13_v7, 16 }
   0x6   :  { %v26_v9 = vmax.bf16 %v15_v6, %v12_v3 }
   0x7   :  { %v27_v13 = vmax.bf16 %v20_v10, %v13_v7 }
   0x8   :  { %v36_v12 = vsel %vm34_vm6, %v26_v9, %v35_v8 }
   0x9   :  { %37 = vst [vmem:[%s88_s1] sm:$0x3] %v36_v12  ;;  %v39_v14 = vsel %vm34_vm6, %v27_v13, %v38_v11 }
   0xa   :  { %40 = vst [vmem:[%s88_s1 + $0x2] sm:$0x3] %v39_v14 }

// kernel: forward.11
= control target key start
LH: loop header
LB: loop body
LE: loop exit
PB: predicated region body
PF: predicated region fallthrough
CT: control target
= control target key end

     0   :  { %v209_v0 = vlaneseq  ;;  %v601_v4 = vmov 1935823168   ;;  %v602_v6 = vmov 1983009808   ;;  %vm477_vm0 = vcmask 1041409   ;;  %s833_s0 = inlined_call_operand.vmem [shape: bf16[6,2,3,2,128], index: 0, kind: input, shape index: {}]   ;;  %s834_s1 = inlined_call_operand.vmem [shape: bf16[6,3,128], index: 1, kind: output, shape index: {}]  }
   0x1   :  { %v8_v1 = vld [vmem:[%s833_s0] sm:$0x1]  ;;  %v9_v2 = vld [vmem:[%s833_s0 + $0x1] sm:$0x1]  ;;  %v10_v3 = vld [vmem:[%s833_s0 + $0x2] sm:$0x1]  ;;  %v207_v5 = vunpack.c.l.s4 %v601_v4  ;;  %v333_v7 = vunpack.c.l.s4 %v602_v6 }
   0x2   :  { %v11_v8 = vld [vmem:[%s833_s0 + $0x3] sm:$0x1]  ;;  %v12_v9 = vld [vmem:[%s833_s0 + $0x4] sm:$0x1]  ;;  %v13_v10 = vld [vmem:[%s833_s0 + $0x5] sm:$0x1] }
   0x3   :  { %v44_v11 = vmax.bf16 %v11_v8, %v8_v1  ;;  %v45_v12 = vmax.bf16 %v12_v9, %v9_v2  ;;  %v46_v13 = vmax.bf16 %v13_v10, %v10_v3  ;;  %v208_v14 = vunpack.c.0.s8 %v207_v5  ;;  %v14_v17 = vld [vmem:[%s833_s0 + $0x6] sm:$0x1]  ;;  %v15_v18 = vld [vmem:[%s833_s0 + $0x7] sm:$0x1]  ;;  %v16_v22 = vld [vmem:[%s833_s0 + $0x8] sm:$0x1] }
   0x4   :  { %v210_v15 = vshrl.u32 %v209_v0, 7  ;;  %v334_v16 = vunpack.c.0.s8 %v333_v7  ;;  %v17_v25 = vld [vmem:[%s833_s0 + $0x9] sm:$0x1]  ;;  %v18_v26 = vld [vmem:[%s833_s0 + $0xa] sm:$0x1]  ;;  %vm480_vm1 = vcmask 1042434  }
   0x5   :  { %v63_v19 = vshrl.u32 %v44_v11, 16  ;;  %v68_v20 = vshrl.u32 %v45_v12, 16  ;;  %v73_v21 = vshrl.u32 %v46_v13, 16  ;;  %v19_v30 = vld [vmem:[%s833_s0 + $0xb] sm:$0x1]  ;;  %v47_v31 = vmax.bf16 %v17_v25, %v14_v17 }
   0x6   :  { %v640_v23 = vsub.s32 %v208_v14, %v210_v15  ;;  %v642_v24 = vsub.s32 %v334_v16, %v210_v15  ;;  %v20_v32 = vld [vmem:[%s833_s0 + $0xc] sm:$0x1]  ;;  %v48_v33 = vmax.bf16 %v18_v26, %v15_v18  ;;  %v49_v34 = vmax.bf16 %v19_v30, %v16_v22  ;;  %v21_v35 = vld [vmem:[%s833_s0 + $0xd] sm:$0x1]  ;;  %v22_v36 = vld [vmem:[%s833_s0 + $0xe] sm:$0x1] }
   0x7   :  { %v170_v27 = vmax.bf16 %v63_v19, %v44_v11  ;;  %v171_v28 = vmax.bf16 %v68_v20, %v45_v12  ;;  %v172_v29 = vmax.bf16 %v73_v21, %v46_v13  ;;  %v23_v37 = vld [vmem:[%s833_s0 + $0xf] sm:$0x1]  ;;  %vm556_vm2 = vcmask 1041408   ;;  %v24_v42 = vld [vmem:[%s833_s0 + $0x10] sm:$0x1] }
   0x8   :  { %vm557_vm3 = vsmask.f32 1280  ;;  %v78_v41 = vshrl.u32 %v47_v31, 16  ;;  %v25_v43 = vld [vmem:[%s833_s0 + $0x11] sm:$0x1]  ;;  %v83_v44 = vshrl.u32 %v48_v33, 16  ;;  %v50_v46 = vmax.bf16 %v23_v37, %v20_v32 }
   0x9   :  { %v212_v38 = vrot.slane %v170_v27, %v640_v23  ;;  %v219_v39 = vrot.slane %v171_v28, %v640_v23  ;;  %v226_v40 = vrot.slane %v172_v29, %v640_v23  ;;  %v88_v45 = vshrl.u32 %v49_v34, 16  ;;  %v26_v0 = vld [vmem:[%s833_s0 + $0x12] sm:$0x1]  ;;  %v29_v1 = vld [vmem:[%s833_s0 + $0x15] sm:$0x1]  ;;  %vm709_vm4 = vmand %vm556_vm2, %vm557_vm3 }
   0xa   :  { %v51_v47 = vmax.bf16 %v24_v42, %v21_v35  ;;  %v173_v51 = vmax.bf16 %v78_v41, %v47_v31  ;;  %v174_v52 = vmax.bf16 %v83_v44, %v48_v33  ;;  %v52_v54 = vmax.bf16 %v25_v43, %v22_v36  ;;  %v27_v10 = vld [vmem:[%s833_s0 + $0x13] sm:$0x1]  ;;  %v30_v11 = vld [vmem:[%s833_s0 + $0x16] sm:$0x1]  ;;  %v28_v15 = vld [vmem:[%s833_s0 + $0x14] sm:$0x1] }
   0xb   :  { %v338_v48 = vrot.slane %v212_v38, %v642_v24  ;;  %v345_v49 = vrot.slane %v219_v39, %v642_v24  ;;  %v352_v50 = vrot.slane %v226_v40, %v642_v24  ;;  %v175_v53 = vmax.bf16 %v88_v45, %v49_v34  ;;  %v31_v16 = vld [vmem:[%s833_s0 + $0x17] sm:$0x1]  ;;  %v559_v29 = vld [vmem:[%s834_s1] sm:$0x3]  ;;  %v32_v38 = vld [vmem:[%s833_s0 + $0x18] sm:$0x1] }
   0xc   :  { %v93_v55 = vshrl.u32 %v50_v46, 16  ;;  %v233_v59 = vrot.slane %v173_v51, %v640_v23  ;;  %v240_v60 = vrot.slane %v174_v52, %v640_v23  ;;  %v98_v62 = vshrl.u32 %v51_v47, 16  ;;  %v33_v39 = vld [vmem:[%s833_s0 + $0x19] sm:$0x1]  ;;  %v35_v44 = vld [vmem:[%s833_s0 + $0x1b] sm:$0x1] }
   0xd   :  { %v458_v56 = vunpack.c.l.b16 %v338_v48  ;;  %v459_v57 = vunpack.c.l.b16 %v345_v49  ;;  %v460_v58 = vunpack.c.l.b16 %v352_v50  ;;  %v247_v61 = vrot.slane %v175_v53, %v640_v23  ;;  %v36_v45 = vld [vmem:[%s833_s0 + $0x1c] sm:$0x1] }
   0xe   :  { %v103_v63 = vshrl.u32 %v52_v54, 16  ;;  %v359_v4 = vrot.slane %v233_v59, %v642_v24  ;;  %v176_v5 = vmax.bf16 %v93_v55, %v50_v46  ;;  %v366_v6 = vrot.slane %v240_v60, %v642_v24  ;;  %v37_v55 = vld [vmem:[%s833_s0 + $0x1d] sm:$0x1] }
   0xf   :  { %v476_v2 = vrot.slane %v459_v57, 7  ;;  %v479_v3 = vrot.slane %v460_v58, 6  ;;  %v373_v7 = vrot.slane %v247_v61, %v642_v24  ;;  %v177_v8 = vmax.bf16 %v98_v62, %v51_v47 }
  0x10   :  { %v178_v9 = vmax.bf16 %v103_v63, %v52_v54  ;;  %v461_v13 = vunpack.c.l.b16 %v359_v4  ;;  %v254_v14 = vrot.slane %v176_v5, %v640_v23  ;;  %v53_v17 = vmax.bf16 %v29_v1, %v26_v0  ;;  %v34_v54 = vld [vmem:[%s833_s0 + $0x1a] sm:$0x1]  ;;  %v38_v5 = vld [vmem:[%s833_s0 + $0x1e] sm:$0x1] }
  0x11   :  { %v478_v12 = vsel %vm477_vm0, %v476_v2, %v458_v56  ;;  %v462_v19 = vunpack.c.l.b16 %v366_v6  ;;  %v463_v20 = vunpack.c.l.b16 %v373_v7  ;;  %v261_v21 = vrot.slane %v177_v8, %v640_v23  ;;  %v562_v56 = vld [vmem:[%s834_s1 + $0x2] sm:$0x3]  ;;  %v41_v6 = vld [vmem:[%s833_s0 + $0x21] sm:$0x1] }
  0x12   :  { %v481_v18 = vsel %vm480_vm1, %v479_v3, %v478_v12  ;;  %v268_v25 = vrot.slane %v178_v9, %v640_v23  ;;  %v380_v26 = vrot.slane %v254_v14, %v642_v24  ;;  %v54_v27 = vmax.bf16 %v30_v11, %v27_v10  ;;  %v565_v9 = vld [vmem:[%s834_s1 + $0x4] sm:$0x3]  ;;  %v39_v12 = vld [vmem:[%s833_s0 + $0x1f] sm:$0x1] }
  0x13   :  { %v502_v22 = vpack.c.b16 %v481_v18, %v481_v18  ;;  %v482_v30 = vrot.slane %v462_v19, 7  ;;  %v484_v31 = vrot.slane %v463_v20, 6  ;;  %v387_v32 = vrot.slane %v261_v21, %v642_v24  ;;  %v40_v18 = vld [vmem:[%s833_s0 + $0x20] sm:$0x1]  ;;  %v43_v19 = vld [vmem:[%s833_s0 + $0x23] sm:$0x1] }
  0x14   :  { %v55_v33 = vmax.bf16 %v31_v16, %v28_v15  ;;  %v394_v35 = vrot.slane %v268_v25, %v642_v24  ;;  %v464_v36 = vunpack.c.l.b16 %v380_v26  ;;  %v108_v37 = vshrl.u32 %v53_v17, 16 }
  0x15   :  { %v514_v34 = vrot.slane %v502_v22, %v642_v24  ;;  %v483_v40 = vsel %vm477_vm0, %v482_v30, %v461_v13  ;;  %v465_v41 = vunpack.c.l.b16 %v387_v32  ;;  %v113_v42 = vshrl.u32 %v54_v27, 16  ;;  %v42_v13 = vld [vmem:[%s833_s0 + $0x22] sm:$0x1] }
  0x16   :  { %v118_v43 = vshrl.u32 %v55_v33, 16  ;;  %v485_v47 = vsel %vm480_vm1, %v484_v31, %v483_v40  ;;  %v466_v48 = vunpack.c.l.b16 %v394_v35  ;;  %v179_v49 = vmax.bf16 %v108_v37, %v53_v17 }
  0x17   :  { %v560_v46 = vsel %vm709_vm4, %v514_v34, %v559_v29  ;;  %v503_v50 = vpack.c.b16 %v485_v47, %v485_v47  ;;  %v486_v51 = vrot.slane %v465_v41, 7  ;;  %v180_v52 = vmax.bf16 %v113_v42, %v54_v27 }
  0x18   :  { %561 = vst [vmem:[%s834_s1] sm:$0x3] %v560_v46  ;;  %v181_v53 = vmax.bf16 %v118_v43, %v55_v33  ;;  %v488_v57 = vrot.slane %v466_v48, 6  ;;  %v275_v58 = vrot.slane %v179_v49, %v640_v23  ;;  %v56_v59 = vmax.bf16 %v35_v44, %v32_v38  ;;  %v568_v49 = vld [vmem:[%s834_s1 + $0x6] sm:$0x3] }
  0x19   :  { %v57_v60 = vmax.bf16 %v36_v45, %v33_v39  ;;  %v521_v61 = vrot.slane %v503_v50, %v642_v24  ;;  %v487_v62 = vsel %vm477_vm0, %v486_v51, %v464_v36  ;;  %v282_v63 = vrot.slane %v180_v52, %v640_v23 }
  0x1a   :  { %v289_v0 = vrot.slane %v181_v53, %v640_v23  ;;  %v489_v1 = vsel %vm480_vm1, %v488_v57, %v487_v62  ;;  %v401_v2 = vrot.slane %v275_v58, %v642_v24  ;;  %v58_v3 = vmax.bf16 %v37_v55, %v34_v54 }
  0x1b   :  { %v123_v4 = vshrl.u32 %v56_v59, 16  ;;  %v563_v7 = vsel %vm709_vm4, %v521_v61, %v562_v56  ;;  %v504_v8 = vpack.c.b16 %v489_v1, %v489_v1  ;;  %v408_v10 = vrot.slane %v282_v63, %v642_v24 }
  0x1c   :  { %v415_v11 = vrot.slane %v289_v0, %v642_v24  ;;  %564 = vst [vmem:[%s834_s1 + $0x2] sm:$0x3] %v563_v7  ;;  %v467_v14 = vunpack.c.l.b16 %v401_v2  ;;  %v128_v15 = vshrl.u32 %v57_v60, 16  ;;  %v133_v16 = vshrl.u32 %v58_v3, 16 }
  0x1d   :  { %v182_v17 = vmax.bf16 %v123_v4, %v56_v59  ;;  %v528_v20 = vrot.slane %v504_v8, %v642_v24  ;;  %v468_v21 = vunpack.c.l.b16 %v408_v10  ;;  %v59_v25 = vmax.bf16 %v41_v6, %v38_v5  ;;  %v571_v4 = vld [vmem:[%s834_s1 + $0x8] sm:$0x3] }
  0x1e   :  { %v469_v22 = vunpack.c.l.b16 %v415_v11  ;;  %v183_v26 = vmax.bf16 %v128_v15, %v57_v60  ;;  %v184_v27 = vmax.bf16 %v133_v16, %v58_v3  ;;  %v60_v30 = vmax.bf16 %v42_v13, %v39_v12  ;;  %v574_v12 = vld [vmem:[%s834_s1 + $0xa] sm:$0x3] }
  0x1f   :  { %v296_v29 = vrot.slane %v182_v17, %v640_v23  ;;  %v566_v31 = vsel %vm709_vm4, %v528_v20, %v565_v9  ;;  %v490_v32 = vrot.slane %v468_v21, 7  ;;  %v61_v34 = vmax.bf16 %v43_v19, %v40_v18 }
  0x20   :  { %v492_v33 = vrot.slane %v469_v22, 6  ;;  %567 = vst [vmem:[%s834_s1 + $0x4] sm:$0x3] %v566_v31  ;;  %v303_v35 = vrot.slane %v183_v26, %v640_v23  ;;  %v310_v36 = vrot.slane %v184_v27, %v640_v23  ;;  %v138_v38 = vshrl.u32 %v59_v25, 16 }
  0x21   :  { %v422_v37 = vrot.slane %v296_v29, %v642_v24  ;;  %v491_v39 = vsel %vm477_vm0, %v490_v32, %v467_v14  ;;  %v143_v40 = vshrl.u32 %v60_v30, 16  ;;  %v148_v41 = vshrl.u32 %v61_v34, 16 }
  0x22   :  { %v493_v42 = vsel %vm480_vm1, %v492_v33, %v491_v39  ;;  %v429_v43 = vrot.slane %v303_v35, %v642_v24  ;;  %v436_v44 = vrot.slane %v310_v36, %v642_v24  ;;  %v185_v46 = vmax.bf16 %v138_v38, %v59_v25 }
  0x23   :  { %v505_v45 = vpack.c.b16 %v493_v42, %v493_v42  ;;  %v186_v47 = vmax.bf16 %v143_v40, %v60_v30  ;;  %v187_v48 = vmax.bf16 %v148_v41, %v61_v34  ;;  %v470_v50 = vunpack.c.l.b16 %v422_v37 }
  0x24   :  { %v471_v51 = vunpack.c.l.b16 %v429_v43  ;;  %v472_v52 = vunpack.c.l.b16 %v436_v44  ;;  %v317_v54 = vrot.slane %v185_v46, %v640_v23 }
  0x25   :  { %v535_v53 = vrot.slane %v505_v45, %v642_v24  ;;  %v324_v55 = vrot.slane %v186_v47, %v640_v23  ;;  %v331_v56 = vrot.slane %v187_v48, %v640_v23 }
  0x26   :  { %v494_v57 = vrot.slane %v471_v51, 7  ;;  %v496_v58 = vrot.slane %v472_v52, 6  ;;  %v443_v60 = vrot.slane %v317_v54, %v642_v24 }
  0x27   :  { %v569_v59 = vsel %vm709_vm4, %v535_v53, %v568_v49  ;;  %v450_v61 = vrot.slane %v324_v55, %v642_v24  ;;  %v457_v62 = vrot.slane %v331_v56, %v642_v24 }
  0x28   :  { %570 = vst [vmem:[%s834_s1 + $0x6] sm:$0x3] %v569_v59  ;;  %v495_v63 = vsel %vm477_vm0, %v494_v57, %v470_v50  ;;  %v473_v23 = vunpack.c.l.b16 %v443_v60 }
  0x29   :  { %v497_v0 = vsel %vm480_vm1, %v496_v58, %v495_v63  ;;  %v474_v1 = vunpack.c.l.b16 %v450_v61  ;;  %v475_v2 = vunpack.c.l.b16 %v457_v62 }
  0x2a   :  { %v506_v3 = vpack.c.b16 %v497_v0, %v497_v0 }
  0x2b   :  { %v498_v5 = vrot.slane %v474_v1, 7  ;;  %v500_v6 = vrot.slane %v475_v2, 6 }
  0x2c   :  { %v542_v7 = vrot.slane %v506_v3, %v642_v24 }
  0x2d   :  { %v499_v8 = vsel %vm477_vm0, %v498_v5, %v473_v23 }
  0x2e   :  { %v572_v9 = vsel %vm709_vm4, %v542_v7, %v571_v4  ;;  %v501_v10 = vsel %vm480_vm1, %v500_v6, %v499_v8 }
  0x2f   :  { %573 = vst [vmem:[%s834_s1 + $0x8] sm:$0x3] %v572_v9  ;;  %v507_v11 = vpack.c.b16 %v501_v10, %v501_v10 }
  0x31   :  { %v549_v13 = vrot.slane %v507_v11, %v642_v24 }
  0x33   :  { %v575_v14 = vsel %vm709_vm4, %v549_v13, %v574_v12 }
  0x34   :  { %576 = vst [vmem:[%s834_s1 + $0xa] sm:$0x3] %v575_v14 }

// kernel: forward.12
= control target key start
LH: loop header
LB: loop body
LE: loop exit
PB: predicated region body
PF: predicated region fallthrough
CT: control target
= control target key end

     0   :  { %s1273_s12 = smov 0   ;;  %s1275_s13 = smov 0   ;;  %s1526_s0 = inlined_call_operand.vmem [shape: bf16[8,512], index: 0, kind: input, shape index: {}]   ;;  %s1527_s1 = inlined_call_operand.vmem [shape: bf16[512,256], index: 1, kind: input, shape index: {}]   ;;  %s1528_s2 = inlined_call_operand.vmem [shape: f32[1,256], index: 2, kind: input, shape index: {}]   ;;  %s1529_s3 = inlined_call_operand.vmem [shape: bf16[8,256], index: 3, kind: output, shape index: {}]  }
   0x1   :  { %s1277_s14 = smov 0   ;;  %s1279_s15 = smov 0  }
   0x2   :  { %s1281_s16 = smov 0  }
   0x3 LB: > { %s28_s17 = sadd.s32 1, %s1247_s15  ;;  %p76_p1 = scmp.ne.s32.totalorder %s1239_s13, %s1235_s12  ;;  %s1251_s16 = sphi %s1281_s16, %s13_s16   ;;  %s1247_s15 = sphi %s1279_s15, %s1533_s15   ;;  %s1243_s14 = sphi %s1277_s14, %s1532_s14   ;;  %s1239_s13 = sphi %s1275_s13, %s1531_s13   ;;  %s1235_s12 = sphi %s1273_s12, %s1530_s12  }
   0x4   : > { %p30_p0 = scmp.ge.s32.totalorder %s28_s17, 2  ;;  %p77_p2 = scmp.eq.s32.totalorder %s1251_s16, 0 }
   0x5   : > { %s69_s19 = sadd.s32 1, %s1239_s13  ;;  %p1048_p5 = scmp.ge.s32.totalorder %s1251_s16, 2 }
   0x6   : > { %s1535_s17 = smov (%p30_p0, %s28_s17), 0  ;;  %p78_p3 = por %p77_p2, %p76_p1 }
   0x7   : > { %s65_s18 = ssub.s32 %s1247_s15, %s1535_s17  ;;  %169 = sbr.rel (%p1048_p5) target bundleno = 58 (0x3a), region = 20 }
   0x8   : > { %p67_p4 = scmp.eq.s32.totalorder %s65_s18, 0 }
   0xa   : > { %s1308_s20 = scalar_select %p67_p4, %s1239_s13, %s69_s19  }
   0xc   : > { %172 = sbr.rel (!%p78_p3) target bundleno = 58 (0x3a), region = 24  ;;  %s174_s21 = sand.u32 (%p78_p3), 1, %s1239_s13  }
   0xd   : > { %s1050_s22 = sshll.u32 (%p78_p3), %s1247_s15, 2  ;;  %s1049_s23 = sshll.u32 (%p78_p3), %s174_s21, 8 }
   0xe   : > { %s1316_s26 = scalar_lea.vmem (%p78_p3), %s1527_s1, %s1050_s22  ;;  %s1320_s27 = scalar_lea.vmem (%p78_p3), [#allocation3], %s1049_s23 }
   0xf   : > { %v198_v0 = vld [vmem:[%s1316_s26] sm:$0xf] (%p78_p3)  ;;  %v200_v1 = vld [vmem:[%s1316_s26 + $0x8] sm:$0xf] (%p78_p3)  ;;  %v202_v2 = vld [vmem:[%s1316_s26 + $0x10] sm:$0xf] (%p78_p3) }
  0x10   : > { %199 = vst [vmem:[%s1320_s27] sm:$0xf] (%p78_p3), %v198_v0  ;;  %201 = vst [vmem:[%s1320_s27 + $0x4] sm:$0xf] (%p78_p3), %v200_v1  ;;  %v204_v3 = vld [vmem:[%s1316_s26 + $0x18] sm:$0xf] (%p78_p3) }
  0x11   : > { %v206_v4 = vld [vmem:[%s1316_s26 + $0x20] sm:$0xf]  ;;  %203 = vst [vmem:[%s1320_s27 + $0x8] sm:$0xf] %v202_v2  ;;  %205 = vst [vmem:[%s1320_s27 + $0xc] sm:$0xf] %v204_v3 }
  0x12   : > { %207 = vst [vmem:[%s1320_s27 + $0x10] sm:$0xf] %v206_v4  ;;  %v208_v5 = vld [vmem:[%s1316_s26 + $0x28] sm:$0xf]  ;;  %v210_v6 = vld [vmem:[%s1316_s26 + $0x30] sm:$0xf] }
  0x13   : > { %v212_v7 = vld [vmem:[%s1316_s26 + $0x38] sm:$0xf]  ;;  %209 = vst [vmem:[%s1320_s27 + $0x14] sm:$0xf] %v208_v5  ;;  %211 = vst [vmem:[%s1320_s27 + $0x18] sm:$0xf] %v210_v6 }
  0x14   : > { %213 = vst [vmem:[%s1320_s27 + $0x1c] sm:$0xf] %v212_v7  ;;  %v214_v8 = vld [vmem:[%s1316_s26 + $0x40] sm:$0xf]  ;;  %v216_v9 = vld [vmem:[%s1316_s26 + $0x48] sm:$0xf] }
  0x15   : > { %v218_v10 = vld [vmem:[%s1316_s26 + $0x50] sm:$0xf]  ;;  %215 = vst [vmem:[%s1320_s27 + $0x20] sm:$0xf] %v214_v8  ;;  %217 = vst [vmem:[%s1320_s27 + $0x24] sm:$0xf] %v216_v9 }
  0x16   : > { %219 = vst [vmem:[%s1320_s27 + $0x28] sm:$0xf] %v218_v10  ;;  %v220_v11 = vld [vmem:[%s1316_s26 + $0x58] sm:$0xf]  ;;  %v222_v12 = vld [vmem:[%s1316_s26 + $0x60] sm:$0xf] }
  0x17   : > { %v224_v13 = vld [vmem:[%s1316_s26 + $0x68] sm:$0xf]  ;;  %221 = vst [vmem:[%s1320_s27 + $0x2c] sm:$0xf] %v220_v11  ;;  %223 = vst [vmem:[%s1320_s27 + $0x30] sm:$0xf] %v222_v12 }
  0x18   : > { %225 = vst [vmem:[%s1320_s27 + $0x34] sm:$0xf] %v224_v13  ;;  %v226_v14 = vld [vmem:[%s1316_s26 + $0x70] sm:$0xf]  ;;  %v228_v15 = vld [vmem:[%s1316_s26 + $0x78] sm:$0xf] }
  0x19   : > { %v230_v16 = vld [vmem:[%s1316_s26 + $0x80] sm:$0xf]  ;;  %227 = vst [vmem:[%s1320_s27 + $0x38] sm:$0xf] %v226_v14  ;;  %229 = vst [vmem:[%s1320_s27 + $0x3c] sm:$0xf] %v228_v15 }
  0x1a   : > { %231 = vst [vmem:[%s1320_s27 + $0x40] sm:$0xf] %v230_v16  ;;  %v232_v17 = vld [vmem:[%s1316_s26 + $0x88] sm:$0xf]  ;;  %v234_v18 = vld [vmem:[%s1316_s26 + $0x90] sm:$0xf] }
  0x1b   : > { %v236_v19 = vld [vmem:[%s1316_s26 + $0x98] sm:$0xf]  ;;  %233 = vst [vmem:[%s1320_s27 + $0x44] sm:$0xf] %v232_v17  ;;  %235 = vst [vmem:[%s1320_s27 + $0x48] sm:$0xf] %v234_v18 }
  0x1c   : > { %237 = vst [vmem:[%s1320_s27 + $0x4c] sm:$0xf] %v236_v19  ;;  %v238_v20 = vld [vmem:[%s1316_s26 + $0xa0] sm:$0xf]  ;;  %v240_v21 = vld [vmem:[%s1316_s26 + $0xa8] sm:$0xf] }
  0x1d   : > { %v242_v22 = vld [vmem:[%s1316_s26 + $0xb0] sm:$0xf]  ;;  %239 = vst [vmem:[%s1320_s27 + $0x50] sm:$0xf] %v238_v20  ;;  %241 = vst [vmem:[%s1320_s27 + $0x54] sm:$0xf] %v240_v21 }
  0x1e   : > { %243 = vst [vmem:[%s1320_s27 + $0x58] sm:$0xf] %v242_v22  ;;  %v244_v23 = vld [vmem:[%s1316_s26 + $0xb8] sm:$0xf]  ;;  %v246_v24 = vld [vmem:[%s1316_s26 + $0xc0] sm:$0xf] }
  0x1f   : > { %v248_v25 = vld [vmem:[%s1316_s26 + $0xc8] sm:$0xf]  ;;  %245 = vst [vmem:[%s1320_s27 + $0x5c] sm:$0xf] %v244_v23  ;;  %247 = vst [vmem:[%s1320_s27 + $0x60] sm:$0xf] %v246_v24 }
  0x20   : > { %249 = vst [vmem:[%s1320_s27 + $0x64] sm:$0xf] %v248_v25  ;;  %v250_v26 = vld [vmem:[%s1316_s26 + $0xd0] sm:$0xf]  ;;  %v252_v27 = vld [vmem:[%s1316_s26 + $0xd8] sm:$0xf] }
  0x21   : > { %v254_v28 = vld [vmem:[%s1316_s26 + $0xe0] sm:$0xf]  ;;  %251 = vst [vmem:[%s1320_s27 + $0x68] sm:$0xf] %v250_v26  ;;  %253 = vst [vmem:[%s1320_s27 + $0x6c] sm:$0xf] %v252_v27 }
  0x22   : > { %255 = vst [vmem:[%s1320_s27 + $0x70] sm:$0xf] %v254_v28  ;;  %v256_v29 = vld [vmem:[%s1316_s26 + $0xe8] sm:$0xf]  ;;  %v258_v30 = vld [vmem:[%s1316_s26 + $0xf0] sm:$0xf] }
  0x23   : > { %v260_v31 = vld [vmem:[%s1316_s26 + $0xf8] sm:$0xf]  ;;  %257 = vst [vmem:[%s1320_s27 + $0x74] sm:$0xf] %v256_v29  ;;  %259 = vst [vmem:[%s1320_s27 + $0x78] sm:$0xf] %v258_v30 }
  0x24   : > { %261 = vst [vmem:[%s1320_s27 + $0x7c] sm:$0xf] %v260_v31  ;;  %v262_v32 = vld [vmem:[%s1316_s26 + $0x100] sm:$0xf]  ;;  %v264_v33 = vld [vmem:[%s1316_s26 + $0x108] sm:$0xf] }
  0x25   : > { %v266_v34 = vld [vmem:[%s1316_s26 + $0x110] sm:$0xf]  ;;  %263 = vst [vmem:[%s1320_s27 + $0x80] sm:$0xf] %v262_v32  ;;  %265 = vst [vmem:[%s1320_s27 + $0x84] sm:$0xf] %v264_v33 }
  0x26   : > { %267 = vst [vmem:[%s1320_s27 + $0x88] sm:$0xf] %v266_v34  ;;  %v268_v35 = vld [vmem:[%s1316_s26 + $0x118] sm:$0xf]  ;;  %v270_v36 = vld [vmem:[%s1316_s26 + $0x120] sm:$0xf] }
  0x27   : > { %v272_v37 = vld [vmem:[%s1316_s26 + $0x128] sm:$0xf]  ;;  %269 = vst [vmem:[%s1320_s27 + $0x8c] sm:$0xf] %v268_v35  ;;  %271 = vst [vmem:[%s1320_s27 + $0x90] sm:$0xf] %v270_v36 }
  0x28   : > { %273 = vst [vmem:[%s1320_s27 + $0x94] sm:$0xf] %v272_v37  ;;  %v274_v38 = vld [vmem:[%s1316_s26 + $0x130] sm:$0xf]  ;;  %v276_v39 = vld [vmem:[%s1316_s26 + $0x138] sm:$0xf] }
  0x29   : > { %v278_v40 = vld [vmem:[%s1316_s26 + $0x140] sm:$0xf]  ;;  %275 = vst [vmem:[%s1320_s27 + $0x98] sm:$0xf] %v274_v38  ;;  %277 = vst [vmem:[%s1320_s27 + $0x9c] sm:$0xf] %v276_v39 }
  0x2a   : > { %279 = vst [vmem:[%s1320_s27 + $0xa0] sm:$0xf] %v278_v40  ;;  %v280_v41 = vld [vmem:[%s1316_s26 + $0x148] sm:$0xf]  ;;  %v282_v42 = vld [vmem:[%s1316_s26 + $0x150] sm:$0xf] }
  0x2b   : > { %v284_v43 = vld [vmem:[%s1316_s26 + $0x158] sm:$0xf]  ;;  %281 = vst [vmem:[%s1320_s27 + $0xa4] sm:$0xf] %v280_v41  ;;  %283 = vst [vmem:[%s1320_s27 + $0xa8] sm:$0xf] %v282_v42 }
  0x2c   : > { %285 = vst [vmem:[%s1320_s27 + $0xac] sm:$0xf] %v284_v43  ;;  %v286_v44 = vld [vmem:[%s1316_s26 + $0x160] sm:$0xf]  ;;  %v288_v45 = vld [vmem:[%s1316_s26 + $0x168] sm:$0xf] }
  0x2d   : > { %v290_v46 = vld [vmem:[%s1316_s26 + $0x170] sm:$0xf]  ;;  %287 = vst [vmem:[%s1320_s27 + $0xb0] sm:$0xf] %v286_v44  ;;  %289 = vst [vmem:[%s1320_s27 + $0xb4] sm:$0xf] %v288_v45 }
  0x2e   : > { %291 = vst [vmem:[%s1320_s27 + $0xb8] sm:$0xf] %v290_v46  ;;  %v292_v47 = vld [vmem:[%s1316_s26 + $0x178] sm:$0xf]  ;;  %v294_v48 = vld [vmem:[%s1316_s26 + $0x180] sm:$0xf] }
  0x2f   : > { %v296_v49 = vld [vmem:[%s1316_s26 + $0x188] sm:$0xf]  ;;  %293 = vst [vmem:[%s1320_s27 + $0xbc] sm:$0xf] %v292_v47  ;;  %295 = vst [vmem:[%s1320_s27 + $0xc0] sm:$0xf] %v294_v48 }
  0x30   : > { %297 = vst [vmem:[%s1320_s27 + $0xc4] sm:$0xf] %v296_v49  ;;  %v298_v50 = vld [vmem:[%s1316_s26 + $0x190] sm:$0xf]  ;;  %v300_v51 = vld [vmem:[%s1316_s26 + $0x198] sm:$0xf] }
  0x31   : > { %v302_v52 = vld [vmem:[%s1316_s26 + $0x1a0] sm:$0xf]  ;;  %299 = vst [vmem:[%s1320_s27 + $0xc8] sm:$0xf] %v298_v50  ;;  %301 = vst [vmem:[%s1320_s27 + $0xcc] sm:$0xf] %v300_v51 }
  0x32   : > { %303 = vst [vmem:[%s1320_s27 + $0xd0] sm:$0xf] %v302_v52  ;;  %v304_v53 = vld [vmem:[%s1316_s26 + $0x1a8] sm:$0xf]  ;;  %v306_v54 = vld [vmem:[%s1316_s26 + $0x1b0] sm:$0xf] }
  0x33   : > { %v308_v55 = vld [vmem:[%s1316_s26 + $0x1b8] sm:$0xf]  ;;  %305 = vst [vmem:[%s1320_s27 + $0xd4] sm:$0xf] %v304_v53  ;;  %307 = vst [vmem:[%s1320_s27 + $0xd8] sm:$0xf] %v306_v54 }
  0x34   : > { %309 = vst [vmem:[%s1320_s27 + $0xdc] sm:$0xf] %v308_v55  ;;  %v310_v56 = vld [vmem:[%s1316_s26 + $0x1c0] sm:$0xf]  ;;  %v312_v57 = vld [vmem:[%s1316_s26 + $0x1c8] sm:$0xf] }
  0x35   : > { %v314_v58 = vld [vmem:[%s1316_s26 + $0x1d0] sm:$0xf]  ;;  %311 = vst [vmem:[%s1320_s27 + $0xe0] sm:$0xf] %v310_v56  ;;  %313 = vst [vmem:[%s1320_s27 + $0xe4] sm:$0xf] %v312_v57 }
  0x36   : > { %315 = vst [vmem:[%s1320_s27 + $0xe8] sm:$0xf] %v314_v58  ;;  %v316_v59 = vld [vmem:[%s1316_s26 + $0x1d8] sm:$0xf]  ;;  %v318_v60 = vld [vmem:[%s1316_s26 + $0x1e0] sm:$0xf] }
  0x37   : > { %v320_v61 = vld [vmem:[%s1316_s26 + $0x1e8] sm:$0xf]  ;;  %317 = vst [vmem:[%s1320_s27 + $0xec] sm:$0xf] %v316_v59  ;;  %319 = vst [vmem:[%s1320_s27 + $0xf0] sm:$0xf] %v318_v60 }
  0x38   : > { %321 = vst [vmem:[%s1320_s27 + $0xf4] sm:$0xf] %v320_v61  ;;  %v322_v62 = vld [vmem:[%s1316_s26 + $0x1f0] sm:$0xf]  ;;  %v324_v63 = vld [vmem:[%s1316_s26 + $0x1f8] sm:$0xf] }
  0x39   : > { %323 = vst [vmem:[%s1320_s27 + $0xf8] sm:$0xf] %v322_v62  ;;  %325 = vst [vmem:[%s1320_s27 + $0xfc] sm:$0xf] %v324_v63 }
  0x3a PF: > { %p1051_p6 = scmp.ge.s32.totalorder %s1251_s16, 1  ;;  %p482_p7 = scmp.lt.s32.totalorder %s1251_s16, 3 }
  0x3c   : > { %p483_p8 = pnand %p1051_p6, %p482_p7 }
  0x3d   : > { %s489_s28 = sand.u32 (!%p483_p8), 1, %s1235_s12   ;;  %p538_p9 = scmp.lt.s32.totalorder (!%p483_p8), %s1243_s14, 1 }
  0x3e   : > { %486 = sbr.rel (%p483_p8) target bundleno = 308 (0x134), region = 69  ;;  %s1052_s6 = sshll.u32 (!%p483_p8), %s489_s28, 8 }
  0x3f   : > { %s1465_s7 = scalar_lea.vmem (!%p483_p8), [#allocation3], %s1052_s6 }
  0x43   : > { %v1454_v0 = vld [vmem:[%s1526_s0] sm:$0xff]  ;;  %v1459_v1 = vld [vmem:[%s1526_s0 + $0x8] sm:$0xff]  ;;  %v1177_v4 = vld [vmem:[%s1465_s7 + $0x78] sm:$0xff]   ;;  %s1537_s14 = smov (!%p538_p9, %s1243_s14), 1 }
  0x44   : > { %v1055_v2 = vcombine.high %v1454_v0, %v1454_v0  ;;  %v1057_v3 = vcombine.high %v1459_v1, %v1459_v1  ;;  %v1178_v5 = vld [vmem:[%s1465_s7 + $0xf8] sm:$0xff]   ;;  %1093 = vmatprep.subr.bf16.mxu0 %v1177_v4  ;;  %v1181_v8 = vld [vmem:[%s1465_s7 + $0x70] sm:$0xff]   ;;  %v1185_v12 = vld [vmem:[%s1465_s7 + $0x68] sm:$0xff]   ;;  %v1054_v36 = vcombine.low %v1454_v0, %v1454_v0  ;;  %v1056_v37 = vcombine.low %v1459_v1, %v1459_v1  ;;  %s540_s10 = scalar_lea.vmem %s1528_s2, %s1537_s14  ;;  %s1053_s11 = sshll.u32 %s1537_s14, 2 }
  0x45   : > { %v1179_v6 = vld [vmem:[%s1465_s7 + $0x38] sm:$0xff]   ;;  %1115 = vmatprep.subr.bf16.mxu1 %v1178_v5  ;;  %v1182_v9 = vld [vmem:[%s1465_s7 + $0xf0] sm:$0xff]   ;;  %v1186_v13 = vld [vmem:[%s1465_s7 + $0xe8] sm:$0xff]   ;;  %s548_s19 = scalar_lea.vmem %s1529_s3, %s1053_s11 }
  0x46   : > { %860 = vmatprep.mubr.bf16.mxu0 %v1055_v2  ;;  %900 = vmatprep.mubr.bf16.mxu1 %v1057_v3  ;;  %v1180_v7 = vld [vmem:[%s1465_s7 + $0xb8] sm:$0xff]   ;;  %v1183_v10 = vld [vmem:[%s1465_s7 + $0x30] sm:$0xff]   ;;  %v1187_v14 = vld [vmem:[%s1465_s7 + $0x28] sm:$0xff]  }
  0x47   : > { %1094 = vmatpush3.bf16.msra.mxu0 %v1179_v6  ;;  %1116 = vmatpush3.bf16.msra.mxu1 %v1180_v7  ;;  %v1184_v11 = vld [vmem:[%s1465_s7 + $0xb0] sm:$0xff]   ;;  %v1188_v15 = vld [vmem:[%s1465_s7 + $0xa8] sm:$0xff]   ;;  %v1189_v16 = vld [vmem:[%s1465_s7 + $0x60] sm:$0xff]  }
  0x48   : > { %1095 = vmatprep.subr.bf16.mxu0 %v1181_v8  ;;  %1117 = vmatprep.subr.bf16.mxu1 %v1182_v9  ;;  %v1190_v17 = vld [vmem:[%s1465_s7 + $0xe0] sm:$0xff]   ;;  %v1193_v20 = vld [vmem:[%s1465_s7 + $0x58] sm:$0xff]   ;;  %v1197_v24 = vld [vmem:[%s1465_s7 + $0x50] sm:$0xff]  }
  0x49   : > { %v1191_v18 = vld [vmem:[%s1465_s7 + $0x20] sm:$0xff]   ;;  %v1194_v21 = vld [vmem:[%s1465_s7 + $0xd8] sm:$0xff]   ;;  %v1198_v25 = vld [vmem:[%s1465_s7 + $0xd0] sm:$0xff]  }
  0x4a   : > { %v1192_v19 = vld [vmem:[%s1465_s7 + $0xa0] sm:$0xff]   ;;  %v1195_v22 = vld [vmem:[%s1465_s7 + $0x18] sm:$0xff]   ;;  %v1199_v26 = vld [vmem:[%s1465_s7 + $0x10] sm:$0xff]  }
  0x4b   : > { %1096 = vmatpush3.bf16.msra.mxu0 %v1183_v10  ;;  %1118 = vmatpush3.bf16.msra.mxu1 %v1184_v11  ;;  %v1196_v23 = vld [vmem:[%s1465_s7 + $0x98] sm:$0xff]   ;;  %v1200_v27 = vld [vmem:[%s1465_s7 + $0x90] sm:$0xff]   ;;  %v1201_v28 = vld [vmem:[%s1465_s7 + $0x48] sm:$0xff]  }
  0x4c   : > { %1097 = vmatprep.subr.bf16.mxu0 %v1185_v12  ;;  %1119 = vmatprep.subr.bf16.mxu1 %v1186_v13  ;;  %v1202_v29 = vld [vmem:[%s1465_s7 + $0xc8] sm:$0xff]   ;;  %v1205_v32 = vld [vmem:[%s1465_s7 + $0x40] sm:$0xff]  }
  0x4d   : > { %v1203_v30 = vld [vmem:[%s1465_s7 + $0x8] sm:$0xff]   ;;  %v1206_v33 = vld [vmem:[%s1465_s7 + $0xc0] sm:$0xff]  }
  0x4e   : > { %v1204_v31 = vld [vmem:[%s1465_s7 + $0x88] sm:$0xff]   ;;  %v1207_v34 = vld [vmem:[%s1465_s7] sm:$0xff]  }
  0x4f   : > { %1098 = vmatpush3.bf16.msra.mxu0 %v1187_v14  ;;  %1120 = vmatpush3.bf16.msra.mxu1 %v1188_v15  ;;  %v1208_v35 = vld [vmem:[%s1465_s7 + $0x80] sm:$0xff]  }
  0x50   : > { %1099 = vmatprep.subr.bf16.mxu0 %v1189_v16  ;;  %1121 = vmatprep.subr.bf16.mxu1 %v1190_v17  ;;  %v1090_v45 = vld [vmem:[%s540_s10] ss:$0 sm:$0xff] }
  0x53   : > { %1100 = vmatpush3.bf16.msra.mxu0 %v1191_v18  ;;  %1122 = vmatpush3.bf16.msra.mxu1 %v1192_v19 }
  0x54   : > { %1101 = vmatprep.subr.bf16.mxu0 %v1193_v20  ;;  %1123 = vmatprep.subr.bf16.mxu1 %v1194_v21 }
  0x57   : > { %1102 = vmatpush3.bf16.msra.mxu0 %v1195_v22  ;;  %1124 = vmatpush3.bf16.msra.mxu1 %v1196_v23 }
  0x58   : > { %1103 = vmatprep.subr.bf16.mxu0 %v1197_v24  ;;  %1125 = vmatprep.subr.bf16.mxu1 %v1198_v25 }
  0x5b   : > { %1104 = vmatpush3.bf16.msra.mxu0 %v1199_v26  ;;  %1126 = vmatpush3.bf16.msra.mxu1 %v1200_v27 }
  0x5c   : > { %1105 = vmatprep.subr.bf16.mxu0 %v1201_v28  ;;  %1127 = vmatprep.subr.bf16.mxu1 %v1202_v29 }
  0x5f   : > { %1106 = vmatpush3.bf16.msra.mxu0 %v1203_v30  ;;  %1128 = vmatpush3.bf16.msra.mxu1 %v1204_v31 }
  0x60   : > { %1107 = vmatprep.subr.bf16.mxu0 %v1205_v32  ;;  %1129 = vmatprep.subr.bf16.mxu1 %v1206_v33 }
  0x63   : > { %1108 = vmatpush3.bf16.msra.mxu0 %v1207_v34  ;;  %1130 = vmatpush3.bf16.msra.mxu1 %v1208_v35 }
  0x66   : > { %861 = vmatmul.mubr.bf16.vlgmr.msra.gmra.mxu0 %v1054_v36  ;;  %901 = vmatmul.mubr.bf16.vlgmr.msra.gmra.mxu1 %v1056_v37 }
 0x126   : > { %v1109_v38 = vpop.f32.mrf.mxu0  ;;  %v1131_v39 = vpop.f32.mrf.mxu1 }
 0x128   : > { %v1110_v40 = vpop.f32.mrf.mxu0  ;;  %v1132_v42 = vpop.f32.mrf.mxu1 }
 0x129   : > { %v1111_v41 = vadd.f32 %v1110_v40, %v1109_v38  ;;  %v1133_v43 = vadd.f32 %v1132_v42, %v1131_v39 }
 0x12a   : > { %v1112_v44 = vpop.f32.mrf.mxu0  ;;  %v1134_v46 = vpop.f32.mrf.mxu1 }
 0x12b   : > { %v903_v47 = vadd.f32 %v1133_v43, %v1111_v41 }
 0x12c   : > { %v1113_v48 = vpop.f32.mrf.mxu0  ;;  %v1135_v49 = vpop.f32.mrf.mxu1 }
 0x12d   : > { %v921_v50 = vadd.f32 %v1090_v45, %v903_v47 }
 0x12f   : > { %v922_v51 = vmax.f32 %v921_v50, 0.0 }
 0x131   : > { %v923_v52 = vpack.c.bf16 %v922_v51, %v922_v51 }
 0x133   : > { %924 = vst [vmem:[%s548_s19] sm:$0xf] %v923_v52 }
 0x134 PF: > { %s13_s16 = sadd.s32 1, %s1251_s16   ;;  %s1530_s12 = smov %s1239_s13 }
 0x135   : > { %p10_p10 = scmp.ge.s32.totalorder %s13_s16, 4   ;;  %s1531_s13 = smov %s1308_s20 }
 0x136   : > { %s1532_s14 = smov %s1247_s15  ;;  %s1533_s15 = smov %s1535_s17 }
 0x137   :  { %12 = sbr.rel (!%p10_p10) target bundleno = 3 (0x3), region = 122 }

// kernel: forward.14
= control target key start
LH: loop header
LB: loop body
LE: loop exit
PB: predicated region body
PF: predicated region fallthrough
CT: control target
= control target key end

     0   :  { %v297_v6 = vmov 1966171168   ;;  %v67_v8 = vlaneseq  ;;  %vm19_vm0 = vcmask 254976   ;;  %v298_v26 = vmov 0.0   ;;  %s376_s1 = inlined_call_operand.vmem [shape: bf16[256,32], index: 1, kind: input, shape index: {}]   ;;  %s377_s0 = inlined_call_operand.vmem [shape: bf16[2,256], index: 0, kind: input, shape index: {}]   ;;  %s378_s2 = inlined_call_operand.vmem [shape: f32[1,32], index: 2, kind: input, shape index: {}]   ;;  %s379_s3 = inlined_call_operand.vmem [shape: bf16[2,32], index: 3, kind: output, shape index: {}]  }
   0x1   :  { %v281_v0 = vld [vmem:[%s376_s1 + $0x78] sm:$0xff]   ;;  %v283_v2 = vld [vmem:[%s376_s1 + $0x70] sm:$0xff]   ;;  %v285_v4 = vld [vmem:[%s376_s1 + $0x68] sm:$0xff]   ;;  %v65_v7 = vunpack.c.l.s4 %v297_v6  ;;  %20 = vst.msk [vmem:[#allocation2] sm:$0x3] %vm19_vm0, %v298_v26  ;;  %vm233_vm1 = vcmask 253952  }
   0x2   :  { %v282_v1 = vld [vmem:[%s376_s1 + $0x38] sm:$0xff]   ;;  %257 = vmatprep.subr.bf16.mxu0 %v281_v0  ;;  %v284_v3 = vld [vmem:[%s376_s1 + $0x30] sm:$0xff]   ;;  %v286_v5 = vld [vmem:[%s376_s1 + $0x28] sm:$0xff]   ;;  %v68_v12 = vshrl.u32 %v67_v8, 7 }
   0x3   :  { %258 = vmatpush3.bf16.msra.mxu0 %v282_v1  ;;  %v287_v9 = vld [vmem:[%s376_s1 + $0x60] sm:$0xff]   ;;  %v66_v11 = vunpack.c.0.s8 %v65_v7  ;;  %v289_v13 = vld [vmem:[%s376_s1 + $0x58] sm:$0xff]   ;;  %v291_v16 = vld [vmem:[%s376_s1 + $0x50] sm:$0xff]  }
   0x4   :  { %259 = vmatprep.subr.bf16.mxu0 %v283_v2  ;;  %v288_v10 = vld [vmem:[%s376_s1 + $0x20] sm:$0xff]   ;;  %v290_v14 = vld [vmem:[%s376_s1 + $0x18] sm:$0xff]   ;;  %v292_v19 = vld [vmem:[%s376_s1 + $0x10] sm:$0xff]  }
   0x5   :  { %v69_v15 = vsub.s32 %v66_v11, %v68_v12  ;;  %v239_v17 = vld.sshfl [vmem:[%s377_s0] sm:$0x11 pattern:$0x75316420]  ;;  %v293_v21 = vld [vmem:[%s376_s1 + $0x48] sm:$0xff]  }
   0x6   :  { %v63_v18 = vcombine.high %v239_v17, %v239_v17  ;;  %v294_v22 = vld [vmem:[%s376_s1 + $0x8] sm:$0xff]   ;;  %v295_v23 = vld [vmem:[%s376_s1 + $0x40] sm:$0xff]  }
   0x7   :  { %260 = vmatpush3.bf16.msra.mxu0 %v284_v3  ;;  %v296_v24 = vld [vmem:[%s376_s1] sm:$0xff]   ;;  %v70_v25 = vrot.slane %v239_v17, %v69_v15 }
   0x8   :  { %261 = vmatprep.subr.bf16.mxu0 %v285_v4  ;;  %v77_v20 = vrot.slane %v63_v18, %v69_v15  ;;  %v21_v28 = vld [vmem:[#allocation2] sm:$0x3] }
   0x9   :  { %v256_v34 = vld [vmem:[%s378_s2] ss:$0 sm:$0xff] }
   0xa   :  { %208 = vmatprep.mubr.bf16.mxu0 %v77_v20 }
   0xb   :  { %262 = vmatpush3.bf16.msra.mxu0 %v286_v5 }
   0xc   :  { %263 = vmatprep.subr.bf16.mxu0 %v287_v9 }
   0xf   :  { %264 = vmatpush3.bf16.msra.mxu0 %v288_v10 }
  0x10   :  { %265 = vmatprep.subr.bf16.mxu0 %v289_v13 }
  0x13   :  { %266 = vmatpush3.bf16.msra.mxu0 %v290_v14 }
  0x14   :  { %267 = vmatprep.subr.bf16.mxu0 %v291_v16 }
  0x17   :  { %268 = vmatpush3.bf16.msra.mxu0 %v292_v19 }
  0x18   :  { %269 = vmatprep.subr.bf16.mxu0 %v293_v21 }
  0x1b   :  { %270 = vmatpush3.bf16.msra.mxu0 %v294_v22 }
  0x1c   :  { %271 = vmatprep.subr.bf16.mxu0 %v295_v23 }
  0x1f   :  { %272 = vmatpush3.bf16.msra.mxu0 %v296_v24 }
  0x22   :  { %209 = vmatmul.mubr.bf16.vlgmr.msra.gmra.mxu0 %v70_v25 }
  0xe2   :  { %v273_v27 = vpop.f32.mrf.mxu0 }
  0xe4   :  { %v274_v29 = vpop.f32.mrf.mxu0 }
  0xe5   :  { %v275_v30 = vadd.f32 %v274_v29, %v273_v27 }
  0xe6   :  { %v276_v31 = vpop.f32.mrf.mxu0 }
  0xe7   :  { %v216_v32 = vadd.f32 %v275_v30, %v21_v28 }
  0xe8   :  { %v277_v33 = vpop.f32.mrf.mxu0 }
  0xe9   :  { %218 = vst.msk [vmem:[#allocation2] sm:$0x3] %vm19_vm0, %v216_v32 }
  0xf0   :  { %v222_v35 = vld [vmem:[#allocation2] sm:$0x3] }
  0xf1   :  { %v230_v36 = vadd.f32 %v256_v34, %v222_v35 }
  0xf3   :  { %v231_v37 = vmax.f32 %v230_v36, 0.0 }
  0xf5   :  { %v232_v38 = vpack.c.bf16 %v231_v37, %v231_v37 }
  0xf7   :  { %234 = vst.msk [vmem:[%s379_s3] sm:$0x1] %vm233_vm1, %v232_v38 }

// kernel: forward.15
= control target key start
LH: loop header
LB: loop body
LE: loop exit
PB: predicated region body
PF: predicated region fallthrough
CT: control target
= control target key end

     0   :  { %v157_v1 = vmov 0.0   ;;  %vm158_vm0 = vmmov 0   ;;  %vm20_vm1 = vcmask 254976   ;;  %s198_s0 = inlined_call_operand.vmem [shape: bf16[2,32], index: 0, kind: input, shape index: {}]   ;;  %s199_s1 = inlined_call_operand.vmem [shape: bf16[32,32], index: 1, kind: input, shape index: {}]   ;;  %s200_s2 = inlined_call_operand.vmem [shape: f32[1,32], index: 2, kind: input, shape index: {}]   ;;  %s201_s3 = inlined_call_operand.hbm [shape: f32[2,32], index: 3, kind: output, shape index: {}]  }
   0x1   :  { %v133_v0 = vld [vmem:[%s199_s1 + $0x8] sm:$0xff]   ;;  %122 = vmatprep.subr.bf16.mxu0 %v157_v1  ;;  %v134_v2 = vld [vmem:[%s199_s1] sm:$0xff]   ;;  %126 = vmatprep.mubr.msk.bf16.mxu0 %vm158_vm0, %v157_v1 }
   0x2   :  { %123 = vmatpush3.bf16.msra.mxu0 %v133_v0 }
   0x3   :  { %8 = vsyncpa [#allocation4], 0  ;;  %124 = vmatprep.subr.bf16.mxu0 %v157_v1  ;;  %21 = vst.msk [vmem:[#allocation2] sm:$0x3] %vm20_vm1, %v157_v1  ;;  %v23_v3 = vld [vmem:[%s198_s0] sm:$0x1] }
   0x4   :  { %vm40_vm2 = vcmask 261120   ;;  %v118_v10 = vld [vmem:[%s200_s2] ss:$0 sm:$0xff]  ;;  %s159_s19 = smov [#allocation3]  }
   0x5   :  { %s107_s20 = sshll.u32 %s159_s19, 4  ;;  %s108_s20 = int_to_ptr.vmem [resolvable:$true] %s107_s20 }
   0x6   :  { %125 = vmatpush3.bf16.msra.mxu0 %v134_v2  ;;  %s135_s0 = scalar_lea.vmem %s108_s20, 32  ;;  %p140_p1 = scmp.lt.s32.totalorder %s108_s20, %s108_s20 }
   0x7   :  { %p136_p0 = scmp.ne.s32.totalorder %s108_s20, %s135_s0  ;;  %p141_p2 = scmp.lt.s32.totalorder %s135_s0, %s135_s0 }
   0x9   :  { %127 = vmatmul.mubr.msk.bf16.vlgmr.msra.gmra.mxu0 %vm40_vm2, %v23_v3  ;;  %p142_p3 = por %p141_p2, %p140_p1 }
   0xa   :  { %v22_v4 = vld [vmem:[#allocation2] sm:$0x3] }
   0xb   :  { %p143_p4 = pnand %p142_p3, %p136_p0 }
  0xc9   :  { %v78_v5 = vpop.f32.mrf.mxu0 }
  0xca   :  { %v84_v6 = vadd.f32 %v78_v5, %v22_v4 }
  0xcb   :  { %v128_v7 = vpop.f32.mrf.mxu0 }
  0xcc   :  { %86 = vst.msk [vmem:[#allocation2] sm:$0x3] %vm20_vm1, %v84_v6 }
  0xcd   :  { %v81_v8 = vpop.f32.mrf.mxu0 }
  0xcf   :  { %v129_v9 = vpop.f32.mrf.mxu0 }
  0xd3   :  { %v90_v11 = vld [vmem:[#allocation2] sm:$0x3] }
  0xd4   :  { %v98_v12 = vadd.f32 %v118_v10, %v90_v11 }
  0xd6   :  { %v99_v13 = vmax.f32 %v98_v12, 0.0 }
  0xd8   :  { %100 = vst.msk [vmem:[#allocation3] sm:$0x3] %vm20_vm1, %v99_v13 }
  0xd9   :  { %146 = shalt.err (!%p143_p4)
}
  0xda   :  { %110 = dma.vmem_to_hbm [thread:$0]  %s108_s20, 32, %s201_s3, [#allocation4]  }
  0xdb   :  { %155 = dma.done.wait [#allocation4], 32  }
  0xdc   :  { %156 = vsyncadd [#allocation4], 4294967264 }
  0xdd   :  { %114 = vsyncpa [#allocation4], 1 }

</bundles_post_ra>
